<compile_context>
chip_gen: v7x
topology: tpu7x:2x2x1
jax: 0.10.0
libtpu: 0.0.40
codegen_flags: <defaults>
</compile_context>

<pallas_src>
import functools

import jax
import jax.numpy as jnp
from jax.experimental import pallas as pl
from jax.experimental.pallas import tpu as pltpu


NEG_SLOPE = 0.01  # nn.LeakyReLU default negative_slope


def _leaky(y):
    return jnp.where(y > 0, y, NEG_SLOPE * y)


# ----------------------------------------------------------------------------
# Fused bottleneck kernel (b_tile images per grid step, NCHW / (C, H*W) layout)
# ----------------------------------------------------------------------------
def _med_conv_block_kernel(x_ref, w1_ref, b1_ref, w2_ref, b2_ref, w3_ref,
                           b3_ref, m_ref, o_ref, buf_ref, *, W, HW, med,
                           b_tile):
    """Per-program shapes:
         x_ref  : (b_tile, C, HW)   f32   input (NCHW, spatial flattened)
         w1_ref : (med, C)          bf16  conv1 weight * bn1 scale
         b1_ref : (med, 1)          f32   bn1 bias
         w2_ref : (med, 9*med)      bf16  conv2 taps concatenated * bn2 scale
         b2_ref : (med, 1)          f32   bn2 bias
         w3_ref : (C, med)          bf16  conv3 weight * bn3 scale
         b3_ref : (C, 1)            f32   bn3 bias
         m_ref  : (9, HW)           f32   0/1 boundary masks per 3x3 tap
         o_ref  : (b_tile, C, HW)   f32 or bf16 output
         buf_ref: (9*med, HW)       bf16  VMEM im2col scratch
    """
    for b in range(b_tile):
        # conv1 (1x1) + BN1 + LeakyReLU  ->  (med, HW) f32
        x_bf = x_ref[b].astype(jnp.bfloat16)                    # MXU feed
        y1 = jnp.dot(w1_ref[...], x_bf, preferred_element_type=jnp.float32)
        y1 = _leaky(y1 + b1_ref[...])

        # Build the 9 shifted taps (im2col rows) via lane rolls + masks.
        # Tap t = dy*3+dx reads y1 at flattened index p + (dy-1)*W + (dx-1);
        # the mask zeroes out-of-image positions (this IS the zero padding).
        for t in range(9):
            dy, dx = divmod(t, 3)
            off = (dy - 1) * W + (dx - 1)
            tap = y1 if off == 0 else pltpu.roll(y1, shift=(-off) % HW, axis=1)
            if t != 4:                                          # center: all-valid
                tap = tap * m_ref[pl.ds(t, 1), :]
            buf_ref[pl.ds(t * med, med), :] = tap.astype(jnp.bfloat16)

        # conv2 (3x3, pad=1) as a single K=9*med dot + BN2 + LeakyReLU
        y2 = jnp.dot(w2_ref[...], buf_ref[...],
                     preferred_element_type=jnp.float32)
        y2 = _leaky(y2 + b2_ref[...])

        # conv3 (1x1) + BN3 + f32 residual + LeakyReLU
        y3 = jnp.dot(w3_ref[...], y2.astype(jnp.bfloat16),
                     preferred_element_type=jnp.float32)
        y3 = y3 + b3_ref[...] + x_ref[b]                        # f32 residual
        o_ref[b] = _leaky(y3).astype(o_ref.dtype)


# ----------------------------------------------------------------------------
# Wrapper: BN folding, mask precompute, pallas_call (no activation transposes)
# ----------------------------------------------------------------------------
def _fold_bn(gamma, beta, mean, var, eps):
    s = gamma / jnp.sqrt(var + eps)
    return s, beta - mean * s


def med_conv_block_forward(x_nchw, params, *, out_dtype=jnp.float32,
                           b_tile=None):
    """x_nchw: (B, C, H, W) float32 (PyTorch layout).  Returns (B, C, H, W).

    out_dtype=jnp.bfloat16 halves HBM writeback (use when the consumer accepts
    bf16); default f32 matches the PyTorch module's output dtype.
    """
    B, C, H, W = x_nchw.shape
    med = C // 4
    HW = H * W
    assert C % 4 == 0
    if b_tile is None:
        # >=2 images per step when possible, but keep >=2 grid steps for v7x.
        b_tile = 2 if (B % 2 == 0 and B >= 4) else 1
    assert B % b_tile == 0

    s1, t1 = _fold_bn(params["bn1_g"], params["bn1_b"], params["bn1_m"],
                      params["bn1_v"], params["eps"])
    s2, t2 = _fold_bn(params["bn2_g"], params["bn2_b"], params["bn2_m"],
                      params["bn2_v"], params["eps"])
    s3, t3 = _fold_bn(params["bn3_g"], params["bn3_b"], params["bn3_m"],
                      params["bn3_v"], params["eps"])

    # PyTorch OIHW conv weights -> left-multiply matrices, BN scale folded.
    w1 = (params["conv1_w"][:, :, 0, 0] * s1[:, None]).astype(jnp.bfloat16)
    w2 = (jnp.transpose(params["conv2_w"], (0, 2, 3, 1))                 # (med,3,3,med)
          * s2[:, None, None, None]).reshape(med, 9 * med).astype(jnp.bfloat16)
    w3 = (params["conv3_w"][:, :, 0, 0] * s3[:, None]).astype(jnp.bfloat16)
    b1 = t1.reshape(med, 1).astype(jnp.float32)
    b2 = t2.reshape(med, 1).astype(jnp.float32)
    b3 = t3.reshape(C, 1).astype(jnp.float32)

    # Precompute 0/1 boundary masks for the 9 taps (constant folded under jit).
    hh = jnp.repeat(jnp.arange(H, dtype=jnp.int32), W)
    ww = jnp.tile(jnp.arange(W, dtype=jnp.int32), H)
    mask_rows = []
    for dy in (-1, 0, 1):
        hv = (hh + dy >= 0) & (hh + dy < H)
        for dx in (-1, 0, 1):
            wv = (ww + dx >= 0) & (ww + dx < W)
            mask_rows.append((hv & wv).astype(jnp.float32))
    tap_masks = jnp.stack(mask_rows)                                      # (9, HW)

    # NCHW in, NCHW out: only free reshapes, no transpose HBM passes.
    x = x_nchw.reshape(B, C, HW)

    flops = 2 * B * HW * med * (2 * C + 9 * med)
    bytes_accessed = (x.size * 4 + B * C * HW * jnp.dtype(out_dtype).itemsize
                      + (w1.size + w2.size + w3.size) * 2
                      + (b1.size + b2.size + b3.size + tap_masks.size) * 4)

    kernel = functools.partial(_med_conv_block_kernel, W=W, HW=HW, med=med,
                               b_tile=b_tile)
    out = pl.pallas_call(
        kernel,
        out_shape=jax.ShapeDtypeStruct((B, C, HW), out_dtype),
        grid=(B // b_tile,),
        in_specs=[
            pl.BlockSpec((b_tile, C, HW), lambda i: (i, 0, 0)),
            pl.BlockSpec((med, C), lambda i: (0, 0)),
            pl.BlockSpec((med, 1), lambda i: (0, 0)),
            pl.BlockSpec((med, 9 * med), lambda i: (0, 0)),
            pl.BlockSpec((med, 1), lambda i: (0, 0)),
            pl.BlockSpec((C, med), lambda i: (0, 0)),
            pl.BlockSpec((C, 1), lambda i: (0, 0)),
            pl.BlockSpec((9, HW), lambda i: (0, 0)),
        ],
        out_specs=pl.BlockSpec((b_tile, C, HW), lambda i: (i, 0, 0)),
        scratch_shapes=[pltpu.VMEM((9 * med, HW), jnp.bfloat16)],
        compiler_params=pltpu.CompilerParams(
            dimension_semantics=("parallel",)),
        cost_estimate=pl.CostEstimate(flops=int(flops), transcendentals=0,
                                      bytes_accessed=int(bytes_accessed)),
    )(x, w1, b1, w2, b2, w3, b3, tap_masks)

    return out.reshape(B, C, H, W)


# ----------------------------------------------------------------------------
# Pure-JAX reference (mirrors the kernel's bf16 quantization points)
# ----------------------------------------------------------------------------
def med_conv_block_reference(x_nchw, params):
    B, C, H, W = x_nchw.shape
    med = C // 4
    f32 = jnp.float32

    s1, t1 = _fold_bn(params["bn1_g"], params["bn1_b"], params["bn1_m"],
                      params["bn1_v"], params["eps"])
    s2, t2 = _fold_bn(params["bn2_g"], params["bn2_b"], params["bn2_m"],
                      params["bn2_v"], params["eps"])
    s3, t3 = _fold_bn(params["bn3_g"], params["bn3_b"], params["bn3_m"],
                      params["bn3_v"], params["eps"])
    w1 = (params["conv1_w"][:, :, 0, 0] * s1[:, None]).astype(jnp.bfloat16)
    w2 = (params["conv2_w"] * s2[:, None, None, None]).astype(jnp.bfloat16)
    w3 = (params["conv3_w"][:, :, 0, 0] * s3[:, None]).astype(jnp.bfloat16)

    x = x_nchw.astype(f32)
    y1 = jnp.einsum("mc,bchw->bmhw", w1, x.astype(jnp.bfloat16),
                    preferred_element_type=f32)
    y1 = _leaky(y1 + t1[None, :, None, None])
    y1p = jnp.pad(y1, ((0, 0), (0, 0), (1, 1), (1, 1)))
    acc = jnp.zeros((B, med, H, W), f32)
    for dy in range(3):
        for dx in range(3):
            tap = y1p[:, :, dy:dy + H, dx:dx + W].astype(jnp.bfloat16)
            acc = acc + jnp.einsum("nm,bmhw->bnhw", w2[:, :, dy, dx], tap,
                                   preferred_element_type=f32)
    y2 = _leaky(acc + t2[None, :, None, None])
    y3 = jnp.einsum("cm,bmhw->bchw", w3, y2.astype(jnp.bfloat16),
                    preferred_element_type=f32)
    y3 = y3 + t3[None, :, None, None] + x
    return _leaky(y3)


# ----------------------------------------------------------------------------
# Main
# ----------------------------------------------------------------------------
if __name__ == "__main__":
    # inplanes = 128 -> med_planes = 32 ; H*W = 256 is lane-dense.
    # B=4 exercises b_tile=2 images/step while keeping 2 parallel grid steps.
    B, C, H, W = 4, 128, 16, 16
    med = C // 4

    key = jax.random.PRNGKey(0)
    ks = jax.random.split(key, 16)

    def conv_init(k, cout, cin, kh, kw):
        fan_in = cin * kh * kw
        return jax.random.normal(k, (cout, cin, kh, kw),
                                 jnp.float32) * (2.0 / fan_in) ** 0.5

    params = dict(
        eps=1e-6,
        conv1_w=conv_init(ks[0], med, C, 1, 1),
        conv2_w=conv_init(ks[1], med, med, 3, 3),
        conv3_w=conv_init(ks[2], C, med, 1, 1),
        bn1_g=1.0 + 0.1 * jax.random.normal(ks[3], (med,), jnp.float32),
        bn1_b=0.1 * jax.random.normal(ks[4], (med,), jnp.float32),
        bn1_m=0.1 * jax.random.normal(ks[5], (med,), jnp.float32),
        bn1_v=0.5 + jax.random.uniform(ks[6], (med,), jnp.float32),
        bn2_g=1.0 + 0.1 * jax.random.normal(ks[7], (med,), jnp.float32),
        bn2_b=0.1 * jax.random.normal(ks[8], (med,), jnp.float32),
        bn2_m=0.1 * jax.random.normal(ks[9], (med,), jnp.float32),
        bn2_v=0.5 + jax.random.uniform(ks[10], (med,), jnp.float32),
        bn3_g=1.0 + 0.1 * jax.random.normal(ks[11], (C,), jnp.float32),
        bn3_b=0.1 * jax.random.normal(ks[12], (C,), jnp.float32),
        bn3_m=0.1 * jax.random.normal(ks[13], (C,), jnp.float32),
        bn3_v=0.5 + jax.random.uniform(ks[14], (C,), jnp.float32),
    )
    x = jax.random.normal(ks[15], (B, C, H, W), jnp.float32)

    ref = med_conv_block_reference(x, params)

    # f32 output (PyTorch dtype parity).
    fwd_f32 = jax.jit(functools.partial(med_conv_block_forward,
                                        out_dtype=jnp.float32))
    out_f32 = jax.block_until_ready(fwd_f32(x, params))
    assert out_f32.shape == (B, C, H, W) and out_f32.dtype == jnp.float32
    err_f32 = float(jnp.max(jnp.abs(out_f32 - ref)))
    assert err_f32 < 2e-2, f"f32 output max abs error too large: {err_f32}"

    # bf16 output (halved HBM writeback, per perf review).
    fwd_bf16 = jax.jit(functools.partial(med_conv_block_forward,
                                         out_dtype=jnp.bfloat16))
    out_bf16 = jax.block_until_ready(fwd_bf16(x, params))
    assert out_bf16.shape == (B, C, H, W) and out_bf16.dtype == jnp.bfloat16
    err_bf16 = float(jnp.max(jnp.abs(out_bf16.astype(jnp.float32) - ref)))
    assert err_bf16 < 6e-2, f"bf16 output max abs error too large: {err_bf16}"

    print("KERNEL_OK")
</pallas_src>

<mosaic_0001>
module attributes {stable_mosaic.version = 11 : i64} {
  func.func @_med_conv_block_kernel(%arg0: i32, %arg1: memref<2x128x256xf32, #tpu.memory_space<vmem>>, %arg2: memref<32x128xbf16, #tpu.memory_space<vmem>>, %arg3: memref<32x1xf32, #tpu.memory_space<vmem>>, %arg4: memref<32x288xbf16, #tpu.memory_space<vmem>>, %arg5: memref<32x1xf32, #tpu.memory_space<vmem>>, %arg6: memref<128x32xbf16, #tpu.memory_space<vmem>>, %arg7: memref<128x1xf32, #tpu.memory_space<vmem>>, %arg8: memref<9x256xf32, #tpu.memory_space<vmem>>, %arg9: memref<2x128x256xf32, #tpu.memory_space<vmem>>, %arg10: memref<288x256xbf16, #tpu.memory_space<vmem>>) attributes {dimension_semantics = [#tpu.dimension_semantics<parallel>], iteration_bounds = array<i64: 2>, scalar_prefetch = 0 : i64, scratch_operands = 1 : i64, tpu.core_type = #tpu.core_type<tc>, window_params = [{transform_indices = @transform_0, window_bounds = array<i64: 2, 128, 256>}, {pipeline_mode = #tpu.pipeline_mode<synchronous>, transform_indices = @transform_1, window_bounds = array<i64: 32, 128>}, {pipeline_mode = #tpu.pipeline_mode<synchronous>, transform_indices = @transform_2, window_bounds = array<i64: 32, 1>}, {pipeline_mode = #tpu.pipeline_mode<synchronous>, transform_indices = @transform_3, window_bounds = array<i64: 32, 288>}, {pipeline_mode = #tpu.pipeline_mode<synchronous>, transform_indices = @transform_4, window_bounds = array<i64: 32, 1>}, {pipeline_mode = #tpu.pipeline_mode<synchronous>, transform_indices = @transform_5, window_bounds = array<i64: 128, 32>}, {pipeline_mode = #tpu.pipeline_mode<synchronous>, transform_indices = @transform_6, window_bounds = array<i64: 128, 1>}, {pipeline_mode = #tpu.pipeline_mode<synchronous>, transform_indices = @transform_7, window_bounds = array<i64: 9, 256>}, {transform_indices = @transform_8, window_bounds = array<i64: 2, 128, 256>}]} {
    %c0 = arith.constant 0 : index
    %c0_0 = arith.constant 0 : index
    %c0_1 = arith.constant 0 : index
    %0 = vector.load %arg1[%c0, %c0_0, %c0_1] : memref<2x128x256xf32, #tpu.memory_space<vmem>>, vector<1x128x256xf32>
    %1 = vector.shape_cast %0 : vector<1x128x256xf32> to vector<128x256xf32>
    %2 = arith.truncf %1 : vector<128x256xf32> to vector<128x256xbf16>
    %c0_2 = arith.constant 0 : index
    %c0_3 = arith.constant 0 : index
    %3 = vector.load %arg2[%c0_2, %c0_3] : memref<32x128xbf16, #tpu.memory_space<vmem>>, vector<32x128xbf16>
    %cst = arith.constant dense<0.000000e+00> : vector<32x256xf32>
    %4 = tpu.matmul %3, %2, %cst {dimension_numbers = #tpu.dot_dimension_numbers<[1], [0], [0], [1], [0, 0, 1, 1], [], []>} : vector<32x128xbf16>, vector<128x256xbf16>, vector<32x256xf32> -> vector<32x256xf32>
    %c0_4 = arith.constant 0 : index
    %c0_5 = arith.constant 0 : index
    %5 = vector.load %arg3[%c0_4, %c0_5] : memref<32x1xf32, #tpu.memory_space<vmem>>, vector<32x1xf32>
    %6 = vector.broadcast %5 : vector<32x1xf32> to vector<32x256xf32>
    %7 = arith.addf %4, %6 : vector<32x256xf32>
    %cst_6 = arith.constant 0.000000e+00 : f32
    %8 = vector.broadcast %cst_6 : f32 to vector<32x256xf32>
    %9 = arith.cmpf ogt, %7, %8 : vector<32x256xf32>
    %cst_7 = arith.constant 0.00999999977 : f32
    %10 = vector.broadcast %cst_7 : f32 to vector<32x256xf32>
    %11 = arith.mulf %10, %7 : vector<32x256xf32>
    %12 = arith.select %9, %7, %11 : vector<32x256xi1>, vector<32x256xf32>
    %c17_i32 = arith.constant 17 : i32
    %13 = tpu.dynamic_rotate %12 by %c17_i32 dim 1 : vector<32x256xf32>, i32 -> vector<32x256xf32>
    %c0_8 = arith.constant 0 : index
    %c0_9 = arith.constant 0 : index
    %14 = vector.load %arg8[%c0_8, %c0_9] : memref<9x256xf32, #tpu.memory_space<vmem>>, vector<1x256xf32>
    %15 = vector.broadcast %14 : vector<1x256xf32> to vector<32x256xf32>
    %16 = arith.mulf %13, %15 : vector<32x256xf32>
    %17 = arith.truncf %16 : vector<32x256xf32> to vector<32x256xbf16>
    %c0_10 = arith.constant 0 : index
    %c0_11 = arith.constant 0 : index
    %18 = vector.load %arg10[%c0_10, %c0_11] : memref<288x256xbf16, #tpu.memory_space<vmem>>, vector<32x256xbf16>
    tpu.vector_store %arg10[%c0_10, %c0_11], %17 {strides = array<i32>} : memref<288x256xbf16, #tpu.memory_space<vmem>>, vector<32x256xbf16>,
    %c16_i32 = arith.constant 16 : i32
    %19 = tpu.dynamic_rotate %12 by %c16_i32 dim 1 : vector<32x256xf32>, i32 -> vector<32x256xf32>
    %c1 = arith.constant 1 : index
    %c0_12 = arith.constant 0 : index
    %20 = vector.load %arg8[%c1, %c0_12] : memref<9x256xf32, #tpu.memory_space<vmem>>, vector<1x256xf32>
    %21 = vector.broadcast %20 : vector<1x256xf32> to vector<32x256xf32>
    %22 = arith.mulf %19, %21 : vector<32x256xf32>
    %23 = arith.truncf %22 : vector<32x256xf32> to vector<32x256xbf16>
    %c32 = arith.constant 32 : index
    %c0_13 = arith.constant 0 : index
    %24 = vector.load %arg10[%c32, %c0_13] : memref<288x256xbf16, #tpu.memory_space<vmem>>, vector<32x256xbf16>
    tpu.vector_store %arg10[%c32, %c0_13], %23 {strides = array<i32>} : memref<288x256xbf16, #tpu.memory_space<vmem>>, vector<32x256xbf16>,
    %c15_i32 = arith.constant 15 : i32
    %25 = tpu.dynamic_rotate %12 by %c15_i32 dim 1 : vector<32x256xf32>, i32 -> vector<32x256xf32>
    %c2 = arith.constant 2 : index
    %c0_14 = arith.constant 0 : index
    %26 = vector.load %arg8[%c2, %c0_14] : memref<9x256xf32, #tpu.memory_space<vmem>>, vector<1x256xf32>
    %27 = vector.broadcast %26 : vector<1x256xf32> to vector<32x256xf32>
    %28 = arith.mulf %25, %27 : vector<32x256xf32>
    %29 = arith.truncf %28 : vector<32x256xf32> to vector<32x256xbf16>
    %c64 = arith.constant 64 : index
    %c0_15 = arith.constant 0 : index
    %30 = vector.load %arg10[%c64, %c0_15] : memref<288x256xbf16, #tpu.memory_space<vmem>>, vector<32x256xbf16>
    tpu.vector_store %arg10[%c64, %c0_15], %29 {strides = array<i32>} : memref<288x256xbf16, #tpu.memory_space<vmem>>, vector<32x256xbf16>,
    %c1_i32 = arith.constant 1 : i32
    %31 = tpu.dynamic_rotate %12 by %c1_i32 dim 1 : vector<32x256xf32>, i32 -> vector<32x256xf32>
    %c3 = arith.constant 3 : index
    %c0_16 = arith.constant 0 : index
    %32 = vector.load %arg8[%c3, %c0_16] : memref<9x256xf32, #tpu.memory_space<vmem>>, vector<1x256xf32>
    %33 = vector.broadcast %32 : vector<1x256xf32> to vector<32x256xf32>
    %34 = arith.mulf %31, %33 : vector<32x256xf32>
    %35 = arith.truncf %34 : vector<32x256xf32> to vector<32x256xbf16>
    %c96 = arith.constant 96 : index
    %c0_17 = arith.constant 0 : index
    %36 = vector.load %arg10[%c96, %c0_17] : memref<288x256xbf16, #tpu.memory_space<vmem>>, vector<32x256xbf16>
    tpu.vector_store %arg10[%c96, %c0_17], %35 {strides = array<i32>} : memref<288x256xbf16, #tpu.memory_space<vmem>>, vector<32x256xbf16>,
    %37 = arith.truncf %12 : vector<32x256xf32> to vector<32x256xbf16>
    %c128 = arith.constant 128 : index
    %c0_18 = arith.constant 0 : index
    %38 = vector.load %arg10[%c128, %c0_18] : memref<288x256xbf16, #tpu.memory_space<vmem>>, vector<32x256xbf16>
    tpu.vector_store %arg10[%c128, %c0_18], %37 {strides = array<i32>} : memref<288x256xbf16, #tpu.memory_space<vmem>>, vector<32x256xbf16>,
    %c255_i32 = arith.constant 255 : i32
    %39 = tpu.dynamic_rotate %12 by %c255_i32 dim 1 : vector<32x256xf32>, i32 -> vector<32x256xf32>
    %c5 = arith.constant 5 : index
    %c0_19 = arith.constant 0 : index
    %40 = vector.load %arg8[%c5, %c0_19] : memref<9x256xf32, #tpu.memory_space<vmem>>, vector<1x256xf32>
    %41 = vector.broadcast %40 : vector<1x256xf32> to vector<32x256xf32>
    %42 = arith.mulf %39, %41 : vector<32x256xf32>
    %43 = arith.truncf %42 : vector<32x256xf32> to vector<32x256xbf16>
    %c160 = arith.constant 160 : index
    %c0_20 = arith.constant 0 : index
    %44 = vector.load %arg10[%c160, %c0_20] : memref<288x256xbf16, #tpu.memory_space<vmem>>, vector<32x256xbf16>
    tpu.vector_store %arg10[%c160, %c0_20], %43 {strides = array<i32>} : memref<288x256xbf16, #tpu.memory_space<vmem>>, vector<32x256xbf16>,
    %c241_i32 = arith.constant 241 : i32
    %45 = tpu.dynamic_rotate %12 by %c241_i32 dim 1 : vector<32x256xf32>, i32 -> vector<32x256xf32>
    %c6 = arith.constant 6 : index
    %c0_21 = arith.constant 0 : index
    %46 = vector.load %arg8[%c6, %c0_21] : memref<9x256xf32, #tpu.memory_space<vmem>>, vector<1x256xf32>
    %47 = vector.broadcast %46 : vector<1x256xf32> to vector<32x256xf32>
    %48 = arith.mulf %45, %47 : vector<32x256xf32>
    %49 = arith.truncf %48 : vector<32x256xf32> to vector<32x256xbf16>
    %c192 = arith.constant 192 : index
    %c0_22 = arith.constant 0 : index
    %50 = vector.load %arg10[%c192, %c0_22] : memref<288x256xbf16, #tpu.memory_space<vmem>>, vector<32x256xbf16>
    tpu.vector_store %arg10[%c192, %c0_22], %49 {strides = array<i32>} : memref<288x256xbf16, #tpu.memory_space<vmem>>, vector<32x256xbf16>,
    %c240_i32 = arith.constant 240 : i32
    %51 = tpu.dynamic_rotate %12 by %c240_i32 dim 1 : vector<32x256xf32>, i32 -> vector<32x256xf32>
    %c7 = arith.constant 7 : index
    %c0_23 = arith.constant 0 : index
    %52 = vector.load %arg8[%c7, %c0_23] : memref<9x256xf32, #tpu.memory_space<vmem>>, vector<1x256xf32>
    %53 = vector.broadcast %52 : vector<1x256xf32> to vector<32x256xf32>
    %54 = arith.mulf %51, %53 : vector<32x256xf32>
    %55 = arith.truncf %54 : vector<32x256xf32> to vector<32x256xbf16>
    %c224 = arith.constant 224 : index
    %c0_24 = arith.constant 0 : index
    %56 = vector.load %arg10[%c224, %c0_24] : memref<288x256xbf16, #tpu.memory_space<vmem>>, vector<32x256xbf16>
    tpu.vector_store %arg10[%c224, %c0_24], %55 {strides = array<i32>} : memref<288x256xbf16, #tpu.memory_space<vmem>>, vector<32x256xbf16>,
    %c239_i32 = arith.constant 239 : i32
    %57 = tpu.dynamic_rotate %12 by %c239_i32 dim 1 : vector<32x256xf32>, i32 -> vector<32x256xf32>
    %c8 = arith.constant 8 : index
    %c0_25 = arith.constant 0 : index
    %58 = vector.load %arg8[%c8, %c0_25] : memref<9x256xf32, #tpu.memory_space<vmem>>, vector<1x256xf32>
    %59 = vector.broadcast %58 : vector<1x256xf32> to vector<32x256xf32>
    %60 = arith.mulf %57, %59 : vector<32x256xf32>
    %61 = arith.truncf %60 : vector<32x256xf32> to vector<32x256xbf16>
    %c256 = arith.constant 256 : index
    %c0_26 = arith.constant 0 : index
    %62 = vector.load %arg10[%c256, %c0_26] : memref<288x256xbf16, #tpu.memory_space<vmem>>, vector<32x256xbf16>
    tpu.vector_store %arg10[%c256, %c0_26], %61 {strides = array<i32>} : memref<288x256xbf16, #tpu.memory_space<vmem>>, vector<32x256xbf16>,
    %c0_27 = arith.constant 0 : index
    %c0_28 = arith.constant 0 : index
    %63 = vector.load %arg4[%c0_27, %c0_28] : memref<32x288xbf16, #tpu.memory_space<vmem>>, vector<32x288xbf16>
    %c0_29 = arith.constant 0 : index
    %c0_30 = arith.constant 0 : index
    %64 = vector.load %arg10[%c0_29, %c0_30] : memref<288x256xbf16, #tpu.memory_space<vmem>>, vector<288x256xbf16>
    %cst_31 = arith.constant dense<0.000000e+00> : vector<32x256xf32>
    %65 = tpu.matmul %63, %64, %cst_31 {dimension_numbers = #tpu.dot_dimension_numbers<[1], [0], [0], [1], [0, 0, 1, 1], [], []>} : vector<32x288xbf16>, vector<288x256xbf16>, vector<32x256xf32> -> vector<32x256xf32>
    %c0_32 = arith.constant 0 : index
    %c0_33 = arith.constant 0 : index
    %66 = vector.load %arg5[%c0_32, %c0_33] : memref<32x1xf32, #tpu.memory_space<vmem>>, vector<32x1xf32>
    %67 = vector.broadcast %66 : vector<32x1xf32> to vector<32x256xf32>
    %68 = arith.addf %65, %67 : vector<32x256xf32>
    %cst_34 = arith.constant 0.000000e+00 : f32
    %69 = vector.broadcast %cst_34 : f32 to vector<32x256xf32>
    %70 = arith.cmpf ogt, %68, %69 : vector<32x256xf32>
    %cst_35 = arith.constant 0.00999999977 : f32
    %71 = vector.broadcast %cst_35 : f32 to vector<32x256xf32>
    %72 = arith.mulf %71, %68 : vector<32x256xf32>
    %73 = arith.select %70, %68, %72 : vector<32x256xi1>, vector<32x256xf32>
    %c0_36 = arith.constant 0 : index
    %c0_37 = arith.constant 0 : index
    %74 = vector.load %arg6[%c0_36, %c0_37] : memref<128x32xbf16, #tpu.memory_space<vmem>>, vector<128x32xbf16>
    %75 = arith.truncf %73 : vector<32x256xf32> to vector<32x256xbf16>
    %cst_38 = arith.constant dense<0.000000e+00> : vector<128x256xf32>
    %76 = tpu.matmul %74, %75, %cst_38 {dimension_numbers = #tpu.dot_dimension_numbers<[1], [0], [0], [1], [0, 0, 1, 1], [], []>} : vector<128x32xbf16>, vector<32x256xbf16>, vector<128x256xf32> -> vector<128x256xf32>
    %c0_39 = arith.constant 0 : index
    %c0_40 = arith.constant 0 : index
    %77 = vector.load %arg7[%c0_39, %c0_40] : memref<128x1xf32, #tpu.memory_space<vmem>>, vector<128x1xf32>
    %78 = vector.broadcast %77 : vector<128x1xf32> to vector<128x256xf32>
    %79 = arith.addf %76, %78 : vector<128x256xf32>
    %c0_41 = arith.constant 0 : index
    %c0_42 = arith.constant 0 : index
    %c0_43 = arith.constant 0 : index
    %80 = vector.load %arg1[%c0_41, %c0_42, %c0_43] : memref<2x128x256xf32, #tpu.memory_space<vmem>>, vector<1x128x256xf32>
    %81 = vector.shape_cast %80 : vector<1x128x256xf32> to vector<128x256xf32>
    %82 = arith.addf %79, %81 : vector<128x256xf32>
    %cst_44 = arith.constant 0.000000e+00 : f32
    %83 = vector.broadcast %cst_44 : f32 to vector<128x256xf32>
    %84 = arith.cmpf ogt, %82, %83 : vector<128x256xf32>
    %cst_45 = arith.constant 0.00999999977 : f32
    %85 = vector.broadcast %cst_45 : f32 to vector<128x256xf32>
    %86 = arith.mulf %85, %82 : vector<128x256xf32>
    %87 = arith.select %84, %82, %86 : vector<128x256xi1>, vector<128x256xf32>
    %c0_46 = arith.constant 0 : index
    %c0_47 = arith.constant 0 : index
    %c0_48 = arith.constant 0 : index
    %88 = vector.load %arg9[%c0_46, %c0_47, %c0_48] : memref<2x128x256xf32, #tpu.memory_space<vmem>>, vector<1x128x256xf32>
    %89 = vector.shape_cast %88 : vector<1x128x256xf32> to vector<128x256xf32>
    %90 = vector.shape_cast %87 : vector<128x256xf32> to vector<1x128x256xf32>
    tpu.vector_store %arg9[%c0_46, %c0_47, %c0_48], %90 {strides = array<i32>} : memref<2x128x256xf32, #tpu.memory_space<vmem>>, vector<1x128x256xf32>,
    %c1_49 = arith.constant 1 : index
    %c0_50 = arith.constant 0 : index
    %c0_51 = arith.constant 0 : index
    %91 = vector.load %arg1[%c1_49, %c0_50, %c0_51] : memref<2x128x256xf32, #tpu.memory_space<vmem>>, vector<1x128x256xf32>
    %92 = vector.shape_cast %91 : vector<1x128x256xf32> to vector<128x256xf32>
    %93 = arith.truncf %92 : vector<128x256xf32> to vector<128x256xbf16>
    %c0_52 = arith.constant 0 : index
    %c0_53 = arith.constant 0 : index
    %94 = vector.load %arg2[%c0_52, %c0_53] : memref<32x128xbf16, #tpu.memory_space<vmem>>, vector<32x128xbf16>
    %cst_54 = arith.constant dense<0.000000e+00> : vector<32x256xf32>
    %95 = tpu.matmul %94, %93, %cst_54 {dimension_numbers = #tpu.dot_dimension_numbers<[1], [0], [0], [1], [0, 0, 1, 1], [], []>} : vector<32x128xbf16>, vector<128x256xbf16>, vector<32x256xf32> -> vector<32x256xf32>
    %c0_55 = arith.constant 0 : index
    %c0_56 = arith.constant 0 : index
    %96 = vector.load %arg3[%c0_55, %c0_56] : memref<32x1xf32, #tpu.memory_space<vmem>>, vector<32x1xf32>
    %97 = vector.broadcast %96 : vector<32x1xf32> to vector<32x256xf32>
    %98 = arith.addf %95, %97 : vector<32x256xf32>
    %cst_57 = arith.constant 0.000000e+00 : f32
    %99 = vector.broadcast %cst_57 : f32 to vector<32x256xf32>
    %100 = arith.cmpf ogt, %98, %99 : vector<32x256xf32>
    %cst_58 = arith.constant 0.00999999977 : f32
    %101 = vector.broadcast %cst_58 : f32 to vector<32x256xf32>
    %102 = arith.mulf %101, %98 : vector<32x256xf32>
    %103 = arith.select %100, %98, %102 : vector<32x256xi1>, vector<32x256xf32>
    %c17_i32_59 = arith.constant 17 : i32
    %104 = tpu.dynamic_rotate %103 by %c17_i32_59 dim 1 : vector<32x256xf32>, i32 -> vector<32x256xf32>
    %c0_60 = arith.constant 0 : index
    %c0_61 = arith.constant 0 : index
    %105 = vector.load %arg8[%c0_60, %c0_61] : memref<9x256xf32, #tpu.memory_space<vmem>>, vector<1x256xf32>
    %106 = vector.broadcast %105 : vector<1x256xf32> to vector<32x256xf32>
    %107 = arith.mulf %104, %106 : vector<32x256xf32>
    %108 = arith.truncf %107 : vector<32x256xf32> to vector<32x256xbf16>
    %c0_62 = arith.constant 0 : index
    %c0_63 = arith.constant 0 : index
    %109 = vector.load %arg10[%c0_62, %c0_63] : memref<288x256xbf16, #tpu.memory_space<vmem>>, vector<32x256xbf16>
    tpu.vector_store %arg10[%c0_62, %c0_63], %108 {strides = array<i32>} : memref<288x256xbf16, #tpu.memory_space<vmem>>, vector<32x256xbf16>,
    %c16_i32_64 = arith.constant 16 : i32
    %110 = tpu.dynamic_rotate %103 by %c16_i32_64 dim 1 : vector<32x256xf32>, i32 -> vector<32x256xf32>
    %c1_65 = arith.constant 1 : index
    %c0_66 = arith.constant 0 : index
    %111 = vector.load %arg8[%c1_65, %c0_66] : memref<9x256xf32, #tpu.memory_space<vmem>>, vector<1x256xf32>
    %112 = vector.broadcast %111 : vector<1x256xf32> to vector<32x256xf32>
    %113 = arith.mulf %110, %112 : vector<32x256xf32>
    %114 = arith.truncf %113 : vector<32x256xf32> to vector<32x256xbf16>
    %c32_67 = arith.constant 32 : index
    %c0_68 = arith.constant 0 : index
    %115 = vector.load %arg10[%c32_67, %c0_68] : memref<288x256xbf16, #tpu.memory_space<vmem>>, vector<32x256xbf16>
    tpu.vector_store %arg10[%c32_67, %c0_68], %114 {strides = array<i32>} : memref<288x256xbf16, #tpu.memory_space<vmem>>, vector<32x256xbf16>,
    %c15_i32_69 = arith.constant 15 : i32
    %116 = tpu.dynamic_rotate %103 by %c15_i32_69 dim 1 : vector<32x256xf32>, i32 -> vector<32x256xf32>
    %c2_70 = arith.constant 2 : index
    %c0_71 = arith.constant 0 : index
    %117 = vector.load %arg8[%c2_70, %c0_71] : memref<9x256xf32, #tpu.memory_space<vmem>>, vector<1x256xf32>
    %118 = vector.broadcast %117 : vector<1x256xf32> to vector<32x256xf32>
    %119 = arith.mulf %116, %118 : vector<32x256xf32>
    %120 = arith.truncf %119 : vector<32x256xf32> to vector<32x256xbf16>
    %c64_72 = arith.constant 64 : index
    %c0_73 = arith.constant 0 : index
    %121 = vector.load %arg10[%c64_72, %c0_73] : memref<288x256xbf16, #tpu.memory_space<vmem>>, vector<32x256xbf16>
    tpu.vector_store %arg10[%c64_72, %c0_73], %120 {strides = array<i32>} : memref<288x256xbf16, #tpu.memory_space<vmem>>, vector<32x256xbf16>,
    %c1_i32_74 = arith.constant 1 : i32
    %122 = tpu.dynamic_rotate %103 by %c1_i32_74 dim 1 : vector<32x256xf32>, i32 -> vector<32x256xf32>
    %c3_75 = arith.constant 3 : index
    %c0_76 = arith.constant 0 : index
    %123 = vector.load %arg8[%c3_75, %c0_76] : memref<9x256xf32, #tpu.memory_space<vmem>>, vector<1x256xf32>
    %124 = vector.broadcast %123 : vector<1x256xf32> to vector<32x256xf32>
    %125 = arith.mulf %122, %124 : vector<32x256xf32>
    %126 = arith.truncf %125 : vector<32x256xf32> to vector<32x256xbf16>
    %c96_77 = arith.constant 96 : index
    %c0_78 = arith.constant 0 : index
    %127 = vector.load %arg10[%c96_77, %c0_78] : memref<288x256xbf16, #tpu.memory_space<vmem>>, vector<32x256xbf16>
    tpu.vector_store %arg10[%c96_77, %c0_78], %126 {strides = array<i32>} : memref<288x256xbf16, #tpu.memory_space<vmem>>, vector<32x256xbf16>,
    %128 = arith.truncf %103 : vector<32x256xf32> to vector<32x256xbf16>
    %c128_79 = arith.constant 128 : index
    %c0_80 = arith.constant 0 : index
    %129 = vector.load %arg10[%c128_79, %c0_80] : memref<288x256xbf16, #tpu.memory_space<vmem>>, vector<32x256xbf16>
    tpu.vector_store %arg10[%c128_79, %c0_80], %128 {strides = array<i32>} : memref<288x256xbf16, #tpu.memory_space<vmem>>, vector<32x256xbf16>,
    %c255_i32_81 = arith.constant 255 : i32
    %130 = tpu.dynamic_rotate %103 by %c255_i32_81 dim 1 : vector<32x256xf32>, i32 -> vector<32x256xf32>
    %c5_82 = arith.constant 5 : index
    %c0_83 = arith.constant 0 : index
    %131 = vector.load %arg8[%c5_82, %c0_83] : memref<9x256xf32, #tpu.memory_space<vmem>>, vector<1x256xf32>
    %132 = vector.broadcast %131 : vector<1x256xf32> to vector<32x256xf32>
    %133 = arith.mulf %130, %132 : vector<32x256xf32>
    %134 = arith.truncf %133 : vector<32x256xf32> to vector<32x256xbf16>
    %c160_84 = arith.constant 160 : index
    %c0_85 = arith.constant 0 : index
    %135 = vector.load %arg10[%c160_84, %c0_85] : memref<288x256xbf16, #tpu.memory_space<vmem>>, vector<32x256xbf16>
    tpu.vector_store %arg10[%c160_84, %c0_85], %134 {strides = array<i32>} : memref<288x256xbf16, #tpu.memory_space<vmem>>, vector<32x256xbf16>,
    %c241_i32_86 = arith.constant 241 : i32
    %136 = tpu.dynamic_rotate %103 by %c241_i32_86 dim 1 : vector<32x256xf32>, i32 -> vector<32x256xf32>
    %c6_87 = arith.constant 6 : index
    %c0_88 = arith.constant 0 : index
    %137 = vector.load %arg8[%c6_87, %c0_88] : memref<9x256xf32, #tpu.memory_space<vmem>>, vector<1x256xf32>
    %138 = vector.broadcast %137 : vector<1x256xf32> to vector<32x256xf32>
    %139 = arith.mulf %136, %138 : vector<32x256xf32>
    %140 = arith.truncf %139 : vector<32x256xf32> to vector<32x256xbf16>
    %c192_89 = arith.constant 192 : index
    %c0_90 = arith.constant 0 : index
    %141 = vector.load %arg10[%c192_89, %c0_90] : memref<288x256xbf16, #tpu.memory_space<vmem>>, vector<32x256xbf16>
    tpu.vector_store %arg10[%c192_89, %c0_90], %140 {strides = array<i32>} : memref<288x256xbf16, #tpu.memory_space<vmem>>, vector<32x256xbf16>,
    %c240_i32_91 = arith.constant 240 : i32
    %142 = tpu.dynamic_rotate %103 by %c240_i32_91 dim 1 : vector<32x256xf32>, i32 -> vector<32x256xf32>
    %c7_92 = arith.constant 7 : index
    %c0_93 = arith.constant 0 : index
    %143 = vector.load %arg8[%c7_92, %c0_93] : memref<9x256xf32, #tpu.memory_space<vmem>>, vector<1x256xf32>
    %144 = vector.broadcast %143 : vector<1x256xf32> to vector<32x256xf32>
    %145 = arith.mulf %142, %144 : vector<32x256xf32>
    %146 = arith.truncf %145 : vector<32x256xf32> to vector<32x256xbf16>
    %c224_94 = arith.constant 224 : index
    %c0_95 = arith.constant 0 : index
    %147 = vector.load %arg10[%c224_94, %c0_95] : memref<288x256xbf16, #tpu.memory_space<vmem>>, vector<32x256xbf16>
    tpu.vector_store %arg10[%c224_94, %c0_95], %146 {strides = array<i32>} : memref<288x256xbf16, #tpu.memory_space<vmem>>, vector<32x256xbf16>,
    %c239_i32_96 = arith.constant 239 : i32
    %148 = tpu.dynamic_rotate %103 by %c239_i32_96 dim 1 : vector<32x256xf32>, i32 -> vector<32x256xf32>
    %c8_97 = arith.constant 8 : index
    %c0_98 = arith.constant 0 : index
    %149 = vector.load %arg8[%c8_97, %c0_98] : memref<9x256xf32, #tpu.memory_space<vmem>>, vector<1x256xf32>
    %150 = vector.broadcast %149 : vector<1x256xf32> to vector<32x256xf32>
    %151 = arith.mulf %148, %150 : vector<32x256xf32>
    %152 = arith.truncf %151 : vector<32x256xf32> to vector<32x256xbf16>
    %c256_99 = arith.constant 256 : index
    %c0_100 = arith.constant 0 : index
    %153 = vector.load %arg10[%c256_99, %c0_100] : memref<288x256xbf16, #tpu.memory_space<vmem>>, vector<32x256xbf16>
    tpu.vector_store %arg10[%c256_99, %c0_100], %152 {strides = array<i32>} : memref<288x256xbf16, #tpu.memory_space<vmem>>, vector<32x256xbf16>,
    %c0_101 = arith.constant 0 : index
    %c0_102 = arith.constant 0 : index
    %154 = vector.load %arg4[%c0_101, %c0_102] : memref<32x288xbf16, #tpu.memory_space<vmem>>, vector<32x288xbf16>
    %c0_103 = arith.constant 0 : index
    %c0_104 = arith.constant 0 : index
    %155 = vector.load %arg10[%c0_103, %c0_104] : memref<288x256xbf16, #tpu.memory_space<vmem>>, vector<288x256xbf16>
    %cst_105 = arith.constant dense<0.000000e+00> : vector<32x256xf32>
    %156 = tpu.matmul %154, %155, %cst_105 {dimension_numbers = #tpu.dot_dimension_numbers<[1], [0], [0], [1], [0, 0, 1, 1], [], []>} : vector<32x288xbf16>, vector<288x256xbf16>, vector<32x256xf32> -> vector<32x256xf32>
    %c0_106 = arith.constant 0 : index
    %c0_107 = arith.constant 0 : index
    %157 = vector.load %arg5[%c0_106, %c0_107] : memref<32x1xf32, #tpu.memory_space<vmem>>, vector<32x1xf32>
    %158 = vector.broadcast %157 : vector<32x1xf32> to vector<32x256xf32>
    %159 = arith.addf %156, %158 : vector<32x256xf32>
    %cst_108 = arith.constant 0.000000e+00 : f32
    %160 = vector.broadcast %cst_108 : f32 to vector<32x256xf32>
    %161 = arith.cmpf ogt, %159, %160 : vector<32x256xf32>
    %cst_109 = arith.constant 0.00999999977 : f32
    %162 = vector.broadcast %cst_109 : f32 to vector<32x256xf32>
    %163 = arith.mulf %162, %159 : vector<32x256xf32>
    %164 = arith.select %161, %159, %163 : vector<32x256xi1>, vector<32x256xf32>
    %c0_110 = arith.constant 0 : index
    %c0_111 = arith.constant 0 : index
    %165 = vector.load %arg6[%c0_110, %c0_111] : memref<128x32xbf16, #tpu.memory_space<vmem>>, vector<128x32xbf16>
    %166 = arith.truncf %164 : vector<32x256xf32> to vector<32x256xbf16>
    %cst_112 = arith.constant dense<0.000000e+00> : vector<128x256xf32>
    %167 = tpu.matmul %165, %166, %cst_112 {dimension_numbers = #tpu.dot_dimension_numbers<[1], [0], [0], [1], [0, 0, 1, 1], [], []>} : vector<128x32xbf16>, vector<32x256xbf16>, vector<128x256xf32> -> vector<128x256xf32>
    %c0_113 = arith.constant 0 : index
    %c0_114 = arith.constant 0 : index
    %168 = vector.load %arg7[%c0_113, %c0_114] : memref<128x1xf32, #tpu.memory_space<vmem>>, vector<128x1xf32>
    %169 = vector.broadcast %168 : vector<128x1xf32> to vector<128x256xf32>
    %170 = arith.addf %167, %169 : vector<128x256xf32>
    %c1_115 = arith.constant 1 : index
    %c0_116 = arith.constant 0 : index
    %c0_117 = arith.constant 0 : index
    %171 = vector.load %arg1[%c1_115, %c0_116, %c0_117] : memref<2x128x256xf32, #tpu.memory_space<vmem>>, vector<1x128x256xf32>
    %172 = vector.shape_cast %171 : vector<1x128x256xf32> to vector<128x256xf32>
    %173 = arith.addf %170, %172 : vector<128x256xf32>
    %cst_118 = arith.constant 0.000000e+00 : f32
    %174 = vector.broadcast %cst_118 : f32 to vector<128x256xf32>
    %175 = arith.cmpf ogt, %173, %174 : vector<128x256xf32>
    %cst_119 = arith.constant 0.00999999977 : f32
    %176 = vector.broadcast %cst_119 : f32 to vector<128x256xf32>
    %177 = arith.mulf %176, %173 : vector<128x256xf32>
    %178 = arith.select %175, %173, %177 : vector<128x256xi1>, vector<128x256xf32>
    %c1_120 = arith.constant 1 : index
    %c0_121 = arith.constant 0 : index
    %c0_122 = arith.constant 0 : index
    %179 = vector.load %arg9[%c1_120, %c0_121, %c0_122] : memref<2x128x256xf32, #tpu.memory_space<vmem>>, vector<1x128x256xf32>
    %180 = vector.shape_cast %179 : vector<1x128x256xf32> to vector<128x256xf32>
    %181 = vector.shape_cast %178 : vector<128x256xf32> to vector<1x128x256xf32>
    tpu.vector_store %arg9[%c1_120, %c0_121, %c0_122], %181 {strides = array<i32>} : memref<2x128x256xf32, #tpu.memory_space<vmem>>, vector<1x128x256xf32>,
    return
  }
  func.func @transform_0(%arg0: i32) -> (i32, i32, i32) {
    %c0_i32 = arith.constant 0 : i32
    %c0_i32_0 = arith.constant 0 : i32
    %c0_i32_1 = arith.constant 0 : i32
    return %arg0, %c0_i32, %c0_i32_0 : i32, i32, i32
  }
  func.func @transform_1(%arg0: i32) -> (i32, i32) {
    %c0_i32 = arith.constant 0 : i32
    %c0_i32_0 = arith.constant 0 : i32
    %c0_i32_1 = arith.constant 0 : i32
    return %c0_i32, %c0_i32_0 : i32, i32
  }
  func.func @transform_2(%arg0: i32) -> (i32, i32) {
    %c0_i32 = arith.constant 0 : i32
    %c0_i32_0 = arith.constant 0 : i32
    %c0_i32_1 = arith.constant 0 : i32
    return %c0_i32, %c0_i32_0 : i32, i32
  }
  func.func @transform_3(%arg0: i32) -> (i32, i32) {
    %c0_i32 = arith.constant 0 : i32
    %c0_i32_0 = arith.constant 0 : i32
    %c0_i32_1 = arith.constant 0 : i32
    return %c0_i32, %c0_i32_0 : i32, i32
  }
  func.func @transform_4(%arg0: i32) -> (i32, i32) {
    %c0_i32 = arith.constant 0 : i32
    %c0_i32_0 = arith.constant 0 : i32
    %c0_i32_1 = arith.constant 0 : i32
    return %c0_i32, %c0_i32_0 : i32, i32
  }
  func.func @transform_5(%arg0: i32) -> (i32, i32) {
    %c0_i32 = arith.constant 0 : i32
    %c0_i32_0 = arith.constant 0 : i32
    %c0_i32_1 = arith.constant 0 : i32
    return %c0_i32, %c0_i32_0 : i32, i32
  }
  func.func @transform_6(%arg0: i32) -> (i32, i32) {
    %c0_i32 = arith.constant 0 : i32
    %c0_i32_0 = arith.constant 0 : i32
    %c0_i32_1 = arith.constant 0 : i32
    return %c0_i32, %c0_i32_0 : i32, i32
  }
  func.func @transform_7(%arg0: i32) -> (i32, i32) {
    %c0_i32 = arith.constant 0 : i32
    %c0_i32_0 = arith.constant 0 : i32
    %c0_i32_1 = arith.constant 0 : i32
    return %c0_i32, %c0_i32_0 : i32, i32
  }
  func.func @transform_8(%arg0: i32) -> (i32, i32, i32) {
    %c0_i32 = arith.constant 0 : i32
    %c0_i32_0 = arith.constant 0 : i32
    %c0_i32_1 = arith.constant 0 : i32
    return %arg0, %c0_i32, %c0_i32_0 : i32, i32, i32
  }
}

</mosaic_0001>

<bundles_post_ra>
// kernel: med_conv_block_forward.1
= control target key start
LH: loop header
LB: loop body
LE: loop exit
PB: predicated region body
PF: predicated region fallthrough
CT: control target
= control target key end

     0   :  { %s3339_s27 = smov 0   ;;  %s4893_s0 = inlined_call_operand.vmem [shape: f32[4,128,256], index: 0, kind: input, shape index: {}]   ;;  %s4894_s1 = inlined_call_operand.vmem [shape: bf16[32,128], index: 1, kind: input, shape index: {}]   ;;  %s4895_s2 = inlined_call_operand.vmem [shape: f32[32,1], index: 2, kind: input, shape index: {}]   ;;  %s4896_s3 = inlined_call_operand.vmem [shape: bf16[32,288], index: 3, kind: input, shape index: {}]   ;;  %s4897_s4 = inlined_call_operand.vmem [shape: f32[32,1], index: 4, kind: input, shape index: {}]   ;;  %s4898_s5 = inlined_call_operand.vmem [shape: bf16[128,32], index: 5, kind: input, shape index: {}]   ;;  %s4899_s6 = inlined_call_operand.vmem [shape: f32[128,1], index: 6, kind: input, shape index: {}]   ;;  %s4900_s7 = inlined_call_operand.vmem [shape: f32[9,256], index: 7, kind: input, shape index: {}]   ;;  %s4901_s8 = inlined_call_operand.vmem [shape: f32[4,128,256], index: 8, kind: output, shape index: {}]  }
   0x1 LB: > { %s3009_s28 = sadd.s32 4294967295, %s3283_s27   ;;  %p3013_p0 = scmp.ge.s32.totalorder %s3283_s27, 1  ;;  %s3283_s27 = sphi %s3339_s27, %s18_s27  }
   0x2   : > { %p264_p1 = scmp.lt.s32.totalorder %s3283_s27, 3 }
   0x4   : > { %p265_p2 = pnand %p3013_p0, %p264_p1 }
   0x6   : > { %268 = sbr.rel (%p265_p2) target bundleno = 1791 (0x6ff), region = 52 }
   0xd   : > { %s3014_s29 = sshll.u32 %s3009_s28, 1  ;;  %v4902_v0 = vmov 0   ;;  %v3352_v1 = vld [vmem:[%s4895_s2] sm:$0xff]  ;;  %v3357_v2 = vld [vmem:[%s4895_s2 + $0x8] sm:$0xff]  ;;  %v3366_v3 = vld [vmem:[%s4895_s2 + $0x10] sm:$0xff]  ;;  %s3286_s24 = smov 17  }
   0xe   : > { %p301_p3 = scmp.lt.s32.totalorder %s3014_s29, 3  ;;  %435 = vmatprep.mubr.bf16.mxu0 %v4902_v0  ;;  %3239 = vset.pattern.permute.xlu0 %v4902_v0  ;;  %v3371_v4 = vld [vmem:[%s4895_s2 + $0x18] sm:$0xff]  ;;  %v3241_v53 = vld [vmem:[%s4894_s1] sm:$0xff]   ;;  %v3242_v54 = vld [vmem:[%s4894_s1 + $0x8] sm:$0xff]   ;;  %s3287_s25 = smov 16  }
   0xf   : > { %3240 = vset.pattern.permute.xlu1 %v4902_v0  ;;  %373 = vperm.xlu0 %3239, %v3352_v1   ;;  %s3288_s26 = smov 15   ;;  %s3289_s28 = smov 1  }
  0x10   : > { %s4985_s29 = smov (!%p301_p3, %s3014_s29), 3  ;;  %383 = vperm.xlu1 %3240, %v3366_v3   ;;  %s3290_s30 = smov 127  }
  0x11   : > { %s3184_s16 = sshll.u32 %s4985_s29, 8  ;;  %s3291_s9 = smov 113  }
  0x12   : > { %s3380_s19 = scalar_lea.vmem %s4893_s0, %s3184_s16  ;;  %s3292_s10 = smov 112  }
  0x13   : > { %v316_v5 = vld [vmem:[%s3380_s19 + $0x8] sm:$0xff]  ;;  %v318_v6 = vld [vmem:[%s3380_s19 + $0x18] sm:$0xff]  ;;  %v315_v7 = vld [vmem:[%s3380_s19] sm:$0xff]  ;;  %378 = vperm.xlu0 %3239, %v3357_v2   ;;  %s3293_s13 = smov 111   ;;  %s4643_s17 = scalar_lea.vmem %s4901_s8, %s3184_s16 }
  0x14   : > { %v348_v8 = vpack.c.bf16 %v318_v6, %v316_v5  ;;  %v317_v9 = vld [vmem:[%s3380_s19 + $0x10] sm:$0xff]  ;;  %v320_v10 = vld [vmem:[%s3380_s19 + $0x28] sm:$0xff]  ;;  %v322_v11 = vld [vmem:[%s3380_s19 + $0x38] sm:$0xff]  ;;  %388 = vperm.xlu1 %3240, %v3371_v4  }
  0x15   : > { %v347_v12 = vpack.c.bf16 %v317_v9, %v315_v7  ;;  %v350_v13 = vpack.c.bf16 %v322_v11, %v320_v10  ;;  %v319_v14 = vld [vmem:[%s3380_s19 + $0x20] sm:$0xff]  ;;  %v321_v15 = vld [vmem:[%s3380_s19 + $0x30] sm:$0xff]  ;;  %v324_v16 = vld [vmem:[%s3380_s19 + $0x48] sm:$0xff] }
  0x16   : > { %403 = vmatprep.subr.bf16.mxu0 %v348_v8  ;;  %v326_v17 = vld [vmem:[%s3380_s19 + $0x58] sm:$0xff]  ;;  %v349_v18 = vpack.c.bf16 %v321_v15, %v319_v14  ;;  %v323_v20 = vld [vmem:[%s3380_s19 + $0x40] sm:$0xff]  ;;  %v325_v21 = vld [vmem:[%s3380_s19 + $0x50] sm:$0xff] }
  0x17   : > { %404 = vmatpush1.bf16.msra.mxu0 %v347_v12  ;;  %v352_v19 = vpack.c.bf16 %v326_v17, %v324_v16  ;;  %v328_v22 = vld [vmem:[%s3380_s19 + $0x68] sm:$0xff]  ;;  %v330_v23 = vld [vmem:[%s3380_s19 + $0x78] sm:$0xff]  ;;  %v351_v24 = vpack.c.bf16 %v325_v21, %v323_v20  ;;  %v327_v26 = vld [vmem:[%s3380_s19 + $0x60] sm:$0xff] }
  0x18   : > { %405 = vmatprep.subr.bf16.mxu0 %v350_v13  ;;  %v354_v25 = vpack.c.bf16 %v330_v23, %v328_v22  ;;  %v329_v27 = vld [vmem:[%s3380_s19 + $0x70] sm:$0xff]  ;;  %v332_v28 = vld [vmem:[%s3380_s19 + $0x88] sm:$0xff]  ;;  %v334_v29 = vld [vmem:[%s3380_s19 + $0x98] sm:$0xff] }
  0x19   : > { %v331_v30 = vld [vmem:[%s3380_s19 + $0x80] sm:$0xff]  ;;  %v333_v31 = vld [vmem:[%s3380_s19 + $0x90] sm:$0xff]  ;;  %v353_v32 = vpack.c.bf16 %v329_v27, %v327_v26  ;;  %v336_v33 = vld [vmem:[%s3380_s19 + $0xa8] sm:$0xff]  ;;  %v356_v35 = vpack.c.bf16 %v334_v29, %v332_v28 }
  0x1a   : > { %v338_v34 = vld [vmem:[%s3380_s19 + $0xb8] sm:$0xff]  ;;  %v335_v36 = vld [vmem:[%s3380_s19 + $0xa0] sm:$0xff]  ;;  %v337_v37 = vld [vmem:[%s3380_s19 + $0xb0] sm:$0xff]  ;;  %v355_v38 = vpack.c.bf16 %v333_v31, %v331_v30 }
  0x1b   : > { %406 = vmatpush1.bf16.msra.mxu0 %v349_v18  ;;  %v340_v39 = vld [vmem:[%s3380_s19 + $0xc8] sm:$0xff]  ;;  %v342_v40 = vld [vmem:[%s3380_s19 + $0xd8] sm:$0xff]  ;;  %v358_v41 = vpack.c.bf16 %v338_v34, %v336_v33  ;;  %v339_v42 = vld [vmem:[%s3380_s19 + $0xc0] sm:$0xff]  ;;  %v357_v44 = vpack.c.bf16 %v337_v37, %v335_v36 }
  0x1c   : > { %407 = vmatprep.subr.bf16.mxu0 %v352_v19  ;;  %v341_v43 = vld [vmem:[%s3380_s19 + $0xd0] sm:$0xff]  ;;  %v344_v45 = vld [vmem:[%s3380_s19 + $0xe8] sm:$0xff]  ;;  %v346_v46 = vld [vmem:[%s3380_s19 + $0xf8] sm:$0xff]  ;;  %v360_v47 = vpack.c.bf16 %v342_v40, %v340_v39 }
  0x1d   : > { %v359_v48 = vpack.c.bf16 %v341_v43, %v339_v42  ;;  %v362_v49 = vpack.c.bf16 %v346_v46, %v344_v45  ;;  %v343_v50 = vld [vmem:[%s3380_s19 + $0xe0] sm:$0xff]  ;;  %v345_v51 = vld [vmem:[%s3380_s19 + $0xf0] sm:$0xff]  ;;  %v966_v43 = vld [vmem:[%s4897_s4 + $0x8] sm:$0xff] }
  0x1e   : > { %v361_v52 = vpack.c.bf16 %v345_v51, %v343_v50  ;;  %v965_v40 = vld [vmem:[%s4897_s4] sm:$0xff]  ;;  %v967_v46 = vld [vmem:[%s4897_s4 + $0x10] sm:$0xff]  ;;  %v968_v50 = vld [vmem:[%s4897_s4 + $0x18] sm:$0xff] }
  0x1f   : > { %408 = vmatpush1.bf16.msra.mxu0 %v351_v24  ;;  %v507_v51 = vld [vmem:[%s4900_s7] ss:$8 sm:$0x3] }
  0x20   : > { %409 = vmatprep.subr.bf16.mxu0 %v354_v25 }
  0x23   : > { %410 = vmatpush1.bf16.msra.mxu0 %v353_v32  ;;  %v3245_v32 = vld [vmem:[%s4896_s3 + $0x4] ss:$12 sps:$4 sm:$0xff]  }
  0x24   : > { %411 = vmatprep.subr.bf16.mxu0 %v356_v35  ;;  %1058 = vmatprep.mubr.bf16.mxu1 %v3245_v32 }
  0x27   : > { %412 = vmatpush1.bf16.msra.mxu0 %v355_v38  ;;  %v496_v38 = vlaneseq }
  0x28   : > { %413 = vmatprep.subr.bf16.mxu0 %v358_v41 }
  0x29   : > { %v510_v42 = vshrl.u32 %v496_v38, 7  ;;  %v3589_v45 = vand.u32 127, %v496_v38 }
  0x2b   : > { %414 = vmatpush1.bf16.msra.mxu0 %v357_v44  ;;  %vm498_vm8 = vcmp.lt.s32.totalorder %v3589_v45, 17  ;;  %vm551_vm9 = vcmp.lt.s32.totalorder %v3589_v45, 16  ;;  %vm605_vm10 = vcmp.lt.s32.totalorder %v3589_v45, 15  ;;  %vm659_vm11 = vcmp.lt.s32.totalorder %v3589_v45, 1 }
  0x2c   : > { %415 = vmatprep.subr.bf16.mxu0 %v360_v47  ;;  %vm721_vm12 = vcmp.lt.s32.totalorder %v3589_v45, 127  ;;  %vm775_vm13 = vcmp.lt.s32.totalorder %v3589_v45, 113  ;;  %vm829_vm14 = vcmp.lt.s32.totalorder %v3589_v45, 112  ;;  %vm883_vm15 = vcmp.lt.s32.totalorder %v3589_v45, 111  ;;  %v3268_v45 = vld [vmem:[%s4896_s3 + $0x20] ss:$12 sps:$4 sm:$0xff]  }
  0x2f   : > { %416 = vmatpush1.bf16.msra.mxu0 %v359_v48  ;;  %v3596_v48 = vsub.s32 0, %v510_v42 }
  0x30   : > { %417 = vmatprep.subr.bf16.mxu0 %v362_v49  ;;  %v3598_v49 = vsub.s32 1, %v510_v42 }
  0x33   : > { %418 = vmatpush1.bf16.msra.mxu0 %v361_v52 }
  0x36   : > { %436 = vmatmul.mubr.bf16.vlgmr.msra.gmra.mrb[0].mxu0 %v3241_v53 }
  0x37   : > { %445 = vmatprep.mubr.bf16.mxu0 %v4902_v0 }
  0x3e   : > { %446 = vmatmul.mubr.bf16.gmra.mrb[4].mxu0 %v3242_v54  ;;  %v516_v54 = vrot.slane %v507_v51, %v3598_v49 }
  0x3f   : > { %1368 = vmatprep.mubr.bf16.mxu0 %v4902_v0 }
  0x8e   : > { %v374_v55 = vpop.permute.xlu0 %373 }
  0x8f   : > { %v384_v17 = vpop.permute.xlu1 %383 }
  0x92   : > { %v379_v59 = vpop.permute.xlu0 %378 }
  0x93   : > { %v389_v19 = vpop.permute.xlu1 %388 }
 0x109   : > { %v437_v56 = vpop.f32.mrb[0].mxu0 }
 0x10a   : > { %v438_v57 = vadd.f32 %v437_v56, %v374_v55  ;;  %v439_v58 = vpop.f32.mrb[1].mxu0 }
 0x10b   : > { %v441_v60 = vpop.f32.mrb[2].mxu0  ;;  %v440_v12 = vadd.f32 %v439_v58, %v374_v55  ;;  %v512_v55 = vrot.slane %v507_v51, %v3596_v48 }
 0x10c   : > { %vm456_vm0 = vcmp.gt.f32.partialorder %v438_v57, 0.0  ;;  %v464_v61 = vmul.f32 0.01, %v438_v57  ;;  %v442_v62 = vadd.f32 %v441_v60, %v379_v59  ;;  %v443_v63 = vpop.f32.mrb[3].mxu0 }
 0x10d   : > { %v444_v13 = vadd.f32 %v443_v63, %v379_v59  ;;  %v465_v14 = vmul.f32 0.01, %v440_v12  ;;  %vm457_vm2 = vcmp.gt.f32.partialorder %v440_v12, 0.0 }
 0x10e   : > { %v3424_v5 = vsel %vm456_vm0, %v438_v57, %v464_v61  ;;  %vm458_vm1 = vcmp.gt.f32.partialorder %v442_v62, 0.0  ;;  %v466_v6 = vmul.f32 0.01, %v442_v62  ;;  %vm1019_vm0 = vcmask 261120  }
 0x10f   : > { %480 = vrot.lane.b32.xlu0 %v3424_v5, %s3286_s24  ;;  %v467_v15 = vmul.f32 0.01, %v444_v13  ;;  %vm459_vm3 = vcmp.gt.f32.partialorder %v444_v13, 0.0  ;;  %v3448_v16 = vsel %vm457_vm2, %v440_v12, %v465_v14 }
 0x110   : > { %v3428_v7 = vsel %vm458_vm1, %v442_v62, %v466_v6 }
 0x111   : > { %482 = vrot.lane.b32.xlu1 %v3428_v7, %s3286_s24  ;;  %v447_v8 = vpop.f32.mrb[4].mxu0  ;;  %v3452_v18 = vsel %vm459_vm3, %v444_v13, %v467_v15 }
 0x112   : > { %v449_v9 = vpop.f32.mrb[5].mxu0  ;;  %v448_v20 = vadd.f32 %v447_v8, %v384_v17 }
 0x113   : > { %535 = vrot.lane.b32.xlu0 %v3424_v5, %s3287_s25  ;;  %v451_v10 = vpop.f32.mrb[6].mxu0  ;;  %v450_v26 = vadd.f32 %v449_v9, %v384_v17 }
 0x114   : > { %v453_v11 = vpop.f32.mrb[7].mxu0  ;;  %v452_v21 = vadd.f32 %v451_v10, %v389_v19  ;;  %v468_v22 = vmul.f32 0.01, %v448_v20  ;;  %vm460_vm4 = vcmp.gt.f32.partialorder %v448_v20, 0.0 }
 0x115   : > { %537 = vrot.lane.b32.xlu1 %v3428_v7, %s3287_s25  ;;  %v454_v27 = vadd.f32 %v453_v11, %v389_v19  ;;  %v469_v28 = vmul.f32 0.01, %v450_v26  ;;  %vm461_vm6 = vcmp.gt.f32.partialorder %v450_v26, 0.0 }
 0x116   : > { %v470_v23 = vmul.f32 0.01, %v452_v21  ;;  %vm462_vm5 = vcmp.gt.f32.partialorder %v452_v21, 0.0  ;;  %v3468_v24 = vsel %vm460_vm4, %v448_v20, %v468_v22 }
 0x117   : > { %589 = vrot.lane.b32.xlu0 %v3424_v5, %s3288_s26  ;;  %v471_v29 = vmul.f32 0.01, %v454_v27  ;;  %vm463_vm7 = vcmp.gt.f32.partialorder %v454_v27, 0.0  ;;  %v3488_v30 = vsel %vm461_vm6, %v450_v26, %v469_v28 }
 0x118   : > { %v3472_v25 = vsel %vm462_vm5, %v452_v21, %v470_v23 }
 0x119   : > { %591 = vrot.lane.b32.xlu1 %v3428_v7, %s3288_s26  ;;  %v3492_v31 = vsel %vm463_vm7, %v454_v27, %v471_v29 }
 0x11b   : > { %643 = vrot.lane.b32.xlu0 %v3424_v5, %s3289_s28 }
 0x11d   : > { %645 = vrot.lane.b32.xlu1 %v3428_v7, %s3289_s28 }
 0x11f   : > { %705 = vrot.lane.b32.xlu0 %v3424_v5, %s3290_s30 }
 0x121   : > { %707 = vrot.lane.b32.xlu1 %v3428_v7, %s3290_s30 }
 0x123   : > { %488 = vrot.lane.b32.xlu0 %v3448_v16, %s3286_s24 }
 0x125   : > { %490 = vrot.lane.b32.xlu1 %v3452_v18, %s3286_s24 }
 0x127   : > { %543 = vrot.lane.b32.xlu0 %v3448_v16, %s3287_s25 }
 0x129   : > { %545 = vrot.lane.b32.xlu1 %v3452_v18, %s3287_s25 }
 0x12b   : > { %597 = vrot.lane.b32.xlu0 %v3448_v16, %s3288_s26 }
 0x12d   : > { %599 = vrot.lane.b32.xlu1 %v3452_v18, %s3288_s26 }
 0x12f   : > { %651 = vrot.lane.b32.xlu0 %v3448_v16, %s3289_s28 }
 0x131   : > { %653 = vrot.lane.b32.xlu1 %v3452_v18, %s3289_s28 }
 0x133   : > { %484 = vrot.lane.b32.xlu0 %v3468_v24, %s3286_s24 }
 0x135   : > { %486 = vrot.lane.b32.xlu1 %v3472_v25, %s3286_s24 }
 0x137   : > { %539 = vrot.lane.b32.xlu0 %v3468_v24, %s3287_s25 }
 0x139   : > { %541 = vrot.lane.b32.xlu1 %v3472_v25, %s3287_s25 }
 0x13b   : > { %593 = vrot.lane.b32.xlu0 %v3468_v24, %s3288_s26 }
 0x13d   : > { %595 = vrot.lane.b32.xlu1 %v3472_v25, %s3288_s26 }
 0x13f   : > { %647 = vrot.lane.b32.xlu0 %v3468_v24, %s3289_s28 }
 0x141   : > { %649 = vrot.lane.b32.xlu1 %v3472_v25, %s3289_s28 }
 0x143   : > { %492 = vrot.lane.b32.xlu0 %v3488_v30, %s3286_s24 }
 0x145   : > { %494 = vrot.lane.b32.xlu1 %v3492_v31, %s3286_s24 }
 0x147   : > { %713 = vrot.lane.b32.xlu0 %v3448_v16, %s3290_s30 }
 0x149   : > { %715 = vrot.lane.b32.xlu1 %v3452_v18, %s3290_s30 }
 0x14b   : > { %547 = vrot.lane.b32.xlu0 %v3488_v30, %s3287_s25 }
 0x14d   : > { %549 = vrot.lane.b32.xlu1 %v3492_v31, %s3287_s25 }
 0x14f   : > { %601 = vrot.lane.b32.xlu0 %v3488_v30, %s3288_s26 }
 0x151   : > { %711 = vrot.lane.b32.xlu1 %v3472_v25, %s3290_s30 }
 0x153   : > { %655 = vrot.lane.b32.xlu0 %v3488_v30, %s3289_s28 }
 0x155   : > { %603 = vrot.lane.b32.xlu1 %v3492_v31, %s3288_s26 }
 0x157   : > { %709 = vrot.lane.b32.xlu0 %v3468_v24, %s3290_s30 }
 0x159   : > { %761 = vrot.lane.b32.xlu1 %v3428_v7, %s3291_s9 }
 0x15b   : > { %717 = vrot.lane.b32.xlu0 %v3488_v30, %s3290_s30 }
 0x15d   : > { %657 = vrot.lane.b32.xlu1 %v3492_v31, %s3289_s28 }
 0x15f   : > { %759 = vrot.lane.b32.xlu0 %v3424_v5, %s3291_s9 }
 0x161   : > { %769 = vrot.lane.b32.xlu1 %v3452_v18, %s3291_s9 }
 0x163   : > { %767 = vrot.lane.b32.xlu0 %v3448_v16, %s3291_s9 }
 0x165   : > { %765 = vrot.lane.b32.xlu1 %v3472_v25, %s3291_s9 }
 0x167   : > { %763 = vrot.lane.b32.xlu0 %v3468_v24, %s3291_s9 }
 0x169   : > { %815 = vrot.lane.b32.xlu1 %v3428_v7, %s3292_s10 }
 0x16b   : > { %771 = vrot.lane.b32.xlu0 %v3488_v30, %s3291_s9 }
 0x16d   : > { %719 = vrot.lane.b32.xlu1 %v3492_v31, %s3290_s30 }
 0x16f   : > { %813 = vrot.lane.b32.xlu0 %v3424_v5, %s3292_s10 }
 0x171   : > { %823 = vrot.lane.b32.xlu1 %v3452_v18, %s3292_s10 }
 0x173   : > { %821 = vrot.lane.b32.xlu0 %v3448_v16, %s3292_s10 }
 0x175   : > { %773 = vrot.lane.b32.xlu1 %v3492_v31, %s3291_s9 }
 0x177   : > { %817 = vrot.lane.b32.xlu0 %v3468_v24, %s3292_s10 }
 0x179   : > { %819 = vrot.lane.b32.xlu1 %v3472_v25, %s3292_s10 }
 0x17b   : > { %825 = vrot.lane.b32.xlu0 %v3488_v30, %s3292_s10 }
 0x17d   : > { %827 = vrot.lane.b32.xlu1 %v3492_v31, %s3292_s10 }
 0x17f   : > { %867 = vrot.lane.b32.xlu0 %v3424_v5, %s3293_s13 }
 0x181   : > { %869 = vrot.lane.b32.xlu1 %v3428_v7, %s3293_s13  ;;  %v481_v33 = vpop.permute.xlu0 %480 }
 0x183   : > { %v483_v34 = vpop.permute.xlu1 %482  ;;  %875 = vrot.lane.b32.xlu0 %v3448_v16, %s3293_s13 }
 0x185   : > { %877 = vrot.lane.b32.xlu1 %v3452_v18, %s3293_s13  ;;  %v3563_v35 = vpop.permute.xlu0 %535 }
 0x187   : > { %v3565_v36 = vpop.permute.xlu1 %537  ;;  %871 = vrot.lane.b32.xlu0 %v3468_v24, %s3293_s13 }
 0x189   : > { %873 = vrot.lane.b32.xlu1 %v3472_v25, %s3293_s13  ;;  %v3571_v37 = vpop.permute.xlu0 %589 }
 0x18b   : > { %v3573_v39 = vpop.permute.xlu1 %591  ;;  %879 = vrot.lane.b32.xlu0 %v3488_v30, %s3293_s13 }
 0x18d   : > { %881 = vrot.lane.b32.xlu1 %v3492_v31, %s3293_s13  ;;  %v3582_v41 = vpop.permute.xlu0 %643 }
 0x18f   : > { %v3587_v44 = vpop.permute.xlu1 %645  ;;  %971 = vperm.xlu0 %3239, %v965_v40  }
 0x191   : > { %976 = vperm.xlu1 %3240, %v966_v43   ;;  %v3594_v47 = vpop.permute.xlu0 %705 }
 0x193   : > { %v3606_v52 = vpop.permute.xlu1 %707  ;;  %981 = vperm.xlu0 %3239, %v967_v46  }
 0x195   : > { %986 = vperm.xlu1 %3240, %v968_v50   ;;  %v489_v53 = vpop.permute.xlu0 %488 }
 0x196   : > { %v503_v56 = vsel %vm498_vm8, %v489_v53, %v481_v33  ;;  %v499_v57 = vsel %vm498_vm8, %v481_v33, %v489_v53 }
 0x197   : > { %v491_v58 = vpop.permute.xlu1 %490  ;;  %1700 = vperm.xlu0 %3239, %v3352_v1   ;;  %v520_v62 = vmul.f32 %v516_v54, %v499_v57  ;;  %v519_v6 = vmul.f32 %v512_v55, %v503_v56 }
 0x198   : > { %v504_v59 = vsel %vm498_vm8, %v491_v58, %v483_v34  ;;  %v500_v60 = vsel %vm498_vm8, %v483_v34, %v491_v58 }
 0x199   : > { %1705 = vperm.xlu1 %3240, %v3357_v2   ;;  %v544_v61 = vpop.permute.xlu0 %543  ;;  %v522_v63 = vmul.f32 %v516_v54, %v500_v60  ;;  %v521_v8 = vmul.f32 %v512_v55, %v504_v59 }
 0x19a   : > { %v552_v33 = vsel %vm551_vm9, %v3563_v35, %v544_v61  ;;  %v556_v57 = vsel %vm551_vm9, %v544_v61, %v3563_v35 }
 0x19b   : > { %v546_v9 = vpop.permute.xlu1 %545  ;;  %1710 = vperm.xlu0 %3239, %v3366_v3   ;;  %v528_v10 = vpack.c.bf16 %v522_v63, %v520_v62  ;;  %v527_v11 = vpack.c.bf16 %v521_v8, %v519_v6 }
 0x19c   : > { %v553_v23 = vsel %vm551_vm9, %v3565_v36, %v546_v9  ;;  %v557_v38 = vsel %vm551_vm9, %v546_v9, %v3565_v36  ;;  %v3023_v36 = vld [vmem:[%s4900_s7 + $0x2] ss:$8 sm:$0x3] }
 0x19d   : > { %1715 = vperm.xlu1 %3240, %v3371_v4   ;;  %1026 = vmatprep.subr.bf16.mxu1 %v528_v10  ;;  %v3623_v1 = vpop.permute.xlu0 %597  ;;  %v3022_v4 = vld [vmem:[%s4900_s7 + $0x1] ss:$8 sm:$0x3]  ;;  %v624_v61 = vrot.slane %v3023_v36, %v3598_v49  ;;  %v620_v10 = vrot.slane %v3023_v36, %v3596_v48 }
 0x19e   : > { %1027 = vmatpush1.bf16.msra.mxu1 %v527_v11  ;;  %v570_v27 = vrot.slane %v3022_v4, %v3598_v49  ;;  %v566_v32 = vrot.slane %v3022_v4, %v3596_v48  ;;  %v606_v11 = vsel %vm605_vm10, %v3571_v37, %v3623_v1 }
 0x19f   : > { %v600_v12 = vpop.permute.xlu1 %599 }
 0x1a0   : > { %v576_v40 = vmul.f32 %v570_v27, %v553_v23  ;;  %v574_v58 = vmul.f32 %v570_v27, %v552_v33  ;;  %v575_v59 = vmul.f32 %v566_v32, %v557_v38  ;;  %v611_v4 = vsel %vm605_vm10, %v600_v12, %v3573_v39 }
 0x1a1   : > { %v3625_v13 = vpop.permute.xlu0 %651 }
 0x1a2   : > { %v582_v35 = vpack.c.bf16 %v576_v40, %v574_v58  ;;  %v610_v40 = vsel %vm605_vm10, %v3623_v1, %v3571_v37 }
 0x1a3   : > { %v3627_v2 = vpop.permute.xlu1 %653 }
 0x1a4   : > { %v665_v36 = vsel %vm659_vm11, %v3627_v2, %v3587_v44 }
 0x1a5   : > { %v485_v14 = vpop.permute.xlu0 %484 }
 0x1a7   : > { %v487_v15 = vpop.permute.xlu1 %486 }
 0x1a9   : > { %v540_v17 = vpop.permute.xlu0 %539 }
 0x1ab   : > { %v542_v19 = vpop.permute.xlu1 %541 }
 0x1ad   : > { %v3629_v20 = vpop.permute.xlu0 %593 }
 0x1af   : > { %v3631_v3 = vpop.permute.xlu1 %595 }
 0x1b1   : > { %v3633_v21 = vpop.permute.xlu0 %647 }
 0x1b3   : > { %v3638_v22 = vpop.permute.xlu1 %649 }
 0x1b5   : > { %v493_v26 = vpop.permute.xlu0 %492 }
 0x1b6   : > { %v501_v28 = vsel %vm498_vm8, %v485_v14, %v493_v26  ;;  %v505_v29 = vsel %vm498_vm8, %v493_v26, %v485_v14 }
 0x1b7   : > { %v495_v34 = vpop.permute.xlu1 %494  ;;  %v523_v46 = vmul.f32 %v512_v55, %v505_v29  ;;  %v524_v50 = vmul.f32 %v516_v54, %v501_v28 }
 0x1b8   : > { %v502_v42 = vsel %vm498_vm8, %v487_v15, %v495_v34  ;;  %v506_v43 = vsel %vm498_vm8, %v495_v34, %v487_v15 }
 0x1b9   : > { %v525_v51 = vmul.f32 %v512_v55, %v506_v43  ;;  %v526_v53 = vmul.f32 %v516_v54, %v502_v42  ;;  %v3660_v56 = vpop.permute.xlu0 %713  ;;  %v573_v55 = vmul.f32 %v566_v32, %v556_v57  ;;  %v607_v54 = vsel %vm605_vm10, %v3573_v39, %v600_v12  ;;  %v3024_v12 = vld [vmem:[%s4900_s7 + $0x3] ss:$8 sm:$0x3] }
 0x1ba   : > { %v630_v23 = vmul.f32 %v624_v61, %v607_v54  ;;  %v628_v42 = vmul.f32 %v624_v61, %v606_v11  ;;  %v629_v39 = vmul.f32 %v620_v10, %v611_v4  ;;  %v660_v57 = vsel %vm659_vm11, %v3582_v41, %v3625_v13 }
 0x1bb   : > { %v3668_v60 = vpop.permute.xlu1 %715  ;;  %v530_v62 = vpack.c.bf16 %v526_v53, %v524_v50  ;;  %v529_v63 = vpack.c.bf16 %v525_v51, %v523_v46  ;;  %v581_v15 = vpack.c.bf16 %v575_v59, %v573_v55  ;;  %v678_v50 = vrot.slane %v3024_v12, %v3598_v49 }
 0x1bc   : > { %v636_v1 = vpack.c.bf16 %v630_v23, %v628_v42 }
 0x1bd   : > { %1028 = vmatprep.subr.bf16.mxu1 %v530_v62  ;;  %v548_v6 = vpop.permute.xlu0 %547 }
 0x1be   : > { %v554_v8 = vsel %vm551_vm9, %v540_v17, %v548_v6  ;;  %v558_v9 = vsel %vm551_vm9, %v548_v6, %v540_v17  ;;  %1029 = vmatpush1.bf16.msra.mxu1 %v529_v63 }
 0x1bf   : > { %v550_v14 = vpop.permute.xlu1 %549  ;;  %1030 = vmatprep.subr.bf16.mxu1 %v582_v35  ;;  %v577_v28 = vmul.f32 %v566_v32, %v558_v9  ;;  %v578_v29 = vmul.f32 %v570_v27, %v554_v8  ;;  %v674_v9 = vrot.slane %v3024_v12, %v3596_v48  ;;  %v3025_v12 = vld [vmem:[%s4900_s7 + $0x5] ss:$8 sm:$0x3] }
 0x1c0   : > { %v555_v26 = vsel %vm551_vm9, %v542_v19, %v550_v14  ;;  %v559_v17 = vsel %vm551_vm9, %v550_v14, %v542_v19 }
 0x1c1   : > { %v579_v33 = vmul.f32 %v566_v32, %v559_v17  ;;  %v580_v34 = vmul.f32 %v570_v27, %v555_v26  ;;  %v602_v38 = vpop.permute.xlu0 %601  ;;  %v627_v27 = vmul.f32 %v620_v10, %v610_v40  ;;  %v661_v32 = vsel %vm659_vm11, %v3587_v44, %v3627_v2 }
 0x1c2   : > { %1031 = vmatpush1.bf16.msra.mxu1 %v581_v15  ;;  %v608_v51 = vsel %vm605_vm10, %v3629_v20, %v602_v38  ;;  %v612_v53 = vsel %vm605_vm10, %v602_v38, %v3629_v20  ;;  %v684_v62 = vmul.f32 %v678_v50, %v661_v32  ;;  %v664_v44 = vsel %vm659_vm11, %v3625_v13, %v3582_v41 }
 0x1c3   : > { %v3698_v43 = vpop.permute.xlu1 %711  ;;  %v584_v19 = vpack.c.bf16 %v580_v34, %v578_v29  ;;  %v583_v46 = vpack.c.bf16 %v579_v33, %v577_v28  ;;  %v635_v59 = vpack.c.bf16 %v629_v39, %v627_v27  ;;  %v631_v55 = vmul.f32 %v620_v10, %v612_v53 }
 0x1c4   : > { %v632_v54 = vmul.f32 %v624_v61, %v608_v51  ;;  %v682_v2 = vmul.f32 %v678_v50, %v660_v57  ;;  %v683_v4 = vmul.f32 %v674_v9, %v665_v36  ;;  %v740_v27 = vrot.slane %v3025_v12, %v3598_v49 }
 0x1c5   : > { %1032 = vmatprep.subr.bf16.mxu1 %v584_v19  ;;  %v656_v37 = vpop.permute.xlu0 %655  ;;  %v700_v53 = vpack.c.bf16 %v3492_v31, %v3488_v30  ;;  %v722_v57 = vsel %vm721_vm12, %v3594_v47, %v3660_v56  ;;  %v699_v30 = vpack.c.bf16 %v3472_v25, %v3468_v24 }
 0x1c6   : > { %1033 = vmatpush1.bf16.msra.mxu1 %v583_v46  ;;  %v690_v23 = vpack.c.bf16 %v684_v62, %v682_v2  ;;  %v666_v26 = vsel %vm659_vm11, %v656_v37, %v3633_v21  ;;  %v727_v46 = vsel %vm721_vm12, %v3668_v60, %v3606_v52 }
 0x1c7   : > { %v604_v58 = vpop.permute.xlu1 %603  ;;  %1034 = vmatprep.subr.bf16.mxu1 %v636_v1  ;;  %v685_v29 = vmul.f32 %v674_v9, %v666_v26  ;;  %v736_v1 = vrot.slane %v3025_v12, %v3596_v48 }
 0x1c8   : > { %v609_v63 = vsel %vm605_vm10, %v3631_v3, %v604_v58  ;;  %v613_v20 = vsel %vm605_vm10, %v604_v58, %v3631_v3 }
 0x1c9   : > { %v633_v6 = vmul.f32 %v620_v10, %v613_v20  ;;  %v634_v35 = vmul.f32 %v624_v61, %v609_v63  ;;  %v710_v8 = vpop.permute.xlu0 %709  ;;  %v681_v10 = vmul.f32 %v674_v9, %v664_v44  ;;  %v662_v61 = vsel %vm659_vm11, %v3633_v21, %v656_v37 }
 0x1ca   : > { %1035 = vmatpush1.bf16.msra.mxu1 %v635_v59  ;;  %v686_v33 = vmul.f32 %v678_v50, %v662_v61  ;;  %v726_v37 = vsel %vm721_vm12, %v3660_v56, %v3594_v47  ;;  %v743_v31 = vmul.f32 %v736_v1, %v722_v57 }
 0x1cb   : > { %v3731_v11 = vpop.permute.xlu1 %761  ;;  %v638_v14 = vpack.c.bf16 %v634_v35, %v632_v54  ;;  %v637_v15 = vpack.c.bf16 %v633_v6, %v631_v55  ;;  %v689_v28 = vpack.c.bf16 %v683_v4, %v681_v10  ;;  %v744_v58 = vmul.f32 %v740_v27, %v726_v37 }
 0x1cd   : > { %1036 = vmatprep.subr.bf16.mxu1 %v638_v14  ;;  %v718_v3 = vpop.permute.xlu0 %717 }
 0x1ce   : > { %1037 = vmatpush1.bf16.msra.mxu1 %v637_v15  ;;  %v728_v56 = vsel %vm721_vm12, %v718_v3, %v710_v8 }
 0x1cf   : > { %v658_v41 = vpop.permute.xlu1 %657  ;;  %1038 = vmatprep.subr.bf16.mxu1 %v690_v23 }
 0x1d0   : > { %v663_v13 = vsel %vm659_vm11, %v3638_v22, %v658_v41  ;;  %v667_v17 = vsel %vm659_vm11, %v658_v41, %v3638_v22  ;;  %v698_v22 = vpack.c.bf16 %v3452_v18, %v3448_v16  ;;  %v723_v16 = vsel %vm721_vm12, %v3606_v52, %v3668_v60 }
 0x1d1   : > { %v687_v34 = vmul.f32 %v674_v9, %v667_v17  ;;  %v688_v38 = vmul.f32 %v678_v50, %v663_v13  ;;  %v760_v40 = vpop.permute.xlu0 %759  ;;  %v697_v18 = vpack.c.bf16 %v3428_v7, %v3424_v5  ;;  %v746_v50 = vmul.f32 %v740_v27, %v727_v46  ;;  %v3026_v7 = vld [vmem:[%s4900_s7 + $0x6] ss:$8 sm:$0x3] }
 0x1d2   : > { %1039 = vmatpush1.bf16.msra.mxu1 %v689_v28  ;;  %v745_v59 = vmul.f32 %v736_v1, %v723_v16  ;;  %v724_v5 = vsel %vm721_vm12, %v710_v8, %v718_v3  ;;  %v790_v63 = vrot.slane %v3026_v7, %v3596_v48  ;;  %v794_v20 = vrot.slane %v3026_v7, %v3598_v49 }
 0x1d3   : > { %v770_v42 = vpop.permute.xlu1 %769  ;;  %v692_v21 = vpack.c.bf16 %v688_v38, %v686_v33  ;;  %v691_v39 = vpack.c.bf16 %v687_v34, %v685_v29  ;;  %v752_v47 = vpack.c.bf16 %v746_v50, %v744_v58  ;;  %v747_v62 = vmul.f32 %v736_v1, %v724_v5 }
 0x1d4   : > { %v751_v24 = vpack.c.bf16 %v745_v59, %v743_v31  ;;  %v781_v25 = vsel %vm775_vm13, %v770_v42, %v3731_v11  ;;  %v748_v8 = vmul.f32 %v740_v27, %v728_v56  ;;  %v777_v15 = vsel %vm775_vm13, %v3731_v11, %v770_v42 }
 0x1d5   : > { %1040 = vmatprep.subr.bf16.mxu1 %v692_v21  ;;  %v768_v19 = vpop.permute.xlu0 %767  ;;  %v800_v4 = vmul.f32 %v794_v20, %v781_v25  ;;  %v799_v41 = vmul.f32 %v790_v63, %v777_v15 }
 0x1d6   : > { %1041 = vmatpush1.bf16.msra.mxu1 %v691_v39  ;;  %v780_v60 = vsel %vm775_vm13, %v768_v19, %v760_v40  ;;  %v776_v54 = vsel %vm775_vm13, %v760_v40, %v768_v19 }
 0x1d7   : > { %v3756_v32 = vpop.permute.xlu1 %765  ;;  %1042 = vmatprep.subr.bf16.mxu1 %v698_v22  ;;  %v798_v9 = vmul.f32 %v794_v20, %v780_v60  ;;  %v797_v3 = vmul.f32 %v790_v63, %v776_v54 }
 0x1d9   : > { %v764_v51 = vpop.permute.xlu0 %763  ;;  %v806_v17 = vpack.c.bf16 %v800_v4, %v798_v9  ;;  %v805_v38 = vpack.c.bf16 %v799_v41, %v797_v3 }
 0x1da   : > { %1043 = vmatpush1.bf16.msra.mxu1 %v697_v18 }
 0x1db   : > { %v816_v36 = vpop.permute.xlu1 %815  ;;  %1044 = vmatprep.subr.bf16.mxu1 %v700_v53 }
 0x1dd   : > { %v772_v52 = vpop.permute.xlu0 %771 }
 0x1de   : > { %1045 = vmatpush1.bf16.msra.mxu1 %v699_v30  ;;  %v778_v26 = vsel %vm775_vm13, %v764_v51, %v772_v52  ;;  %v782_v13 = vsel %vm775_vm13, %v772_v52, %v764_v51 }
 0x1df   : > { %v720_v55 = vpop.permute.xlu1 %719  ;;  %1046 = vmatprep.subr.bf16.mxu1 %v752_v47  ;;  %v801_v29 = vmul.f32 %v790_v63, %v778_v26  ;;  %v802_v40 = vmul.f32 %v794_v20, %v782_v13 }
 0x1e0   : > { %v725_v6 = vsel %vm721_vm12, %v3698_v43, %v720_v55  ;;  %v729_v35 = vsel %vm721_vm12, %v720_v55, %v3698_v43  ;;  %v3027_v43 = vld [vmem:[%s4900_s7 + $0x7] ss:$8 sm:$0x3] }
 0x1e1   : > { %v749_v44 = vmul.f32 %v736_v1, %v725_v6  ;;  %v750_v2 = vmul.f32 %v740_v27, %v729_v35  ;;  %v814_v14 = vpop.permute.xlu0 %813  ;;  %v848_v33 = vrot.slane %v3027_v43, %v3598_v49  ;;  %v844_v37 = vrot.slane %v3027_v43, %v3596_v48  ;;  %v3243_v35 = vld [vmem:[%s4896_s3] ss:$12 sps:$4 sm:$0xff]  }
 0x1e2   : > { %1047 = vmatpush1.bf16.msra.mxu1 %v751_v24 }
 0x1e3   : > { %v824_v23 = vpop.permute.xlu1 %823  ;;  %v754_v10 = vpack.c.bf16 %v750_v2, %v748_v8  ;;  %v753_v61 = vpack.c.bf16 %v749_v44, %v747_v62  ;;  %v3246_v44 = vld [vmem:[%s4896_s3 + $0x1c] ss:$12 sps:$4 sm:$0xff]  }
 0x1e4   : > { %v835_v42 = vsel %vm829_vm14, %v824_v23, %v816_v36  ;;  %v831_v16 = vsel %vm829_vm14, %v816_v36, %v824_v23 }
 0x1e5   : > { %v822_v11 = vpop.permute.xlu0 %821  ;;  %1048 = vmatprep.subr.bf16.mxu1 %v754_v10  ;;  %v854_v18 = vmul.f32 %v848_v33, %v835_v42  ;;  %v853_v58 = vmul.f32 %v844_v37, %v831_v16 }
 0x1e6   : > { %v834_v28 = vsel %vm829_vm14, %v822_v11, %v814_v14  ;;  %1049 = vmatpush1.bf16.msra.mxu1 %v753_v61  ;;  %v830_v12 = vsel %vm829_vm14, %v814_v14, %v822_v11  ;;  %v3248_v11 = vld [vmem:[%s4896_s3 + $0x18] ss:$12 sps:$4 sm:$0xff]  }
 0x1e7   : > { %v774_v34 = vpop.permute.xlu1 %773  ;;  %1050 = vmatprep.subr.bf16.mxu1 %v806_v17  ;;  %v852_v19 = vmul.f32 %v848_v33, %v834_v28  ;;  %v851_v53 = vmul.f32 %v844_v37, %v830_v12 }
 0x1e8   : > { %v779_v21 = vsel %vm775_vm13, %v3756_v32, %v774_v34  ;;  %v783_v39 = vsel %vm775_vm13, %v774_v34, %v3756_v32 }
 0x1e9   : > { %v803_v22 = vmul.f32 %v790_v63, %v779_v21  ;;  %v804_v46 = vmul.f32 %v794_v20, %v783_v39  ;;  %v818_v27 = vpop.permute.xlu0 %817  ;;  %v860_v32 = vpack.c.bf16 %v854_v18, %v852_v19  ;;  %v859_v31 = vpack.c.bf16 %v853_v58, %v851_v53  ;;  %v3028_v63 = vld [vmem:[%s4900_s7 + $0x10] ss:$8 sm:$0x3]  ;;  %v3249_v19 = vld [vmem:[%s4896_s3 + $0x8] ss:$12 sps:$4 sm:$0xff]  }
 0x1ea   : > { %1051 = vmatpush1.bf16.msra.mxu1 %v805_v38  ;;  %v898_v25 = vrot.slane %v3028_v63, %v3596_v48  ;;  %v902_v54 = vrot.slane %v3028_v63, %v3598_v49 }
 0x1eb   : > { %v820_v1 = vpop.permute.xlu1 %819  ;;  %v808_v50 = vpack.c.bf16 %v804_v46, %v802_v40  ;;  %v807_v51 = vpack.c.bf16 %v803_v22, %v801_v29  ;;  %v3250_v22 = vld [vmem:[%s4896_s3 + $0x20] ss:$12 sps:$4 sm:$0xff]  }
 0x1ed   : > { %v826_v57 = vpop.permute.xlu0 %825  ;;  %1052 = vmatprep.subr.bf16.mxu1 %v808_v50 }
 0x1ee   : > { %v832_v59 = vsel %vm829_vm14, %v818_v27, %v826_v57  ;;  %v836_v5 = vsel %vm829_vm14, %v826_v57, %v818_v27  ;;  %1053 = vmatpush1.bf16.msra.mxu1 %v807_v51 }
 0x1ef   : > { %v828_v7 = vpop.permute.xlu1 %827  ;;  %1054 = vmatprep.subr.bf16.mxu1 %v860_v32  ;;  %v855_v52 = vmul.f32 %v844_v37, %v832_v59  ;;  %v856_v47 = vmul.f32 %v848_v33, %v836_v5 }
 0x1f0   : > { %v833_v36 = vsel %vm829_vm14, %v820_v1, %v828_v7  ;;  %v837_v30 = vsel %vm829_vm14, %v828_v7, %v820_v1 }
 0x1f1   : > { %v857_v56 = vmul.f32 %v844_v37, %v833_v36  ;;  %v858_v60 = vmul.f32 %v848_v33, %v837_v30  ;;  %v868_v62 = vpop.permute.xlu0 %867 }
 0x1f2   : > { %1055 = vmatpush1.bf16.msra.mxu1 %v859_v31 }
 0x1f3   : > { %v870_v20 = vpop.permute.xlu1 %869  ;;  %v862_v55 = vpack.c.bf16 %v858_v60, %v856_v47  ;;  %v861_v24 = vpack.c.bf16 %v857_v56, %v855_v52 }
 0x1f5   : > { %v876_v6 = vpop.permute.xlu0 %875  ;;  %1056 = vmatprep.subr.bf16.mxu1 %v862_v55 }
 0x1f6   : > { %v884_v8 = vsel %vm883_vm15, %v868_v62, %v876_v6  ;;  %v888_v9 = vsel %vm883_vm15, %v876_v6, %v868_v62  ;;  %1057 = vmatpush1.bf16.msra.mxu1 %v861_v24 }
 0x1f7   : > { %v878_v2 = vpop.permute.xlu1 %877  ;;  %v905_v4 = vmul.f32 %v898_v25, %v884_v8  ;;  %v906_v3 = vmul.f32 %v902_v54, %v888_v9 }
 0x1f8   : > { %v885_v14 = vsel %vm883_vm15, %v870_v20, %v878_v2  ;;  %v889_v15 = vsel %vm883_vm15, %v878_v2, %v870_v20  ;;  %v3054_v2 = vld [vmem:[%s3380_s19 + $0x108] sm:$0xff] }
 0x1f9   : > { %v907_v23 = vmul.f32 %v898_v25, %v885_v14  ;;  %v908_v10 = vmul.f32 %v902_v54, %v889_v15  ;;  %v872_v61 = vpop.permute.xlu0 %871  ;;  %1059 = vmatmul.mubr.bf16.vlgmr.msra.gmra.mrb[0].mxu1 %v3243_v35  ;;  %v3056_v14 = vld [vmem:[%s3380_s19 + $0x118] sm:$0xff] }
 0x1fa   : > { %1068 = vmatprep.mubr.bf16.mxu1 %v3246_v44 }
 0x1fb   : > { %v913_v26 = vpack.c.bf16 %v907_v23, %v905_v4  ;;  %v874_v43 = vpop.permute.xlu1 %873  ;;  %v914_v41 = vpack.c.bf16 %v908_v10, %v906_v3 }
 0x1fd   : > { %v880_v13 = vpop.permute.xlu0 %879  ;;  %1079 = vmatprep.subr.bf16.mxu1 %v914_v41  ;;  %v3055_v41 = vld [vmem:[%s3380_s19 + $0x110] sm:$0xff] }
 0x1fe   : > { %v886_v17 = vsel %vm883_vm15, %v872_v61, %v880_v13  ;;  %v890_v28 = vsel %vm883_vm15, %v880_v13, %v872_v61  ;;  %1080 = vmatpush1.bf16.msra.mxu1 %v913_v26  ;;  %v1675_v26 = vpack.c.bf16 %v3056_v14, %v3054_v2  ;;  %v3058_v13 = vld [vmem:[%s3380_s19 + $0x128] sm:$0xff]  ;;  %v3257_v2 = vld [vmem:[%s4898_s5 + $0x30] sm:$0xff]   ;;  %v3258_v14 = vld [vmem:[%s4898_s5 + $0x38] sm:$0xff]  }
 0x1ff   : > { %v882_v29 = vpop.permute.xlu1 %881  ;;  %v909_v38 = vmul.f32 %v898_v25, %v886_v17  ;;  %v910_v40 = vmul.f32 %v902_v54, %v890_v28  ;;  %v3251_v17 = vld [vmem:[%s4898_s5] sm:$0xff]  }
 0x200   : > { %v887_v33 = vsel %vm883_vm15, %v874_v43, %v882_v29  ;;  %v891_v34 = vsel %vm883_vm15, %v882_v29, %v874_v43  ;;  %v3053_v43 = vld [vmem:[%s3380_s19 + $0x100] sm:$0xff] }
 0x201   : > { %v911_v42 = vmul.f32 %v898_v25, %v887_v33  ;;  %v912_v21 = vmul.f32 %v902_v54, %v891_v34  ;;  %1069 = vmatmul.mubr.bf16.gmra.mrb[4].mxu1 %v3248_v11  ;;  %v3060_v11 = vld [vmem:[%s3380_s19 + $0x138] sm:$0xff]  ;;  %v1674_v28 = vpack.c.bf16 %v3055_v41, %v3053_v43  ;;  %v3057_v33 = vld [vmem:[%s3380_s19 + $0x120] sm:$0xff]  ;;  %v3059_v34 = vld [vmem:[%s3380_s19 + $0x130] sm:$0xff] }
 0x202   : > { %1111 = vmatprep.mubr.bf16.mxu1 %v4902_v0  ;;  %v1677_v29 = vpack.c.bf16 %v3060_v11, %v3058_v13 }
 0x203   : > { %v915_v39 = vpack.c.bf16 %v911_v42, %v909_v38  ;;  %v916_v12 = vpack.c.bf16 %v912_v21, %v910_v40  ;;  %v3062_v38 = vld [vmem:[%s3380_s19 + $0x148] sm:$0xff]  ;;  %v3064_v40 = vld [vmem:[%s3380_s19 + $0x158] sm:$0xff]  ;;  %v1676_v42 = vpack.c.bf16 %v3059_v34, %v3057_v33 }
 0x204   : > { %v1679_v21 = vpack.c.bf16 %v3064_v40, %v3062_v38 }
 0x205   : > { %1081 = vmatprep.subr.bf16.mxu1 %v916_v12  ;;  %v3063_v12 = vld [vmem:[%s3380_s19 + $0x150] sm:$0xff] }
 0x206   : > { %1082 = vmatpush1.bf16.msra.mxu1 %v915_v39  ;;  %v3061_v39 = vld [vmem:[%s3380_s19 + $0x140] sm:$0xff] }
 0x209   : > { %3035 = vmatmul.mubr.msk.bf16.vlgmr.msra.gmra.mrb[0].mxu1 %vm1019_vm0, %v3249_v19  ;;  %v3066_v19 = vld [vmem:[%s3380_s19 + $0x168] sm:$0xff] }
 0x20a   : > { %1121 = vmatprep.mubr.bf16.mxu1 %v4902_v0 }
 0x20e   : > { %v972_v46 = vpop.permute.xlu0 %971 }
 0x210   : > { %v977_v18 = vpop.permute.xlu1 %976 }
 0x211   : > { %3036 = vmatmul.mubr.msk.bf16.gmra.mrb[4].mxu1 %vm1019_vm0, %v3250_v22  ;;  %v3068_v22 = vld [vmem:[%s3380_s19 + $0x178] sm:$0xff] }
 0x212   : > { %v982_v30 = vpop.permute.xlu0 %981 }
 0x214   : > { %v987_v20 = vpop.permute.xlu1 %986 }
 0x2dc   : > { %v1113_v27 = vpop.f32.mrb[0].mxu1 }
 0x2dd   : > { %v3190_v37 = vadd.f32 %v1113_v27, %v972_v46  ;;  %v1115_v16 = vpop.f32.mrb[1].mxu1  ;;  %v1678_v27 = vpack.c.bf16 %v3063_v12, %v3061_v39 }
 0x2de   : > { %v3191_v1 = vadd.f32 %v1115_v16, %v972_v46  ;;  %v1117_v50 = vpop.f32.mrb[2].mxu1  ;;  %v3252_v46 = vld [vmem:[%s4898_s5 + $0x8] sm:$0xff]   ;;  %v3065_v16 = vld [vmem:[%s3380_s19 + $0x160] sm:$0xff] }
 0x2df   : > { %v1140_v51 = vmul.f32 0.01, %v3190_v37  ;;  %v3192_v53 = vadd.f32 %v1117_v50, %v977_v18  ;;  %v1119_v57 = vpop.f32.mrb[3].mxu1  ;;  %vm1132_vm1 = vcmp.gt.f32.partialorder %v3190_v37, 0.0  ;;  %v3072_v50 = vld [vmem:[%s3380_s19 + $0x198] sm:$0xff] }
 0x2e0   : > { %v1141_v32 = vmul.f32 0.01, %v3191_v1  ;;  %v3193_v58 = vadd.f32 %v1119_v57, %v977_v18  ;;  %vm1133_vm2 = vcmp.gt.f32.partialorder %v3191_v1, 0.0  ;;  %v3067_v18 = vld [vmem:[%s3380_s19 + $0x170] sm:$0xff]  ;;  %v3069_v57 = vld [vmem:[%s3380_s19 + $0x180] sm:$0xff] }
 0x2e1   : > { %vm1134_vm3 = vcmp.gt.f32.partialorder %v3192_v53, 0.0  ;;  %v1142_v59 = vmul.f32 0.01, %v3192_v53  ;;  %v1148_v7 = vsel %vm1132_vm1, %v3190_v37, %v1140_v51  ;;  %v1681_v37 = vpack.c.bf16 %v3068_v22, %v3066_v19 }
 0x2e2   : > { %vm1135_vm4 = vcmp.gt.f32.partialorder %v3193_v58, 0.0  ;;  %v1143_v5 = vmul.f32 0.01, %v3193_v58  ;;  %v1149_v47 = vsel %vm1133_vm2, %v3191_v1, %v1141_v32  ;;  %v3070_v1 = vld [vmem:[%s3380_s19 + $0x188] sm:$0xff]  ;;  %v1680_v51 = vpack.c.bf16 %v3067_v18, %v3065_v16  ;;  %v3071_v32 = vld [vmem:[%s3380_s19 + $0x190] sm:$0xff] }
 0x2e3   : > { %v1150_v36 = vsel %vm1134_vm3, %v3192_v53, %v1142_v59  ;;  %v1683_v53 = vpack.c.bf16 %v3072_v50, %v3070_v1  ;;  %v3076_v59 = vld [vmem:[%s3380_s19 + $0x1b8] sm:$0xff] }
 0x2e4   : > { %v1172_v31 = vpack.c.bf16 %v1150_v36, %v1148_v7  ;;  %v1123_v52 = vpop.f32.mrb[4].mxu1  ;;  %v1151_v56 = vsel %vm1135_vm4, %v3193_v58, %v1143_v5  ;;  %v3074_v58 = vld [vmem:[%s3380_s19 + $0x1a8] sm:$0xff]  ;;  %v3253_v5 = vld [vmem:[%s4898_s5 + $0x10] sm:$0xff]   ;;  %v1682_v7 = vpack.c.bf16 %v3071_v32, %v3069_v57  ;;  %v1701_v32 = vpop.permute.xlu0 %1700 }
 0x2e5   : > { %v3194_v60 = vadd.f32 %v1123_v52, %v982_v30  ;;  %v1125_v62 = vpop.f32.mrb[5].mxu1  ;;  %v1173_v63 = vpack.c.bf16 %v1151_v56, %v1149_v47  ;;  %v1685_v36 = vpack.c.bf16 %v3076_v59, %v3074_v58  ;;  %v3078_v52 = vld [vmem:[%s3380_s19 + $0x1c8] sm:$0xff]  ;;  %v3080_v47 = vld [vmem:[%s3380_s19 + $0x1d8] sm:$0xff] }
 0x2e6   : > { %v3195_v55 = vadd.f32 %v1125_v62, %v982_v30  ;;  %v1127_v24 = vpop.f32.mrb[6].mxu1  ;;  %v3073_v30 = vld [vmem:[%s3380_s19 + $0x1a0] sm:$0xff] }
 0x2e7   : > { %v1144_v25 = vmul.f32 0.01, %v3194_v60  ;;  %v3196_v54 = vadd.f32 %v1127_v24, %v987_v20  ;;  %v1129_v6 = vpop.f32.mrb[7].mxu1  ;;  %1336 = vmatprep.subr.bf16.mxu0 %v1173_v63  ;;  %vm1136_vm5 = vcmp.gt.f32.partialorder %v3194_v60, 0.0  ;;  %v3077_v62 = vld [vmem:[%s3380_s19 + $0x1c0] sm:$0xff]  ;;  %v3079_v63 = vld [vmem:[%s3380_s19 + $0x1d0] sm:$0xff] }
 0x2e8   : > { %v1145_v35 = vmul.f32 0.01, %v3195_v55  ;;  %v3197_v8 = vadd.f32 %v1129_v6, %v987_v20  ;;  %1337 = vmatpush1.bf16.msra.mxu0 %v1172_v31  ;;  %vm1137_vm6 = vcmp.gt.f32.partialorder %v3195_v55, 0.0  ;;  %v3075_v31 = vld [vmem:[%s3380_s19 + $0x1b0] sm:$0xff]  ;;  %v3082_v20 = vld [vmem:[%s3380_s19 + $0x1e8] sm:$0xff]  ;;  %v3254_v24 = vld [vmem:[%s4898_s5 + $0x18] sm:$0xff]  }
 0x2e9   : > { %vm1138_vm7 = vcmp.gt.f32.partialorder %v3196_v54, 0.0  ;;  %v1146_v9 = vmul.f32 0.01, %v3196_v54  ;;  %v1152_v15 = vsel %vm1136_vm5, %v3194_v60, %v1144_v25  ;;  %v1684_v56 = vpack.c.bf16 %v3075_v31, %v3073_v30  ;;  %v3081_v6 = vld [vmem:[%s3380_s19 + $0x1e0] sm:$0xff] }
 0x2ea   : > { %vm1139_vm1 = vcmp.gt.f32.partialorder %v3197_v8, 0.0  ;;  %v1147_v44 = vmul.f32 0.01, %v3197_v8  ;;  %v1153_v23 = vsel %vm1137_vm6, %v3195_v55, %v1145_v35  ;;  %v1687_v60 = vpack.c.bf16 %v3080_v47, %v3078_v52  ;;  %v3084_v55 = vld [vmem:[%s3380_s19 + $0x1f8] sm:$0xff]  ;;  %v3083_v35 = vld [vmem:[%s3380_s19 + $0x1f0] sm:$0xff] }
 0x2eb   : > { %v1154_v4 = vsel %vm1138_vm7, %v3196_v54, %v1146_v9  ;;  %v1686_v25 = vpack.c.bf16 %v3079_v63, %v3077_v62  ;;  %v1689_v54 = vpack.c.bf16 %v3084_v55, %v3082_v20  ;;  %v3255_v9 = vld [vmem:[%s4898_s5 + $0x20] sm:$0xff]  }
 0x2ec   : > { %v1174_v3 = vpack.c.bf16 %v1154_v4, %v1152_v15  ;;  %v1155_v10 = vsel %vm1139_vm1, %v3197_v8, %v1147_v44  ;;  %v1688_v8 = vpack.c.bf16 %v3083_v35, %v3081_v6  ;;  %v3256_v44 = vld [vmem:[%s4898_s5 + $0x28] sm:$0xff]   ;;  %v3259_v15 = vld [vmem:[%s4894_s1] sm:$0xff]  }
 0x2ed   : > { %v1175_v61 = vpack.c.bf16 %v1155_v10, %v1153_v23  ;;  %v3260_v4 = vld [vmem:[%s4894_s1 + $0x8] sm:$0xff]  }
 0x2ef   : > { %1338 = vmatprep.subr.bf16.mxu0 %v1175_v61 }
 0x2f0   : > { %1339 = vmatpush1.bf16.msra.mxu0 %v1174_v3 }
 0x2f1   : > { %1730 = vmatprep.subr.bf16.mxu0 %v1675_v26 }
 0x2f3   : > { %3045 = vmatmul.mubr.msk.bf16.vlgmr.msra.gmra.mrb[8].mxu0 %vm1019_vm0, %v3251_v17 }
 0x2f4   : > { %1731 = vmatpush1.bf16.msra.mxu0 %v1674_v28  ;;  %1378 = vmatprep.mubr.bf16.mxu0 %v4902_v0 }
 0x2f5   : > { %1732 = vmatprep.subr.bf16.mxu0 %v1677_v29 }
 0x2f8   : > { %1733 = vmatpush1.bf16.msra.mxu0 %v1676_v42 }
 0x2f9   : > { %1734 = vmatprep.subr.bf16.mxu0 %v1679_v21 }
 0x2fb   : > { %3046 = vmatmul.mubr.msk.bf16.gmra.mrb[12].mxu0 %vm1019_vm0, %v3252_v46 }
 0x2fc   : > { %1388 = vmatprep.mubr.bf16.mxu0 %v4902_v0  ;;  %1735 = vmatpush1.bf16.msra.mxu0 %v1678_v27 }
 0x2fd   : > { %1736 = vmatprep.subr.bf16.mxu0 %v1681_v37 }
 0x300   : > { %1737 = vmatpush1.bf16.msra.mxu0 %v1680_v51 }
 0x301   : > { %1738 = vmatprep.subr.bf16.mxu0 %v1683_v53 }
 0x303   : > { %3047 = vmatmul.mubr.msk.bf16.gmra.mrb[16].mxu0 %vm1019_vm0, %v3253_v5 }
 0x304   : > { %1398 = vmatprep.mubr.bf16.mxu0 %v4902_v0  ;;  %1739 = vmatpush1.bf16.msra.mxu0 %v1682_v7  ;;  %v1706_v7 = vpop.permute.xlu1 %1705 }
 0x305   : > { %1740 = vmatprep.subr.bf16.mxu0 %v1685_v36 }
 0x308   : > { %1741 = vmatpush1.bf16.msra.mxu0 %v1684_v56 }
 0x309   : > { %1742 = vmatprep.subr.bf16.mxu0 %v1687_v60 }
 0x30b   : > { %3048 = vmatmul.mubr.msk.bf16.gmra.mrb[20].mxu0 %vm1019_vm0, %v3254_v24 }
 0x30c   : > { %1408 = vmatprep.mubr.bf16.mxu0 %v4902_v0  ;;  %1743 = vmatpush1.bf16.msra.mxu0 %v1686_v25 }
 0x30d   : > { %1744 = vmatprep.subr.bf16.mxu0 %v1689_v54 }
 0x310   : > { %1745 = vmatpush1.bf16.msra.mxu0 %v1688_v8 }
 0x313   : > { %3049 = vmatmul.mubr.msk.bf16.gmra.mrb[24].mxu0 %vm1019_vm0, %v3255_v9  ;;  %v1711_v9 = vpop.permute.xlu0 %1710 }
 0x314   : > { %1418 = vmatprep.mubr.bf16.mxu0 %v4902_v0 }
 0x31b   : > { %3050 = vmatmul.mubr.msk.bf16.gmra.mrb[28].mxu0 %vm1019_vm0, %v3256_v44 }
 0x31c   : > { %1428 = vmatprep.mubr.bf16.mxu0 %v4902_v0 }
 0x323   : > { %3051 = vmatmul.mubr.msk.bf16.gmra.mrb[32].mxu0 %vm1019_vm0, %v3257_v2  ;;  %v1716_v2 = vpop.permute.xlu1 %1715 }
 0x324   : > { %1438 = vmatprep.mubr.bf16.mxu0 %v4902_v0 }
 0x32b   : > { %3052 = vmatmul.mubr.msk.bf16.gmra.mrb[36].mxu0 %vm1019_vm0, %v3258_v14 }
 0x32c   : > { %1762 = vmatprep.mubr.bf16.mxu0 %v4902_v0 }
 0x333   : > { %1763 = vmatmul.mubr.bf16.vlgmr.msra.gmra.mrb[40].mxu0 %v3259_v15 }
 0x334   : > { %1772 = vmatprep.mubr.bf16.mxu0 %v4902_v0 }
 0x33b   : > { %1773 = vmatmul.mubr.bf16.gmra.mrb[44].mxu0 %v3260_v4 }
 0x33c   : > { %2677 = vmatprep.mubr.bf16.mxu0 %v4902_v0  ;;  %v4226_v0 = vld [vmem:[%s4899_s6 + $0x10] sm:$0xff] }
 0x3c6   : > { %v3956_v3 = vpop.f32.mrb[8].mxu0 }
 0x3c7   : > { %4909 = vst [vmem:[#allocation3_spill] sm:$0xff] %v3956_v3  ;;  %v3958_v23 = vpop.f32.mrb[9].mxu0 }
 0x3c8   : > { %4910 = vst [vmem:[#allocation4_spill] sm:$0xff] %v3958_v23  ;;  %v3960_v10 = vpop.f32.mrb[10].mxu0 }
 0x3c9   : > { %4911 = vst [vmem:[#allocation5_spill] sm:$0xff] %v3960_v10  ;;  %v3962_v61 = vpop.f32.mrb[11].mxu0 }
 0x3ca   : > { %4912 = vst [vmem:[#allocation6_spill] sm:$0xff] %v3962_v61 }
 0x3ce   : > { %v3964_v26 = vpop.f32.mrb[12].mxu0 }
 0x3cf   : > { %4913 = vst [vmem:[#allocation7_spill] sm:$0xff] %v3964_v26  ;;  %v3966_v43 = vpop.f32.mrb[13].mxu0 }
 0x3d0   : > { %4914 = vst [vmem:[#allocation8_spill] sm:$0xff] %v3966_v43  ;;  %v3968_v41 = vpop.f32.mrb[14].mxu0 }
 0x3d1   : > { %4915 = vst [vmem:[#allocation9_spill] sm:$0xff] %v3968_v41  ;;  %v3970_v13 = vpop.f32.mrb[15].mxu0 }
 0x3d2   : > { %4916 = vst [vmem:[#allocation10_spill] sm:$0xff] %v3970_v13 }
 0x3d6   : > { %v3972_v11 = vpop.f32.mrb[16].mxu0 }
 0x3d7   : > { %4917 = vst [vmem:[#allocation11_spill] sm:$0xff] %v3972_v11  ;;  %v3974_v17 = vpop.f32.mrb[17].mxu0 }
 0x3d8   : > { %4918 = vst [vmem:[#allocation12_spill] sm:$0xff] %v3974_v17  ;;  %v3976_v28 = vpop.f32.mrb[18].mxu0 }
 0x3d9   : > { %4919 = vst [vmem:[#allocation13_spill] sm:$0xff] %v3976_v28  ;;  %v3978_v29 = vpop.f32.mrb[19].mxu0  ;;  %v3090_v28 = vld [vmem:[%s4900_s7 + $0x5] ss:$8 sm:$0x3] }
 0x3da   : > { %4920 = vst [vmem:[#allocation14_spill] sm:$0xff] %v3978_v29 }
 0x3de   : > { %v3980_v33 = vpop.f32.mrb[20].mxu0 }
 0x3df   : > { %4921 = vst [vmem:[#allocation15_spill] sm:$0xff] %v3980_v33  ;;  %v3982_v34 = vpop.f32.mrb[21].mxu0  ;;  %v3088_v33 = vld [vmem:[%s4900_s7 + $0x2] ss:$8 sm:$0x3] }
 0x3e0   : > { %4922 = vst [vmem:[#allocation16_spill] sm:$0xff] %v3982_v34  ;;  %v3984_v38 = vpop.f32.mrb[22].mxu0  ;;  %v4329_v34 = vld [vmem:[%s4899_s6 + $0x78] sm:$0xff]  ;;  %v4347_v43 = vrot.slane %v3088_v33, %v3596_v48  ;;  %v4360_v3 = vrot.slane %v3088_v33, %v3598_v49 }
 0x3e1   : > { %4923 = vst [vmem:[#allocation17_spill] sm:$0xff] %v3984_v38  ;;  %v3986_v40 = vpop.f32.mrb[23].mxu0  ;;  %v3087_v38 = vld [vmem:[%s4900_s7 + $0x1] ss:$8 sm:$0x3] }
 0x3e2   : > { %4924 = vst [vmem:[#allocation18_spill] sm:$0xff] %v3986_v40  ;;  %v1888_v17 = vrot.slane %v3087_v38, %v3596_v48  ;;  %v1892_v41 = vrot.slane %v3087_v38, %v3598_v49 }
 0x3e6   : > { %v3988_v42 = vpop.f32.mrb[24].mxu0 }
 0x3e7   : > { %4925 = vst [vmem:[#allocation19_spill] sm:$0xff] %v3988_v42  ;;  %v3990_v21 = vpop.f32.mrb[25].mxu0  ;;  %v4318_v42 = vld [vmem:[%s4899_s6 + $0x70] sm:$0xff] }
 0x3e8   : > { %4926 = vst [vmem:[#allocation20_spill] sm:$0xff] %v3990_v21  ;;  %v3992_v39 = vpop.f32.mrb[26].mxu0 }
 0x3e9   : > { %4927 = vst [vmem:[#allocation21_spill] sm:$0xff] %v3992_v39  ;;  %v3994_v12 = vpop.f32.mrb[27].mxu0  ;;  %v4310_v39 = vld [vmem:[%s4899_s6 + $0x68] sm:$0xff] }
 0x3ea   : > { %4928 = vst [vmem:[#allocation22_spill] sm:$0xff] %v3994_v12 }
 0x3ee   : > { %v3996_v19 = vpop.f32.mrb[28].mxu0 }
 0x3ef   : > { %4929 = vst [vmem:[#allocation23_spill] sm:$0xff] %v3996_v19  ;;  %v3998_v22 = vpop.f32.mrb[29].mxu0  ;;  %v4302_v19 = vld [vmem:[%s4899_s6 + $0x60] sm:$0xff] }
 0x3f0   : > { %4930 = vst [vmem:[#allocation24_spill] sm:$0xff] %v3998_v22  ;;  %v4000_v46 = vpop.f32.mrb[30].mxu0 }
 0x3f1   : > { %4931 = vst [vmem:[#allocation25_spill] sm:$0xff] %v4000_v46  ;;  %v4002_v27 = vpop.f32.mrb[31].mxu0  ;;  %v4294_v46 = vld [vmem:[%s4899_s6 + $0x58] sm:$0xff] }
 0x3f2   : > { %4932 = vst [vmem:[#allocation26_spill] sm:$0xff] %v4002_v27 }
 0x3f6   : > { %v4004_v37 = vpop.f32.mrb[32].mxu0 }
 0x3f7   : > { %4933 = vst [vmem:[#allocation27_spill] sm:$0xff] %v4004_v37  ;;  %v4006_v16 = vpop.f32.mrb[33].mxu0  ;;  %v4286_v37 = vld [vmem:[%s4899_s6 + $0x50] sm:$0xff] }
 0x3f8   : > { %4934 = vst [vmem:[#allocation28_spill] sm:$0xff] %v4006_v16  ;;  %v4008_v18 = vpop.f32.mrb[34].mxu0 }
 0x3f9   : > { %4935 = vst [vmem:[#allocation29_spill] sm:$0xff] %v4008_v18  ;;  %v4010_v1 = vpop.f32.mrb[35].mxu0  ;;  %v4280_v18 = vld [vmem:[%s4899_s6 + $0x48] sm:$0xff] }
 0x3fa   : > { %4936 = vst [vmem:[#allocation30_spill] sm:$0xff] %v4010_v1 }
 0x3fe   : > { %v4012_v50 = vpop.f32.mrb[36].mxu0 }
 0x3ff   : > { %4937 = vst [vmem:[#allocation31_spill] sm:$0xff] %v4012_v50  ;;  %v4014_v51 = vpop.f32.mrb[37].mxu0 }
 0x400   : > { %4938 = vst [vmem:[#allocation32_spill] sm:$0xff] %v4014_v51  ;;  %v4016_v53 = vpop.f32.mrb[38].mxu0 }
 0x401   : > { %4939 = vst [vmem:[#allocation33_spill] sm:$0xff] %v4016_v53  ;;  %v4018_v57 = vpop.f32.mrb[39].mxu0 }
 0x402   : > { %4940 = vst [vmem:[#allocation34_spill] sm:$0xff] %v4018_v57 }
 0x406   : > { %v1764_v58 = vpop.f32.mrb[40].mxu0 }
 0x407   : > { %v1765_v59 = vadd.f32 %v1764_v58, %v1701_v32  ;;  %v1766_v5 = vpop.f32.mrb[41].mxu0 }
 0x408   : > { %v1768_v36 = vpop.f32.mrb[42].mxu0  ;;  %v1767_v24 = vadd.f32 %v1766_v5, %v1701_v32 }
 0x409   : > { %vm1783_vm2 = vcmp.gt.f32.partialorder %v1765_v59, 0.0  ;;  %v1791_v30 = vmul.f32 0.01, %v1765_v59  ;;  %v1769_v31 = vadd.f32 %v1768_v36, %v1706_v7  ;;  %v1770_v52 = vpop.f32.mrb[43].mxu0 }
 0x40a   : > { %v1771_v25 = vadd.f32 %v1770_v52, %v1706_v7  ;;  %v1792_v54 = vmul.f32 0.01, %v1767_v24  ;;  %vm1784_vm4 = vcmp.gt.f32.partialorder %v1767_v24, 0.0  ;;  %v3263_v52 = vld [vmem:[%s4896_s3 + $0x4] ss:$12 sps:$4 sm:$0xff]  }
 0x40b   : > { %v4020_v47 = vsel %vm1783_vm2, %v1765_v59, %v1791_v30  ;;  %vm1785_vm3 = vcmp.gt.f32.partialorder %v1769_v31, 0.0  ;;  %v1793_v56 = vmul.f32 0.01, %v1769_v31  ;;  %2367 = vmatprep.mubr.bf16.mxu1 %v3263_v52 }
 0x40c   : > { %1807 = vrot.lane.b32.xlu0 %v4020_v47, %s3286_s24  ;;  %v1794_v6 = vmul.f32 0.01, %v1771_v25  ;;  %vm1786_vm5 = vcmp.gt.f32.partialorder %v1771_v25, 0.0  ;;  %v4044_v35 = vsel %vm1784_vm4, %v1767_v24, %v1792_v54 }
 0x40d   : > { %v4024_v60 = vsel %vm1785_vm3, %v1769_v31, %v1793_v56 }
 0x40e   : > { %4941 = vst [vmem:[#allocation35_spill] sm:$0xff] %v4024_v60  ;;  %v1774_v62 = vpop.f32.mrb[44].mxu0  ;;  %1809 = vrot.lane.b32.xlu1 %v4024_v60, %s3286_s24  ;;  %v4048_v8 = vsel %vm1786_vm5, %v1771_v25, %v1794_v6  ;;  %v2275_v25 = vld [vmem:[%s4897_s4] sm:$0xff]  ;;  %v2276_v6 = vld [vmem:[%s4897_s4 + $0x8] sm:$0xff] }
 0x40f   : > { %v1776_v63 = vpop.f32.mrb[45].mxu0  ;;  %v1775_v44 = vadd.f32 %v1774_v62, %v1711_v9 }
 0x410   : > { %v1778_v20 = vpop.f32.mrb[46].mxu0  ;;  %1859 = vrot.lane.b32.xlu0 %v4020_v47, %s3287_s25  ;;  %v1777_v59 = vadd.f32 %v1776_v63, %v1711_v9 }
 0x411   : > { %v1780_v55 = vpop.f32.mrb[47].mxu0  ;;  %v1779_v14 = vadd.f32 %v1778_v20, %v1716_v2  ;;  %v1795_v15 = vmul.f32 0.01, %v1775_v44  ;;  %vm1787_vm6 = vcmp.gt.f32.partialorder %v1775_v44, 0.0 }
 0x412   : > { %1861 = vrot.lane.b32.xlu1 %v4024_v60, %s3287_s25  ;;  %v1781_v5 = vadd.f32 %v1780_v55, %v1716_v2  ;;  %v1796_v7 = vmul.f32 0.01, %v1777_v59  ;;  %vm1788_vm1 = vcmp.gt.f32.partialorder %v1777_v59, 0.0 }
 0x413   : > { %v1797_v4 = vmul.f32 0.01, %v1779_v14  ;;  %vm1789_vm7 = vcmp.gt.f32.partialorder %v1779_v14, 0.0  ;;  %v4064_v32 = vsel %vm1787_vm6, %v1775_v44, %v1795_v15  ;;  %v2277_v44 = vld [vmem:[%s4897_s4 + $0x10] sm:$0xff] }
 0x414   : > { %1911 = vrot.lane.b32.xlu0 %v4020_v47, %s3288_s26  ;;  %4942 = vst [vmem:[#allocation36_spill] sm:$0xff] %v4064_v32  ;;  %v1798_v36 = vmul.f32 0.01, %v1781_v5  ;;  %vm1790_vm2 = vcmp.gt.f32.partialorder %v1781_v5, 0.0  ;;  %v4084_v30 = vsel %vm1788_vm1, %v1777_v59, %v1796_v7  ;;  %v4201_v59 = vld [vmem:[%s4899_s6] sm:$0xff] }
 0x415   : > { %v4068_v58 = vsel %vm1789_vm7, %v1779_v14, %v1797_v4  ;;  %4944 = vst [vmem:[#allocation38_spill] sm:$0xff] %v4084_v30  ;;  %v2278_v14 = vld [vmem:[%s4897_s4 + $0x18] sm:$0xff]  ;;  %v1831_v15 = vld [vmem:[%s4900_s7] ss:$8 sm:$0x3] }
 0x416   : > { %1913 = vrot.lane.b32.xlu1 %v4024_v60, %s3288_s26  ;;  %4943 = vst [vmem:[#allocation37_spill] sm:$0xff] %v4068_v58  ;;  %v4088_v31 = vsel %vm1790_vm2, %v1781_v5, %v1798_v36  ;;  %v4204_v5 = vrot.slane %v1831_v15, %v3596_v48  ;;  %v4207_v7 = vrot.slane %v1831_v15, %v3598_v49 }
 0x417   : > { %4945 = vst [vmem:[#allocation39_spill] sm:$0xff] %v4088_v31 }
 0x418   : > { %1963 = vrot.lane.b32.xlu0 %v4020_v47, %s3289_s28 }
 0x41a   : > { %1965 = vrot.lane.b32.xlu1 %v4024_v60, %s3289_s28 }
 0x41c   : > { %2023 = vrot.lane.b32.xlu0 %v4020_v47, %s3290_s30 }
 0x41e   : > { %2025 = vrot.lane.b32.xlu1 %v4024_v60, %s3290_s30 }
 0x420   : > { %1815 = vrot.lane.b32.xlu0 %v4044_v35, %s3286_s24 }
 0x422   : > { %1817 = vrot.lane.b32.xlu1 %v4048_v8, %s3286_s24 }
 0x424   : > { %1867 = vrot.lane.b32.xlu0 %v4044_v35, %s3287_s25 }
 0x426   : > { %1869 = vrot.lane.b32.xlu1 %v4048_v8, %s3287_s25 }
 0x428   : > { %1919 = vrot.lane.b32.xlu0 %v4044_v35, %s3288_s26 }
 0x42a   : > { %1921 = vrot.lane.b32.xlu1 %v4048_v8, %s3288_s26 }
 0x42c   : > { %1971 = vrot.lane.b32.xlu0 %v4044_v35, %s3289_s28 }
 0x42e   : > { %1973 = vrot.lane.b32.xlu1 %v4048_v8, %s3289_s28 }
 0x430   : > { %1811 = vrot.lane.b32.xlu0 %v4064_v32, %s3286_s24 }
 0x432   : > { %1813 = vrot.lane.b32.xlu1 %v4068_v58, %s3286_s24 }
 0x434   : > { %1863 = vrot.lane.b32.xlu0 %v4064_v32, %s3287_s25 }
 0x436   : > { %1865 = vrot.lane.b32.xlu1 %v4068_v58, %s3287_s25 }
 0x438   : > { %1915 = vrot.lane.b32.xlu0 %v4064_v32, %s3288_s26 }
 0x43a   : > { %1917 = vrot.lane.b32.xlu1 %v4068_v58, %s3288_s26 }
 0x43c   : > { %1967 = vrot.lane.b32.xlu0 %v4064_v32, %s3289_s28 }
 0x43e   : > { %1969 = vrot.lane.b32.xlu1 %v4068_v58, %s3289_s28 }
 0x440   : > { %1819 = vrot.lane.b32.xlu0 %v4084_v30, %s3286_s24 }
 0x442   : > { %1821 = vrot.lane.b32.xlu1 %v4088_v31, %s3286_s24 }
 0x444   : > { %2031 = vrot.lane.b32.xlu0 %v4044_v35, %s3290_s30 }
 0x446   : > { %2033 = vrot.lane.b32.xlu1 %v4048_v8, %s3290_s30 }
 0x448   : > { %1871 = vrot.lane.b32.xlu0 %v4084_v30, %s3287_s25 }
 0x44a   : > { %1873 = vrot.lane.b32.xlu1 %v4088_v31, %s3287_s25 }
 0x44c   : > { %1923 = vrot.lane.b32.xlu0 %v4084_v30, %s3288_s26 }
 0x44e   : > { %2029 = vrot.lane.b32.xlu1 %v4068_v58, %s3290_s30 }
 0x450   : > { %1975 = vrot.lane.b32.xlu0 %v4084_v30, %s3289_s28 }
 0x452   : > { %1925 = vrot.lane.b32.xlu1 %v4088_v31, %s3288_s26 }
 0x454   : > { %2027 = vrot.lane.b32.xlu0 %v4064_v32, %s3290_s30 }
 0x456   : > { %2077 = vrot.lane.b32.xlu1 %v4024_v60, %s3291_s9 }
 0x458   : > { %2035 = vrot.lane.b32.xlu0 %v4084_v30, %s3290_s30 }
 0x45a   : > { %1977 = vrot.lane.b32.xlu1 %v4088_v31, %s3289_s28 }
 0x45c   : > { %2075 = vrot.lane.b32.xlu0 %v4020_v47, %s3291_s9 }
 0x45e   : > { %2085 = vrot.lane.b32.xlu1 %v4048_v8, %s3291_s9 }
 0x460   : > { %2083 = vrot.lane.b32.xlu0 %v4044_v35, %s3291_s9 }
 0x462   : > { %2081 = vrot.lane.b32.xlu1 %v4068_v58, %s3291_s9 }
 0x464   : > { %2079 = vrot.lane.b32.xlu0 %v4064_v32, %s3291_s9 }
 0x466   : > { %2129 = vrot.lane.b32.xlu1 %v4024_v60, %s3292_s10 }
 0x468   : > { %2087 = vrot.lane.b32.xlu0 %v4084_v30, %s3291_s9 }
 0x46a   : > { %2037 = vrot.lane.b32.xlu1 %v4088_v31, %s3290_s30 }
 0x46c   : > { %2127 = vrot.lane.b32.xlu0 %v4020_v47, %s3292_s10 }
 0x46e   : > { %2137 = vrot.lane.b32.xlu1 %v4048_v8, %s3292_s10 }
 0x470   : > { %2135 = vrot.lane.b32.xlu0 %v4044_v35, %s3292_s10 }
 0x472   : > { %2089 = vrot.lane.b32.xlu1 %v4088_v31, %s3291_s9 }
 0x474   : > { %2131 = vrot.lane.b32.xlu0 %v4064_v32, %s3292_s10 }
 0x476   : > { %2133 = vrot.lane.b32.xlu1 %v4068_v58, %s3292_s10 }
 0x478   : > { %2139 = vrot.lane.b32.xlu0 %v4084_v30, %s3292_s10 }
 0x47a   : > { %2141 = vrot.lane.b32.xlu1 %v4088_v31, %s3292_s10 }
 0x47c   : > { %2179 = vrot.lane.b32.xlu0 %v4020_v47, %s3293_s13 }
 0x47e   : > { %2181 = vrot.lane.b32.xlu1 %v4024_v60, %s3293_s13  ;;  %v1808_v56 = vpop.permute.xlu0 %1807 }
 0x480   : > { %v1810_v62 = vpop.permute.xlu1 %1809  ;;  %2187 = vrot.lane.b32.xlu0 %v4044_v35, %s3293_s13 }
 0x482   : > { %2189 = vrot.lane.b32.xlu1 %v4048_v8, %s3293_s13  ;;  %v4159_v63 = vpop.permute.xlu0 %1859 }
 0x484   : > { %v4161_v20 = vpop.permute.xlu1 %1861  ;;  %2183 = vrot.lane.b32.xlu0 %v4064_v32, %s3293_s13 }
 0x486   : > { %2185 = vrot.lane.b32.xlu1 %v4068_v58, %s3293_s13  ;;  %v4167_v55 = vpop.permute.xlu0 %1911  ;;  %v4364_v58 = vrot.slane %v3090_v28, %v3596_v48 }
 0x488   : > { %v4169_v24 = vpop.permute.xlu1 %1913  ;;  %2191 = vrot.lane.b32.xlu0 %v4084_v30, %s3293_s13 }
 0x48a   : > { %2193 = vrot.lane.b32.xlu1 %v4088_v31, %s3293_s13  ;;  %v4178_v54 = vpop.permute.xlu0 %1963 }
 0x48c   : > { %v4183_v9 = vpop.permute.xlu1 %1965  ;;  %2281 = vperm.xlu0 %3239, %v2275_v25  }
 0x48e   : > { %2286 = vperm.xlu1 %3240, %v2276_v6   ;;  %v4188_v2 = vpop.permute.xlu0 %2023  ;;  %v4216_v6 = vld [vmem:[%s4899_s6 + $0x8] sm:$0xff] }
 0x490   : > { %v4196_v4 = vpop.permute.xlu1 %2025  ;;  %2291 = vperm.xlu0 %3239, %v2277_v44  }
 0x492   : > { %2296 = vperm.xlu1 %3240, %v2278_v14   ;;  %v1816_v36 = vpop.permute.xlu0 %1815 }
 0x493   : > { %v1823_v52 = vsel %vm498_vm8, %v1808_v56, %v1816_v36  ;;  %v1827_v25 = vsel %vm498_vm8, %v1816_v36, %v1808_v56 }
 0x494   : > { %v1818_v44 = vpop.permute.xlu1 %1817  ;;  %1194 = vperm.xlu0 %3239, %v4201_v59   ;;  %v1843_v56 = vmul.f32 %v4204_v5, %v1827_v25  ;;  %v1844_v36 = vmul.f32 %v4207_v7, %v1823_v52  ;;  %v4242_v52 = vld [vmem:[%s4899_s6 + $0x20] sm:$0xff] }
 0x495   : > { %v1824_v14 = vsel %vm498_vm8, %v1810_v62, %v1818_v44  ;;  %v1828_v15 = vsel %vm498_vm8, %v1818_v44, %v1810_v62  ;;  %v4236_v62 = vld [vmem:[%s4899_s6 + $0x18] sm:$0xff] }
 0x496   : > { %v1845_v57 = vmul.f32 %v4204_v5, %v1828_v15  ;;  %v1846_v53 = vmul.f32 %v4207_v7, %v1824_v14  ;;  %1199 = vperm.xlu1 %3240, %v4216_v6   ;;  %v1868_v51 = vpop.permute.xlu0 %1867  ;;  %v4250_v14 = vld [vmem:[%s4899_s6 + $0x28] sm:$0xff]  ;;  %v4266_v15 = vld [vmem:[%s4899_s6 + $0x38] sm:$0xff] }
 0x497   : > { %v1875_v10 = vsel %vm551_vm9, %v4159_v63, %v1868_v51  ;;  %v1879_v23 = vsel %vm551_vm9, %v1868_v51, %v4159_v63 }
 0x498   : > { %v1851_v44 = vpack.c.bf16 %v1845_v57, %v1843_v56  ;;  %v1870_v50 = vpop.permute.xlu1 %1869  ;;  %1204 = vperm.xlu0 %3239, %v4226_v0   ;;  %v1852_v1 = vpack.c.bf16 %v1846_v53, %v1844_v36  ;;  %v4258_v53 = vld [vmem:[%s4899_s6 + $0x30] sm:$0xff]  ;;  %v4274_v36 = vld [vmem:[%s4899_s6 + $0x40] sm:$0xff]  ;;  %v1895_v60 = vmul.f32 %v1888_v17, %v1879_v23 }
 0x499   : > { %v1876_v11 = vsel %vm551_vm9, %v4161_v20, %v1870_v50 }
 0x49a   : > { %1209 = vperm.xlu1 %3240, %v4236_v62   ;;  %2335 = vmatprep.subr.bf16.mxu1 %v1852_v1  ;;  %v4245_v25 = vpop.permute.xlu0 %1919 }
 0x49b   : > { %2336 = vmatpush1.bf16.msra.mxu1 %v1851_v44 }
 0x49c   : > { %v4252_v57 = vpop.permute.xlu1 %1921  ;;  %1214 = vperm.xlu0 %3239, %v4242_v52  }
 0x49d   : > { %v1928_v23 = vsel %vm605_vm10, %v4169_v24, %v4252_v57 }
 0x49e   : > { %1219 = vperm.xlu1 %3240, %v4250_v14   ;;  %v4261_v1 = vpop.permute.xlu0 %1971 }
 0x4a0   : > { %v4268_v56 = vpop.permute.xlu1 %1973  ;;  %1224 = vperm.xlu0 %3239, %v4258_v53  }
 0x4a2   : > { %1229 = vperm.xlu1 %3240, %v4266_v15   ;;  %v1812_v44 = vpop.permute.xlu0 %1811 }
 0x4a4   : > { %v1814_v16 = vpop.permute.xlu1 %1813  ;;  %1234 = vperm.xlu0 %3239, %v4274_v36  }
 0x4a6   : > { %1239 = vperm.xlu1 %3240, %v4280_v18   ;;  %v4289_v27 = vpop.permute.xlu0 %1863 }
 0x4a8   : > { %v4296_v22 = vpop.permute.xlu1 %1865  ;;  %1244 = vperm.xlu0 %3239, %v4286_v37  }
 0x4aa   : > { %1249 = vperm.xlu1 %3240, %v4294_v46   ;;  %v4305_v12 = vpop.permute.xlu0 %1915 }
 0x4ac   : > { %v4312_v21 = vpop.permute.xlu1 %1917  ;;  %1254 = vperm.xlu0 %3239, %v4302_v19  }
 0x4ae   : > { %1259 = vperm.xlu1 %3240, %v4310_v39   ;;  %v4321_v40 = vpop.permute.xlu0 %1967 }
 0x4b0   : > { %v4334_v29 = vpop.permute.xlu1 %1969  ;;  %1264 = vperm.xlu0 %3239, %v4318_v42  }
 0x4b2   : > { %1269 = vperm.xlu1 %3240, %v4329_v34   ;;  %v1820_v13 = vpop.permute.xlu0 %1819 }
 0x4b3   : > { %v1825_v26 = vsel %vm498_vm8, %v1812_v44, %v1820_v13  ;;  %v1829_v61 = vsel %vm498_vm8, %v1820_v13, %v1812_v44  ;;  %v1880_v13 = vsel %vm551_vm9, %v1870_v50, %v4161_v20  ;;  %v1898_v44 = vmul.f32 %v1892_v41, %v1876_v11 }
 0x4b4   : > { %v1822_v38 = vpop.permute.xlu1 %1821  ;;  %2503 = vperm.xlu0 %3239, %v4201_v59   ;;  %v1847_v33 = vmul.f32 %v4204_v5, %v1829_v61  ;;  %v1848_v63 = vmul.f32 %v4207_v7, %v1825_v26  ;;  %v1896_v50 = vmul.f32 %v1892_v41, %v1875_v10  ;;  %v4379_v11 = vrot.slane %v3090_v28, %v3598_v49 }
 0x4b5   : > { %v1826_v32 = vsel %vm498_vm8, %v1814_v16, %v1822_v38  ;;  %v1830_v51 = vsel %vm498_vm8, %v1822_v38, %v1814_v16  ;;  %v1897_v20 = vmul.f32 %v1888_v17, %v1880_v13 }
 0x4b6   : > { %v1849_v59 = vmul.f32 %v4204_v5, %v1830_v51  ;;  %v1850_v31 = vmul.f32 %v4207_v7, %v1826_v32  ;;  %2508 = vperm.xlu1 %3240, %v4216_v6   ;;  %v2032_v30 = vpop.permute.xlu0 %2031  ;;  %v1904_v7 = vpack.c.bf16 %v1898_v44, %v1896_v50  ;;  %v1927_v6 = vsel %vm605_vm10, %v4167_v55, %v4245_v25 }
 0x4b7   : > { %v2039_v16 = vsel %vm721_vm12, %v4188_v2, %v2032_v30  ;;  %v2043_v26 = vsel %vm721_vm12, %v2032_v30, %v4188_v2  ;;  %v1932_v44 = vsel %vm605_vm10, %v4252_v57, %v4169_v24 }
 0x4b8   : > { %v1853_v61 = vpack.c.bf16 %v1849_v59, %v1847_v33  ;;  %v2034_v5 = vpop.permute.xlu1 %2033  ;;  %2513 = vperm.xlu0 %3239, %v4226_v0   ;;  %v1854_v32 = vpack.c.bf16 %v1850_v31, %v1848_v63  ;;  %v4399_v30 = vmul.f32 %v4364_v58, %v2039_v16  ;;  %v1950_v63 = vmul.f32 %v4360_v3, %v1928_v23 }
 0x4b9   : > { %v2040_v10 = vsel %vm721_vm12, %v4196_v4, %v2034_v5  ;;  %v2044_v28 = vsel %vm721_vm12, %v2034_v5, %v4196_v4  ;;  %v4413_v4 = vmul.f32 %v4379_v11, %v2043_v26  ;;  %v3089_v26 = vld [vmem:[%s4900_s7 + $0x3] ss:$8 sm:$0x3] }
 0x4ba   : > { %v4402_v0 = vmul.f32 %v4364_v58, %v2040_v10  ;;  %v4405_v31 = vmul.f32 %v4379_v11, %v2044_v28  ;;  %2518 = vperm.xlu1 %3240, %v4236_v62   ;;  %2337 = vmatprep.subr.bf16.mxu1 %v1854_v32  ;;  %v1872_v2 = vpop.permute.xlu0 %1871  ;;  %v1903_v62 = vpack.c.bf16 %v1897_v20, %v1895_v60 }
 0x4bb   : > { %v1877_v38 = vsel %vm551_vm9, %v4289_v27, %v1872_v2  ;;  %v1881_v13 = vsel %vm551_vm9, %v1872_v2, %v4289_v27  ;;  %2338 = vmatpush1.bf16.msra.mxu1 %v1853_v61  ;;  %v1931_v20 = vsel %vm605_vm10, %v4245_v25, %v4167_v55  ;;  %v1948_v61 = vmul.f32 %v4360_v3, %v1927_v6 }
 0x4bc   : > { %v2067_v51 = vpack.c.bf16 %v4402_v0, %v4399_v30  ;;  %v1874_v33 = vpop.permute.xlu1 %1873  ;;  %2523 = vperm.xlu0 %3239, %v4242_v52   ;;  %2339 = vmatprep.subr.bf16.mxu1 %v1904_v7  ;;  %v2068_v24 = vpack.c.bf16 %v4405_v31, %v4413_v4  ;;  %v1899_v57 = vmul.f32 %v1888_v17, %v1881_v13 }
 0x4bd   : > { %v1878_v27 = vsel %vm551_vm9, %v4296_v22, %v1874_v33  ;;  %v1882_v60 = vsel %vm551_vm9, %v1874_v33, %v4296_v22  ;;  %v1900_v59 = vmul.f32 %v1892_v41, %v1877_v38  ;;  %v1949_v22 = vmul.f32 %v4347_v43, %v1932_v44 }
 0x4be   : > { %v1901_v50 = vmul.f32 %v1888_v17, %v1882_v60  ;;  %v1902_v16 = vmul.f32 %v1892_v41, %v1878_v27  ;;  %2528 = vperm.xlu1 %3240, %v4250_v14   ;;  %v1924_v52 = vpop.permute.xlu0 %1923  ;;  %v1947_v14 = vmul.f32 %v4347_v43, %v1931_v20  ;;  %v1980_v55 = vsel %vm659_vm11, %v4183_v9, %v4268_v56 }
 0x4bf   : > { %2340 = vmatpush1.bf16.msra.mxu1 %v1903_v62  ;;  %v1956_v32 = vpack.c.bf16 %v1950_v63, %v1948_v61  ;;  %v1996_v23 = vrot.slane %v3089_v26, %v3598_v49  ;;  %v1929_v10 = vsel %vm605_vm10, %v4305_v12, %v1924_v52  ;;  %v1984_v2 = vsel %vm659_vm11, %v4268_v56, %v4183_v9 }
 0x4c0   : > { %v1905_v5 = vpack.c.bf16 %v1901_v50, %v1899_v57  ;;  %v4447_v17 = vpop.permute.xlu1 %2029  ;;  %2533 = vperm.xlu0 %3239, %v4258_v53   ;;  %v1906_v41 = vpack.c.bf16 %v1902_v16, %v1900_v59  ;;  %v1933_v53 = vsel %vm605_vm10, %v1924_v52, %v4305_v12  ;;  %v1955_v28 = vpack.c.bf16 %v1949_v22, %v1947_v14  ;;  %v4946_v14 = vld [vmem:[#allocation35_spill] sm:$0xff] }
 0x4c1   : > { %v2002_v6 = vmul.f32 %v1996_v23, %v1980_v55  ;;  %v1951_v13 = vmul.f32 %v4347_v43, %v1933_v53  ;;  %v1952_v62 = vmul.f32 %v4360_v3, %v1929_v10  ;;  %v1992_v56 = vrot.slane %v3089_v26, %v3596_v48  ;;  %v4950_v10 = vld [vmem:[#allocation37_spill] sm:$0xff] }
 0x4c2   : > { %2538 = vperm.xlu1 %3240, %v4266_v15   ;;  %2341 = vmatprep.subr.bf16.mxu1 %v1906_v41  ;;  %v1976_v25 = vpop.permute.xlu0 %1975  ;;  %v1979_v15 = vsel %vm659_vm11, %v4178_v54, %v4261_v1  ;;  %v1983_v33 = vsel %vm659_vm11, %v4261_v1, %v4178_v54 }
 0x4c3   : > { %2342 = vmatpush1.bf16.msra.mxu1 %v1905_v5  ;;  %v2001_v60 = vmul.f32 %v1992_v56, %v1984_v2  ;;  %v1999_v57 = vmul.f32 %v1992_v56, %v1983_v33  ;;  %v1981_v59 = vsel %vm659_vm11, %v4321_v40, %v1976_v25  ;;  %v1985_v54 = vsel %vm659_vm11, %v1976_v25, %v4321_v40  ;;  %v4947_v25 = vld [vmem:[#allocation38_spill] sm:$0xff] }
 0x4c4   : > { %v1926_v7 = vpop.permute.xlu1 %1925  ;;  %2543 = vperm.xlu0 %3239, %v4274_v36   ;;  %2343 = vmatprep.subr.bf16.mxu1 %v1956_v32  ;;  %v2003_v16 = vmul.f32 %v1992_v56, %v1985_v54  ;;  %v2004_v52 = vmul.f32 %v1996_v23, %v1981_v59  ;;  %v4948_v32 = vld [vmem:[#allocation39_spill] sm:$0xff] }
 0x4c5   : > { %v1930_v12 = vsel %vm605_vm10, %v4312_v21, %v1926_v7  ;;  %v1934_v38 = vsel %vm605_vm10, %v1926_v7, %v4312_v21  ;;  %v2000_v21 = vmul.f32 %v1996_v23, %v1979_v15 }
 0x4c6   : > { %v1953_v36 = vmul.f32 %v4347_v43, %v1934_v38  ;;  %v1954_v44 = vmul.f32 %v4360_v3, %v1930_v12  ;;  %2548 = vperm.xlu1 %3240, %v4280_v18   ;;  %v2028_v9 = vpop.permute.xlu0 %2027 }
 0x4c7   : > { %2344 = vmatpush1.bf16.msra.mxu1 %v1955_v28  ;;  %v2008_v18 = vpack.c.bf16 %v2002_v6, %v2000_v21 }
 0x4c8   : > { %v1957_v63 = vpack.c.bf16 %v1953_v36, %v1951_v13  ;;  %v4488_v27 = vpop.permute.xlu1 %2077  ;;  %2553 = vperm.xlu0 %3239, %v4286_v37   ;;  %v1958_v43 = vpack.c.bf16 %v1954_v44, %v1952_v62  ;;  %v2007_v37 = vpack.c.bf16 %v2001_v60, %v1999_v57 }
 0x4ca   : > { %2558 = vperm.xlu1 %3240, %v4294_v46   ;;  %2345 = vmatprep.subr.bf16.mxu1 %v1958_v43  ;;  %v2036_v3 = vpop.permute.xlu0 %2035 }
 0x4cb   : > { %2346 = vmatpush1.bf16.msra.mxu1 %v1957_v63 }
 0x4cc   : > { %v1978_v1 = vpop.permute.xlu1 %1977  ;;  %2563 = vperm.xlu0 %3239, %v4302_v19   ;;  %2347 = vmatprep.subr.bf16.mxu1 %v2008_v18 }
 0x4cd   : > { %v1982_v46 = vsel %vm659_vm11, %v4334_v29, %v1978_v1  ;;  %v1986_v50 = vsel %vm659_vm11, %v1978_v1, %v4334_v29  ;;  %v2016_v29 = vpack.c.bf16 %v4048_v8, %v4044_v35  ;;  %v3091_v35 = vld [vmem:[%s4900_s7 + $0x6] ss:$8 sm:$0x3] }
 0x4ce   : > { %v2005_v20 = vmul.f32 %v1992_v56, %v1986_v50  ;;  %v2006_v61 = vmul.f32 %v1996_v23, %v1982_v46  ;;  %2568 = vperm.xlu1 %3240, %v4310_v39   ;;  %v2076_v40 = vpop.permute.xlu0 %2075  ;;  %v2015_v39 = vpack.c.bf16 %v4946_v14, %v4020_v47  ;;  %v2018_v23 = vpack.c.bf16 %v4948_v32, %v4947_v25  ;;  %v4949_v8 = vld [vmem:[#allocation36_spill] sm:$0xff] }
 0x4cf   : > { %2348 = vmatpush1.bf16.msra.mxu1 %v2007_v37  ;;  %v2017_v53 = vpack.c.bf16 %v4950_v10, %v4949_v8  ;;  %v2045_v47 = vsel %vm721_vm12, %v2036_v3, %v2028_v9  ;;  %v2104_v2 = vrot.slane %v3091_v35, %v3596_v48  ;;  %v2108_v6 = vrot.slane %v3091_v35, %v3598_v49 }
 0x4d0   : > { %v2009_v22 = vpack.c.bf16 %v2005_v20, %v2003_v16  ;;  %v2086_v19 = vpop.permute.xlu1 %2085  ;;  %2573 = vperm.xlu0 %3239, %v4318_v42   ;;  %v2010_v26 = vpack.c.bf16 %v2006_v61, %v2004_v52  ;;  %v2064_v44 = vmul.f32 %v4379_v11, %v2045_v47 }
 0x4d1   : > { %v2096_v38 = vsel %vm775_vm13, %v2086_v19, %v4488_v27  ;;  %v2092_v56 = vsel %vm775_vm13, %v4488_v27, %v2086_v19 }
 0x4d2   : > { %2578 = vperm.xlu1 %3240, %v4329_v34   ;;  %2349 = vmatprep.subr.bf16.mxu1 %v2010_v26  ;;  %v2084_v5 = vpop.permute.xlu0 %2083  ;;  %v2041_v34 = vsel %vm721_vm12, %v2028_v9, %v2036_v3  ;;  %v2114_v33 = vmul.f32 %v2108_v6, %v2096_v38 }
 0x4d3   : > { %2350 = vmatpush1.bf16.msra.mxu1 %v2009_v22  ;;  %v2095_v15 = vsel %vm775_vm13, %v2084_v5, %v2076_v40  ;;  %v2063_v7 = vmul.f32 %v4364_v58, %v2041_v34  ;;  %v2091_v13 = vsel %vm775_vm13, %v2076_v40, %v2084_v5 }
 0x4d4   : > { %v2082_v41 = vpop.permute.xlu1 %2081  ;;  %2351 = vmatprep.subr.bf16.mxu1 %v2016_v29  ;;  %v2112_v9 = vmul.f32 %v2108_v6, %v2095_v15  ;;  %v2111_v21 = vmul.f32 %v2104_v2, %v2091_v13  ;;  %v3093_v15 = vld [vmem:[%s4900_s7 + $0x10] ss:$8 sm:$0x3] }
 0x4d5   : > { %v2212_v38 = vrot.slane %v3093_v15, %v3598_v49 }
 0x4d6   : > { %v2080_v55 = vpop.permute.xlu0 %2079  ;;  %v2120_v30 = vpack.c.bf16 %v2114_v33, %v2112_v9  ;;  %v3264_v9 = vld [vmem:[%s4896_s3 + $0x1c] ss:$12 sps:$4 sm:$0xff]  }
 0x4d7   : > { %2352 = vmatpush1.bf16.msra.mxu1 %v2015_v39 }
 0x4d8   : > { %v2130_v42 = vpop.permute.xlu1 %2129  ;;  %2353 = vmatprep.subr.bf16.mxu1 %v2018_v23 }
 0x4da   : > { %v2088_v28 = vpop.permute.xlu0 %2087 }
 0x4db   : > { %2354 = vmatpush1.bf16.msra.mxu1 %v2017_v53  ;;  %v2093_v60 = vsel %vm775_vm13, %v2080_v55, %v2088_v28  ;;  %v2097_v27 = vsel %vm775_vm13, %v2088_v28, %v2080_v55 }
 0x4dc   : > { %v2038_v12 = vpop.permute.xlu1 %2037  ;;  %2355 = vmatprep.subr.bf16.mxu1 %v2068_v24  ;;  %v2115_v18 = vmul.f32 %v2104_v2, %v2093_v60  ;;  %v2116_v54 = vmul.f32 %v2108_v6, %v2097_v27 }
 0x4dd   : > { %v2042_v62 = vsel %vm721_vm12, %v4447_v17, %v2038_v12  ;;  %v2046_v36 = vsel %vm721_vm12, %v2038_v12, %v4447_v17  ;;  %v2208_v12 = vrot.slane %v3093_v15, %v3596_v48  ;;  %v1454_v15 = vld [vmem:[%s3380_s19 + $0x28] sm:$0xff] }
 0x4de   : > { %v2065_v31 = vmul.f32 %v4364_v58, %v2042_v62  ;;  %v2066_v4 = vmul.f32 %v4379_v11, %v2046_v36  ;;  %v2128_v24 = vpop.permute.xlu0 %2127  ;;  %v3092_v58 = vld [vmem:[%s4900_s7 + $0x7] ss:$8 sm:$0x3]  ;;  %v2113_v11 = vmul.f32 %v2104_v2, %v2092_v56 }
 0x4df   : > { %2356 = vmatpush1.bf16.msra.mxu1 %v2067_v51  ;;  %v2160_v57 = vrot.slane %v3092_v58, %v3598_v49  ;;  %v2156_v40 = vrot.slane %v3092_v58, %v3596_v48  ;;  %v3261_v62 = vld [vmem:[%s4896_s3] ss:$12 sps:$4 sm:$0xff]   ;;  %v3266_v58 = vld [vmem:[%s4896_s3 + $0x18] ss:$12 sps:$4 sm:$0xff]  }
 0x4e0   : > { %v2069_v63 = vpack.c.bf16 %v2065_v31, %v2063_v7  ;;  %v2138_v17 = vpop.permute.xlu1 %2137  ;;  %v2070_v43 = vpack.c.bf16 %v2066_v4, %v2064_v44  ;;  %v2119_v51 = vpack.c.bf16 %v2113_v11, %v2111_v21 }
 0x4e1   : > { %v2148_v1 = vsel %vm829_vm14, %v2138_v17, %v2130_v42  ;;  %v2144_v22 = vsel %vm829_vm14, %v2130_v42, %v2138_v17 }
 0x4e2   : > { %v2136_v3 = vpop.permute.xlu0 %2135  ;;  %2357 = vmatprep.subr.bf16.mxu1 %v2070_v43  ;;  %v2166_v19 = vmul.f32 %v2160_v57, %v2148_v1  ;;  %v2165_v55 = vmul.f32 %v2156_v40, %v2144_v22 }
 0x4e3   : > { %v2147_v0 = vsel %vm829_vm14, %v2136_v3, %v2128_v24  ;;  %2358 = vmatpush1.bf16.msra.mxu1 %v2069_v63  ;;  %v2143_v50 = vsel %vm829_vm14, %v2128_v24, %v2136_v3 }
 0x4e4   : > { %v2090_v59 = vpop.permute.xlu1 %2089  ;;  %2359 = vmatprep.subr.bf16.mxu1 %v2120_v30  ;;  %v2164_v16 = vmul.f32 %v2160_v57, %v2147_v0  ;;  %v2163_v14 = vmul.f32 %v2156_v40, %v2143_v50 }
 0x4e5   : > { %v2094_v37 = vsel %vm775_vm13, %v2082_v41, %v2090_v59  ;;  %v2098_v46 = vsel %vm775_vm13, %v2090_v59, %v2082_v41 }
 0x4e6   : > { %v2117_v52 = vmul.f32 %v2104_v2, %v2094_v37  ;;  %v2118_v20 = vmul.f32 %v2108_v6, %v2098_v46  ;;  %v2132_v61 = vpop.permute.xlu0 %2131  ;;  %v2172_v41 = vpack.c.bf16 %v2166_v19, %v2164_v16  ;;  %v2171_v34 = vpack.c.bf16 %v2165_v55, %v2163_v14  ;;  %v3267_v46 = vld [vmem:[%s4896_s3 + $0x8] ss:$12 sps:$4 sm:$0xff]   ;;  %v4952_v19 = vld [vmem:[#allocation3_spill] sm:$0xff] }
 0x4e7   : > { %2360 = vmatpush1.bf16.msra.mxu1 %v2119_v51  ;;  %v1451_v55 = vld [vmem:[%s3380_s19 + $0x10] sm:$0xff] }
 0x4e8   : > { %v2121_v26 = vpack.c.bf16 %v2117_v52, %v2115_v18  ;;  %v2134_v5 = vpop.permute.xlu1 %2133  ;;  %v2122_v29 = vpack.c.bf16 %v2118_v20, %v2116_v54  ;;  %v4951_v54 = vmov 0  }
 0x4ea   : > { %v2140_v39 = vpop.permute.xlu0 %2139  ;;  %2361 = vmatprep.subr.bf16.mxu1 %v2122_v29 }
 0x4eb   : > { %v2145_v25 = vsel %vm829_vm14, %v2132_v61, %v2140_v39  ;;  %v2149_v32 = vsel %vm829_vm14, %v2140_v39, %v2132_v61  ;;  %2362 = vmatpush1.bf16.msra.mxu1 %v2121_v26  ;;  %v1449_v61 = vld [vmem:[%s3380_s19] sm:$0xff] }
 0x4ec   : > { %v2142_v23 = vpop.permute.xlu1 %2141  ;;  %2363 = vmatprep.subr.bf16.mxu1 %v2172_v41  ;;  %v2167_v8 = vmul.f32 %v2156_v40, %v2145_v25  ;;  %v2168_v10 = vmul.f32 %v2160_v57, %v2149_v32  ;;  %v1452_v25 = vld [vmem:[%s3380_s19 + $0x18] sm:$0xff]  ;;  %v4954_v32 = vld [vmem:[#allocation5_spill] sm:$0xff] }
 0x4ed   : > { %v2146_v42 = vsel %vm829_vm14, %v2134_v5, %v2142_v23  ;;  %v2150_v35 = vsel %vm829_vm14, %v2142_v23, %v2134_v5  ;;  %v4953_v5 = vld [vmem:[#allocation4_spill] sm:$0xff] }
 0x4ee   : > { %v2169_v53 = vmul.f32 %v2156_v40, %v2146_v42  ;;  %v2170_v28 = vmul.f32 %v2160_v57, %v2150_v35  ;;  %v2180_v47 = vpop.permute.xlu0 %2179  ;;  %v1450_v40 = vld [vmem:[%s3380_s19 + $0x8] sm:$0xff]  ;;  %v1453_v35 = vld [vmem:[%s3380_s19 + $0x20] sm:$0xff] }
 0x4ef   : > { %2364 = vmatpush1.bf16.msra.mxu1 %v2171_v34  ;;  %v4955_v34 = vld [vmem:[#allocation6_spill] sm:$0xff] }
 0x4f0   : > { %v2173_v7 = vpack.c.bf16 %v2169_v53, %v2167_v8  ;;  %v2182_v2 = vpop.permute.xlu1 %2181  ;;  %v2174_v6 = vpack.c.bf16 %v2170_v28, %v2168_v10 }
 0x4f2   : > { %v2188_v13 = vpop.permute.xlu0 %2187  ;;  %2365 = vmatprep.subr.bf16.mxu1 %v2174_v6  ;;  %v4957_v6 = vld [vmem:[#allocation8_spill] sm:$0xff] }
 0x4f3   : > { %v2195_v36 = vsel %vm883_vm15, %v2180_v47, %v2188_v13  ;;  %v2199_v44 = vsel %vm883_vm15, %v2188_v13, %v2180_v47  ;;  %2366 = vmatpush1.bf16.msra.mxu1 %v2173_v7  ;;  %v4956_v7 = vld [vmem:[#allocation7_spill] sm:$0xff]  ;;  %v1456_v13 = vld [vmem:[%s3380_s19 + $0x38] sm:$0xff] }
 0x4f4   : > { %v2190_v48 = vpop.permute.xlu1 %2189  ;;  %v2215_v4 = vmul.f32 %v2208_v12, %v2195_v36  ;;  %v2216_v24 = vmul.f32 %v2212_v38, %v2199_v44 }
 0x4f5   : > { %v2196_v49 = vsel %vm883_vm15, %v2182_v2, %v2190_v48  ;;  %v2200_v31 = vsel %vm883_vm15, %v2190_v48, %v2182_v2 }
 0x4f6   : > { %v2217_v56 = vmul.f32 %v2208_v12, %v2196_v49  ;;  %v2218_v33 = vmul.f32 %v2212_v38, %v2200_v31  ;;  %v2184_v21 = vpop.permute.xlu0 %2183  ;;  %2368 = vmatmul.mubr.bf16.vlgmr.msra.gmra.mrb[8].mxu1 %v3261_v62  ;;  %v4959_v49 = vld [vmem:[#allocation10_spill] sm:$0xff] }
 0x4f7   : > { %2377 = vmatprep.mubr.bf16.mxu1 %v3264_v9  ;;  %v4958_v9 = vld [vmem:[#allocation9_spill] sm:$0xff] }
 0x4f8   : > { %v2223_v63 = vpack.c.bf16 %v2217_v56, %v2215_v4  ;;  %v2186_v17 = vpop.permute.xlu1 %2185  ;;  %v2224_v43 = vpack.c.bf16 %v2218_v33, %v2216_v24 }
 0x4fa   : > { %v2192_v60 = vpop.permute.xlu0 %2191  ;;  %2388 = vmatprep.subr.bf16.mxu1 %v2224_v43 }
 0x4fb   : > { %v2197_v11 = vsel %vm883_vm15, %v2184_v21, %v2192_v60  ;;  %v2201_v27 = vsel %vm883_vm15, %v2192_v60, %v2184_v21  ;;  %2389 = vmatpush1.bf16.msra.mxu1 %v2223_v63 }
 0x4fc   : > { %v2194_v3 = vpop.permute.xlu1 %2193  ;;  %v2219_v51 = vmul.f32 %v2208_v12, %v2197_v11  ;;  %v2220_v18 = vmul.f32 %v2212_v38, %v2201_v27  ;;  %v1458_v11 = vld [vmem:[%s3380_s19 + $0x48] sm:$0xff]  ;;  %v4960_v27 = vld [vmem:[#allocation11_spill] sm:$0xff] }
 0x4fd   : > { %v2198_v30 = vsel %vm883_vm15, %v2186_v17, %v2194_v3  ;;  %v2202_v0 = vsel %vm883_vm15, %v2194_v3, %v2186_v17 }
 0x4fe   : > { %v2221_v57 = vmul.f32 %v2208_v12, %v2198_v30  ;;  %v2222_v59 = vmul.f32 %v2212_v38, %v2202_v0  ;;  %2378 = vmatmul.mubr.bf16.gmra.mrb[12].mxu1 %v3266_v58  ;;  %v1455_v38 = vld [vmem:[%s3380_s19 + $0x30] sm:$0xff]  ;;  %v1457_v58 = vld [vmem:[%s3380_s19 + $0x40] sm:$0xff]  ;;  %v4961_v30 = vld [vmem:[#allocation12_spill] sm:$0xff] }
 0x4ff   : > { %2420 = vmatprep.mubr.bf16.mxu1 %v4951_v54 }
 0x500   : > { %v2225_v1 = vpack.c.bf16 %v2221_v57, %v2219_v51  ;;  %v2226_v37 = vpack.c.bf16 %v2222_v59, %v2220_v18 }
 0x502   : > { %2390 = vmatprep.subr.bf16.mxu1 %v2226_v37 }
 0x503   : > { %2391 = vmatpush1.bf16.msra.mxu1 %v2225_v1 }
 0x506   : > { %3100 = vmatmul.mubr.msk.bf16.vlgmr.msra.gmra.mrb[8].mxu1 %vm1019_vm0, %v3267_v46 }
 0x507   : > { %2430 = vmatprep.mubr.bf16.mxu1 %v4951_v54 }
 0x50b   : > { %v4619_v50 = vpop.permute.xlu0 %2281 }
 0x50d   : > { %v4621_v16 = vpop.permute.xlu1 %2286 }
 0x50e   : > { %3101 = vmatmul.mubr.msk.bf16.gmra.mrb[12].mxu1 %vm1019_vm0, %v3268_v45 }
 0x50f   : > { %v4624_v52 = vpop.permute.xlu0 %2291  ;;  %2747 = vmatprep.mubr.bf16.mxu1 %v4951_v54 }
 0x511   : > { %v4627_v20 = vpop.permute.xlu1 %2296 }
 0x513   : > { %v1195_v22 = vpop.permute.xlu0 %1194 }
 0x514   : > { %v1371_v26 = vadd.f32 %v4952_v19, %v1195_v22  ;;  %v1373_v29 = vadd.f32 %v4953_v5, %v1195_v22  ;;  %v1459_v22 = vld [vmem:[%s3380_s19 + $0x50] sm:$0xff]  ;;  %v1460_v19 = vld [vmem:[%s3380_s19 + $0x58] sm:$0xff] }
 0x515   : > { %v1200_v14 = vpop.permute.xlu1 %1199 }
 0x516   : > { %v1481_v39 = vadd.f32 %v1449_v61, %v1371_v26  ;;  %v1482_v41 = vadd.f32 %v1450_v40, %v1373_v29  ;;  %v1375_v23 = vadd.f32 %v4954_v32, %v1200_v14  ;;  %v1377_v42 = vadd.f32 %v4955_v34, %v1200_v14  ;;  %v4962_v29 = vld [vmem:[#allocation13_spill] sm:$0xff] }
 0x517   : > { %v1205_v8 = vpop.permute.xlu0 %1204 }
 0x518   : > { %vm1513_vm8 = vcmp.gt.f32.partialorder %v1481_v39, 0.0  ;;  %vm1514_vm9 = vcmp.gt.f32.partialorder %v1482_v41, 0.0  ;;  %v1545_v10 = vmul.f32 0.01, %v1481_v39  ;;  %v1546_v53 = vmul.f32 0.01, %v1482_v41 }
 0x519   : > { %v1483_v28 = vadd.f32 %v1451_v55, %v1375_v23  ;;  %v1484_v47 = vadd.f32 %v1452_v25, %v1377_v42  ;;  %v1381_v2 = vadd.f32 %v4956_v7, %v1205_v8  ;;  %v1383_v12 = vadd.f32 %v4957_v6, %v1205_v8  ;;  %v1210_v62 = vpop.permute.xlu1 %1209  ;;  %v1461_v55 = vld [vmem:[%s3380_s19 + $0x60] sm:$0xff] }
 0x51a   : > { %v1577_v36 = vsel %vm1513_vm8, %v1481_v39, %v1545_v10  ;;  %v1578_v44 = vsel %vm1514_vm9, %v1482_v41, %v1546_v53  ;;  %v1385_v48 = vadd.f32 %v4958_v9, %v1210_v62  ;;  %v1387_v31 = vadd.f32 %v4959_v49, %v1210_v62  ;;  %v4963_v39 = vld [vmem:[#allocation14_spill] sm:$0xff]  ;;  %v4964_v8 = vld [vmem:[#allocation15_spill] sm:$0xff]  ;;  %v4965_v53 = vld [vmem:[#allocation16_spill] sm:$0xff] }
 0x51b   : > { %1609 = vst [vmem:[%s4643_s17] sm:$0xff] %v1577_v36  ;;  %1610 = vst [vmem:[%s4643_s17 + $0x8] sm:$0xff] %v1578_v44  ;;  %vm1515_vm10 = vcmp.gt.f32.partialorder %v1483_v28, 0.0  ;;  %vm1516_vm11 = vcmp.gt.f32.partialorder %v1484_v47, 0.0  ;;  %v1547_v4 = vmul.f32 0.01, %v1483_v28  ;;  %v1215_v56 = vpop.permute.xlu0 %1214  ;;  %v1485_v33 = vadd.f32 %v1453_v35, %v1381_v2  ;;  %v1462_v35 = vld [vmem:[%s3380_s19 + $0x68] sm:$0xff] }
 0x51c   : > { %v1548_v24 = vmul.f32 0.01, %v1484_v47  ;;  %v1486_v21 = vadd.f32 %v1454_v15, %v1383_v12  ;;  %v1487_v63 = vadd.f32 %v1455_v38, %v1385_v48  ;;  %v1488_v17 = vadd.f32 %v1456_v13, %v1387_v31  ;;  %v1464_v15 = vld [vmem:[%s3380_s19 + $0x78] sm:$0xff]  ;;  %v4966_v12 = vld [vmem:[#allocation17_spill] sm:$0xff] }
 0x51d   : > { %v1579_v43 = vsel %vm1515_vm10, %v1483_v28, %v1547_v4  ;;  %v1391_v3 = vadd.f32 %v4960_v27, %v1215_v56  ;;  %v1393_v0 = vadd.f32 %v4961_v30, %v1215_v56  ;;  %v1220_v51 = vpop.permute.xlu1 %1219  ;;  %vm1517_vm12 = vcmp.gt.f32.partialorder %v1485_v33, 0.0  ;;  %v4967_v13 = vld [vmem:[#allocation18_spill] sm:$0xff] }
 0x51e   : > { %v1580_v60 = vsel %vm1516_vm11, %v1484_v47, %v1548_v24  ;;  %1611 = vst [vmem:[%s4643_s17 + $0x10] sm:$0xff] %v1579_v43  ;;  %vm1518_vm13 = vcmp.gt.f32.partialorder %v1486_v21, 0.0  ;;  %v1549_v18 = vmul.f32 0.01, %v1485_v33  ;;  %v1550_v57 = vmul.f32 0.01, %v1486_v21 }
 0x51f   : > { %1612 = vst [vmem:[%s4643_s17 + $0x18] sm:$0xff] %v1580_v60  ;;  %vm1519_vm14 = vcmp.gt.f32.partialorder %v1487_v63, 0.0  ;;  %vm1520_vm15 = vcmp.gt.f32.partialorder %v1488_v17, 0.0  ;;  %v1551_v59 = vmul.f32 0.01, %v1487_v63  ;;  %v1225_v37 = vpop.permute.xlu0 %1224  ;;  %v1489_v61 = vadd.f32 %v1457_v58, %v1391_v3  ;;  %v1463_v47 = vld [vmem:[%s3380_s19 + $0x70] sm:$0xff] }
 0x520   : > { %v1552_v1 = vmul.f32 0.01, %v1488_v17  ;;  %v1581_v46 = vsel %vm1517_vm12, %v1485_v33, %v1549_v18  ;;  %v1582_v45 = vsel %vm1518_vm13, %v1486_v21, %v1550_v57  ;;  %v1490_v40 = vadd.f32 %v1458_v11, %v1393_v0  ;;  %v1465_v33 = vld [vmem:[%s3380_s19 + $0x80] sm:$0xff]  ;;  %v1466_v21 = vld [vmem:[%s3380_s19 + $0x88] sm:$0xff] }
 0x521   : > { %1613 = vst [vmem:[%s4643_s17 + $0x20] sm:$0xff] %v1581_v46  ;;  %1614 = vst [vmem:[%s4643_s17 + $0x28] sm:$0xff] %v1582_v45  ;;  %v1583_v26 = vsel %vm1519_vm14, %v1487_v63, %v1551_v59  ;;  %v1395_v14 = vadd.f32 %v4962_v29, %v1220_v51  ;;  %v1397_v41 = vadd.f32 %v4963_v39, %v1220_v51  ;;  %v1230_v25 = vpop.permute.xlu1 %1229  ;;  %vm1521_vm3 = vcmp.gt.f32.partialorder %v1489_v61, 0.0  ;;  %v4968_v63 = vld [vmem:[#allocation19_spill] sm:$0xff]  ;;  %v4969_v43 = vld [vmem:[#allocation20_spill] sm:$0xff] }
 0x522   : > { %v1584_v5 = vsel %vm1520_vm15, %v1488_v17, %v1552_v1  ;;  %1615 = vst [vmem:[%s4643_s17 + $0x30] sm:$0xff] %v1583_v26  ;;  %vm1522_vm4 = vcmp.gt.f32.partialorder %v1490_v40, 0.0  ;;  %v1553_v32 = vmul.f32 0.01, %v1489_v61  ;;  %v1554_v23 = vmul.f32 0.01, %v1490_v40 }
 0x523   : > { %1616 = vst [vmem:[%s4643_s17 + $0x38] sm:$0xff] %v1584_v5  ;;  %v1491_v34 = vadd.f32 %v1459_v22, %v1395_v14  ;;  %v1492_v42 = vadd.f32 %v1460_v19, %v1397_v41  ;;  %v1401_v10 = vadd.f32 %v4964_v8, %v1225_v37  ;;  %v1403_v28 = vadd.f32 %v4965_v53, %v1225_v37  ;;  %v1235_v7 = vpop.permute.xlu0 %1234  ;;  %v1467_v1 = vld [vmem:[%s3380_s19 + $0x90] sm:$0xff]  ;;  %v1468_v37 = vld [vmem:[%s3380_s19 + $0x98] sm:$0xff]  ;;  %v1469_v26 = vld [vmem:[%s3380_s19 + $0xa0] sm:$0xff] }
 0x524   : > { %v1585_v2 = vsel %vm1521_vm3, %v1489_v61, %v1553_v32  ;;  %v1586_v6 = vsel %vm1522_vm4, %v1490_v40, %v1554_v23  ;;  %v1405_v38 = vadd.f32 %v4966_v12, %v1230_v25  ;;  %v1407_v62 = vadd.f32 %v4967_v13, %v1230_v25  ;;  %v4970_v61 = vld [vmem:[#allocation21_spill] sm:$0xff]  ;;  %v4971_v22 = vld [vmem:[#allocation22_spill] sm:$0xff]  ;;  %v1470_v41 = vld [vmem:[%s3380_s19 + $0xa8] sm:$0xff] }
 0x525   : > { %1617 = vst [vmem:[%s4643_s17 + $0x40] sm:$0xff] %v1585_v2  ;;  %1618 = vst [vmem:[%s4643_s17 + $0x48] sm:$0xff] %v1586_v6  ;;  %vm1523_vm5 = vcmp.gt.f32.partialorder %v1491_v34, 0.0  ;;  %vm1524_vm6 = vcmp.gt.f32.partialorder %v1492_v42, 0.0  ;;  %v1555_v36 = vmul.f32 0.01, %v1491_v34  ;;  %v1240_v9 = vpop.permute.xlu1 %1239  ;;  %v1493_v48 = vadd.f32 %v1461_v55, %v1401_v10 }
 0x526   : > { %v1556_v44 = vmul.f32 0.01, %v1492_v42  ;;  %v1494_v49 = vadd.f32 %v1462_v35, %v1403_v28  ;;  %v1495_v31 = vadd.f32 %v1463_v47, %v1405_v38  ;;  %v1496_v4 = vadd.f32 %v1464_v15, %v1407_v62  ;;  %v4972_v55 = vld [vmem:[#allocation23_spill] sm:$0xff]  ;;  %v4973_v32 = vld [vmem:[#allocation24_spill] sm:$0xff]  ;;  %v4974_v10 = vld [vmem:[#allocation25_spill] sm:$0xff] }
 0x527   : > { %v1587_v24 = vsel %vm1523_vm5, %v1491_v34, %v1555_v36  ;;  %v1411_v17 = vadd.f32 %v4968_v63, %v1235_v7  ;;  %v1413_v60 = vadd.f32 %v4969_v43, %v1235_v7  ;;  %vm1525_vm7 = vcmp.gt.f32.partialorder %v1493_v48, 0.0  ;;  %v1245_v27 = vpop.permute.xlu0 %1244  ;;  %v1471_v34 = vld [vmem:[%s3380_s19 + $0xb0] sm:$0xff]  ;;  %v4975_v28 = vld [vmem:[#allocation26_spill] sm:$0xff] }
 0x528   : > { %v1588_v56 = vsel %vm1524_vm6, %v1492_v42, %v1556_v44  ;;  %1619 = vst [vmem:[%s4643_s17 + $0x50] sm:$0xff] %v1587_v24  ;;  %vm1526_vm1 = vcmp.gt.f32.partialorder %v1494_v49, 0.0  ;;  %v1557_v58 = vmul.f32 0.01, %v1493_v48  ;;  %v1558_v11 = vmul.f32 0.01, %v1494_v49 }
 0x529   : > { %1620 = vst [vmem:[%s4643_s17 + $0x58] sm:$0xff] %v1588_v56  ;;  %vm1527_vm2 = vcmp.gt.f32.partialorder %v1495_v31, 0.0  ;;  %vm1528_vm8 = vcmp.gt.f32.partialorder %v1496_v4, 0.0  ;;  %v1559_v3 = vmul.f32 0.01, %v1495_v31  ;;  %v1250_v0 = vpop.permute.xlu1 %1249  ;;  %v1497_v57 = vadd.f32 %v1465_v33, %v1411_v17  ;;  %v1472_v42 = vld [vmem:[%s3380_s19 + $0xb8] sm:$0xff] }
 0x52a   : > { %v1560_v30 = vmul.f32 0.01, %v1496_v4  ;;  %v1589_v51 = vsel %vm1525_vm7, %v1493_v48, %v1557_v58  ;;  %v1590_v18 = vsel %vm1526_vm1, %v1494_v49, %v1558_v11  ;;  %v1498_v59 = vadd.f32 %v1466_v21, %v1413_v60  ;;  %v1474_v48 = vld [vmem:[%s3380_s19 + $0xc8] sm:$0xff]  ;;  %v4976_v49 = vld [vmem:[#allocation27_spill] sm:$0xff]  ;;  %v1475_v11 = vld [vmem:[%s3380_s19 + $0xd0] sm:$0xff] }
 0x52b   : > { %1621 = vst [vmem:[%s4643_s17 + $0x60] sm:$0xff] %v1589_v51  ;;  %1622 = vst [vmem:[%s4643_s17 + $0x68] sm:$0xff] %v1590_v18  ;;  %v1591_v46 = vsel %vm1527_vm2, %v1495_v31, %v1559_v3  ;;  %v1415_v40 = vadd.f32 %v4970_v61, %v1240_v9  ;;  %v1417_v19 = vadd.f32 %v4971_v22, %v1240_v9  ;;  %vm1529_vm9 = vcmp.gt.f32.partialorder %v1497_v57, 0.0  ;;  %v1255_v15 = vpop.permute.xlu0 %1254  ;;  %v1473_v9 = vld [vmem:[%s3380_s19 + $0xc0] sm:$0xff]  ;;  %v4978_v51 = vld [vmem:[#allocation29_spill] sm:$0xff] }
 0x52c   : > { %v1592_v45 = vsel %vm1528_vm8, %v1496_v4, %v1560_v30  ;;  %1623 = vst [vmem:[%s4643_s17 + $0x70] sm:$0xff] %v1591_v46  ;;  %vm1530_vm10 = vcmp.gt.f32.partialorder %v1498_v59, 0.0  ;;  %v1561_v5 = vmul.f32 0.01, %v1497_v57  ;;  %v1562_v29 = vmul.f32 0.01, %v1498_v59 }
 0x52d   : > { %1624 = vst [vmem:[%s4643_s17 + $0x78] sm:$0xff] %v1592_v45  ;;  %v1499_v14 = vadd.f32 %v1467_v1, %v1415_v40  ;;  %v1500_v39 = vadd.f32 %v1468_v37, %v1417_v19  ;;  %v1421_v25 = vadd.f32 %v4972_v55, %v1245_v27  ;;  %v1423_v23 = vadd.f32 %v4973_v32, %v1245_v27  ;;  %v1260_v6 = vpop.permute.xlu1 %1259  ;;  %v4977_v4 = vld [vmem:[#allocation28_spill] sm:$0xff]  ;;  %v1476_v27 = vld [vmem:[%s3380_s19 + $0xd8] sm:$0xff]  ;;  %v1477_v1 = vld [vmem:[%s3380_s19 + $0xe0] sm:$0xff] }
 0x52e   : > { %v1593_v35 = vsel %vm1529_vm9, %v1497_v57, %v1561_v5  ;;  %v1594_v8 = vsel %vm1530_vm10, %v1498_v59, %v1562_v29  ;;  %v1425_v53 = vadd.f32 %v4974_v10, %v1250_v0  ;;  %v1427_v47 = vadd.f32 %v4975_v28, %v1250_v0  ;;  %v4979_v57 = vld [vmem:[#allocation30_spill] sm:$0xff]  ;;  %v1478_v22 = vld [vmem:[%s3380_s19 + $0xe8] sm:$0xff]  ;;  %v4980_v19 = vld [vmem:[#allocation31_spill] sm:$0xff] }
 0x52f   : > { %1625 = vst [vmem:[%s4643_s17 + $0x80] sm:$0xff] %v1593_v35  ;;  %1626 = vst [vmem:[%s4643_s17 + $0x88] sm:$0xff] %v1594_v8  ;;  %vm1531_vm11 = vcmp.gt.f32.partialorder %v1499_v14, 0.0  ;;  %vm1532_vm12 = vcmp.gt.f32.partialorder %v1500_v39, 0.0  ;;  %v1563_v7 = vmul.f32 0.01, %v1499_v14  ;;  %v1501_v12 = vadd.f32 %v1469_v26, %v1421_v25  ;;  %v1265_v3 = vpop.permute.xlu0 %1264 }
 0x530   : > { %v1564_v2 = vmul.f32 0.01, %v1500_v39  ;;  %v1502_v38 = vadd.f32 %v1470_v41, %v1423_v23  ;;  %v1503_v13 = vadd.f32 %v1471_v34, %v1425_v53  ;;  %v1504_v62 = vadd.f32 %v1472_v42, %v1427_v47  ;;  %v4981_v5 = vld [vmem:[#allocation32_spill] sm:$0xff]  ;;  %v4982_v25 = vld [vmem:[#allocation33_spill] sm:$0xff]  ;;  %v4983_v23 = vld [vmem:[#allocation34_spill] sm:$0xff] }
 0x531   : > { %v1595_v36 = vsel %vm1531_vm11, %v1499_v14, %v1563_v7  ;;  %v1431_v31 = vadd.f32 %v4976_v49, %v1255_v15  ;;  %v1433_v24 = vadd.f32 %v4977_v4, %v1255_v15  ;;  %vm1533_vm13 = vcmp.gt.f32.partialorder %v1501_v12, 0.0  ;;  %v1270_v37 = vpop.permute.xlu1 %1269  ;;  %v1479_v14 = vld [vmem:[%s3380_s19 + $0xf0] sm:$0xff] }
 0x532   : > { %v1596_v44 = vsel %vm1532_vm12, %v1500_v39, %v1564_v2  ;;  %1627 = vst [vmem:[%s4643_s17 + $0x90] sm:$0xff] %v1595_v36  ;;  %vm1534_vm14 = vcmp.gt.f32.partialorder %v1502_v38, 0.0  ;;  %v1565_v56 = vmul.f32 0.01, %v1501_v12  ;;  %v1566_v33 = vmul.f32 0.01, %v1502_v38 }
 0x533   : > { %1628 = vst [vmem:[%s4643_s17 + $0x98] sm:$0xff] %v1596_v44  ;;  %vm1535_vm15 = vcmp.gt.f32.partialorder %v1503_v13, 0.0  ;;  %vm1536_vm3 = vcmp.gt.f32.partialorder %v1504_v62, 0.0  ;;  %v1567_v21 = vmul.f32 0.01, %v1503_v13  ;;  %v1505_v60 = vadd.f32 %v1473_v9, %v1431_v31  ;;  %v1480_v39 = vld [vmem:[%s3380_s19 + $0xf8] sm:$0xff] }
 0x534   : > { %v1568_v63 = vmul.f32 0.01, %v1504_v62  ;;  %v1597_v17 = vsel %vm1533_vm13, %v1501_v12, %v1565_v56  ;;  %v1598_v43 = vsel %vm1534_vm14, %v1502_v38, %v1566_v33  ;;  %v1506_v58 = vadd.f32 %v1474_v48, %v1433_v24 }
 0x535   : > { %1629 = vst [vmem:[%s4643_s17 + $0xa0] sm:$0xff] %v1597_v17  ;;  %1630 = vst [vmem:[%s4643_s17 + $0xa8] sm:$0xff] %v1598_v43  ;;  %v1599_v30 = vsel %vm1535_vm15, %v1503_v13, %v1567_v21  ;;  %v1435_v18 = vadd.f32 %v4978_v51, %v1260_v6  ;;  %v1437_v59 = vadd.f32 %v4979_v57, %v1260_v6  ;;  %vm1537_vm4 = vcmp.gt.f32.partialorder %v1505_v60, 0.0 }
 0x536   : > { %v1600_v0 = vsel %vm1536_vm3, %v1504_v62, %v1568_v63  ;;  %1631 = vst [vmem:[%s4643_s17 + $0xb0] sm:$0xff] %v1599_v30  ;;  %vm1538_vm5 = vcmp.gt.f32.partialorder %v1506_v58, 0.0  ;;  %v1569_v46 = vmul.f32 0.01, %v1505_v60  ;;  %v1570_v45 = vmul.f32 0.01, %v1506_v58 }
 0x537   : > { %1632 = vst [vmem:[%s4643_s17 + $0xb8] sm:$0xff] %v1600_v0  ;;  %v1507_v61 = vadd.f32 %v1475_v11, %v1435_v18  ;;  %v1508_v40 = vadd.f32 %v1476_v27, %v1437_v59  ;;  %v1441_v26 = vadd.f32 %v4980_v19, %v1265_v3  ;;  %v1443_v29 = vadd.f32 %v4981_v5, %v1265_v3  ;;  %v3269_v5 = vld [vmem:[%s4898_s5] sm:$0xff]  }
 0x538   : > { %v1601_v41 = vsel %vm1537_vm4, %v1505_v60, %v1569_v46  ;;  %v1602_v55 = vsel %vm1538_vm5, %v1506_v58, %v1570_v45  ;;  %v1445_v32 = vadd.f32 %v4982_v25, %v1270_v37  ;;  %v1447_v34 = vadd.f32 %v4983_v23, %v1270_v37  ;;  %v3276_v25 = vld [vmem:[%s4898_s5 + $0x30] sm:$0xff]   ;;  %v2509_v23 = vpop.permute.xlu1 %2508 }
 0x539   : > { %1633 = vst [vmem:[%s4643_s17 + $0xc0] sm:$0xff] %v1601_v41  ;;  %1634 = vst [vmem:[%s4643_s17 + $0xc8] sm:$0xff] %v1602_v55  ;;  %vm1539_vm6 = vcmp.gt.f32.partialorder %v1507_v61, 0.0  ;;  %vm1540_vm7 = vcmp.gt.f32.partialorder %v1508_v40, 0.0  ;;  %v1571_v42 = vmul.f32 0.01, %v1507_v61  ;;  %v1509_v8 = vadd.f32 %v1477_v1, %v1441_v26 }
 0x53a   : > { %v1572_v35 = vmul.f32 0.01, %v1508_v40  ;;  %v1510_v10 = vadd.f32 %v1478_v22, %v1443_v29  ;;  %v1511_v53 = vadd.f32 %v1479_v14, %v1445_v32  ;;  %v1512_v28 = vadd.f32 %v1480_v39, %v1447_v34  ;;  %v3271_v29 = vld [vmem:[%s4898_s5 + $0x8] sm:$0xff]   ;;  %v3272_v14 = vld [vmem:[%s4898_s5 + $0x10] sm:$0xff]   ;;  %v3273_v39 = vld [vmem:[%s4898_s5 + $0x18] sm:$0xff]   ;;  %v2504_v32 = vpop.permute.xlu0 %2503 }
 0x53b   : > { %v1603_v47 = vsel %vm1539_vm6, %v1507_v61, %v1571_v42  ;;  %vm1541_vm1 = vcmp.gt.f32.partialorder %v1509_v8, 0.0  ;;  %v1573_v7 = vmul.f32 0.01, %v1509_v8  ;;  %v3274_v41 = vld [vmem:[%s4898_s5 + $0x20] sm:$0xff]   ;;  %v3275_v55 = vld [vmem:[%s4898_s5 + $0x28] sm:$0xff]  }
 0x53c   : > { %v1604_v15 = vsel %vm1540_vm7, %v1508_v40, %v1572_v35  ;;  %1635 = vst [vmem:[%s4643_s17 + $0xd0] sm:$0xff] %v1603_v47  ;;  %vm1542_vm2 = vcmp.gt.f32.partialorder %v1510_v10, 0.0  ;;  %v1574_v2 = vmul.f32 0.01, %v1510_v10  ;;  %vm1543_vm8 = vcmp.gt.f32.partialorder %v1511_v53, 0.0  ;;  %v4780_v42 = vpop.permute.xlu1 %2518 }
 0x53d   : > { %1636 = vst [vmem:[%s4643_s17 + $0xd8] sm:$0xff] %v1604_v15  ;;  %vm1544_vm9 = vcmp.gt.f32.partialorder %v1512_v28, 0.0  ;;  %v1575_v6 = vmul.f32 0.01, %v1511_v53  ;;  %v1576_v12 = vmul.f32 0.01, %v1512_v28  ;;  %v1605_v38 = vsel %vm1541_vm1, %v1509_v8, %v1573_v7 }
 0x53e   : > { %v1606_v13 = vsel %vm1542_vm2, %v1510_v10, %v1574_v2  ;;  %1637 = vst [vmem:[%s4643_s17 + $0xe0] sm:$0xff] %v1605_v38  ;;  %v4778_v34 = vpop.permute.xlu0 %2513 }
 0x53f   : > { %1638 = vst [vmem:[%s4643_s17 + $0xe8] sm:$0xff] %v1606_v13  ;;  %v1607_v62 = vsel %vm1543_vm8, %v1511_v53, %v1575_v6  ;;  %v1608_v36 = vsel %vm1544_vm9, %v1512_v28, %v1576_v12  ;;  %v3118_v13 = vld [vmem:[%s3380_s19 + $0x100] sm:$0xff] }
 0x540   : > { %1639 = vst [vmem:[%s4643_s17 + $0xf0] sm:$0xff] %v1607_v62  ;;  %1640 = vst [vmem:[%s4643_s17 + $0xf8] sm:$0xff] %v1608_v36  ;;  %v4784_v8 = vpop.permute.xlu1 %2528  ;;  %v3146_v36 = vld [vmem:[%s3380_s19 + $0x1e0] sm:$0xff] }
 0x542   : > { %v4782_v35 = vpop.permute.xlu0 %2523 }
 0x546   : > { %v4786_v10 = vpop.permute.xlu0 %2533 }
 0x54a   : > { %v4790_v53 = vpop.permute.xlu0 %2543 }
 0x54e   : > { %v4794_v47 = vpop.permute.xlu0 %2553 }
 0x552   : > { %v4798_v7 = vpop.permute.xlu0 %2563 }
 0x556   : > { %v2574_v6 = vpop.permute.xlu0 %2573 }
 0x5d9   : > { %v2422_v44 = vpop.f32.mrb[8].mxu1 }
 0x5da   : > { %v3198_v9 = vadd.f32 %v2422_v44, %v4619_v50  ;;  %v2424_v48 = vpop.f32.mrb[9].mxu1 }
 0x5db   : > { %v3199_v49 = vadd.f32 %v2424_v48, %v4619_v50  ;;  %v2426_v31 = vpop.f32.mrb[10].mxu1 }
 0x5dc   : > { %v2449_v4 = vmul.f32 0.01, %v3198_v9  ;;  %v3200_v24 = vadd.f32 %v2426_v31, %v4621_v16  ;;  %v2428_v56 = vpop.f32.mrb[11].mxu1  ;;  %vm2441_vm10 = vcmp.gt.f32.partialorder %v3198_v9, 0.0 }
 0x5dd   : > { %v2450_v33 = vmul.f32 0.01, %v3199_v49  ;;  %v3201_v21 = vadd.f32 %v2428_v56, %v4621_v16  ;;  %vm2442_vm11 = vcmp.gt.f32.partialorder %v3199_v49, 0.0 }
 0x5de   : > { %vm2443_vm12 = vcmp.gt.f32.partialorder %v3200_v24, 0.0  ;;  %v2451_v63 = vmul.f32 0.01, %v3200_v24  ;;  %v2457_v43 = vsel %vm2441_vm10, %v3198_v9, %v2449_v4  ;;  %v3147_v4 = vld [vmem:[%s3380_s19 + $0x1e8] sm:$0xff] }
 0x5df   : > { %vm2444_vm13 = vcmp.gt.f32.partialorder %v3201_v21, 0.0  ;;  %v2452_v17 = vmul.f32 0.01, %v3201_v21  ;;  %v2458_v27 = vsel %vm2442_vm11, %v3199_v49, %v2450_v33  ;;  %v3119_v49 = vld [vmem:[%s3380_s19 + $0x108] sm:$0xff] }
 0x5e0   : > { %v2459_v60 = vsel %vm2443_vm12, %v3200_v24, %v2451_v63 }
 0x5e1   : > { %v2481_v58 = vpack.c.bf16 %v2459_v60, %v2457_v43  ;;  %v2432_v11 = vpop.f32.mrb[12].mxu1  ;;  %v2460_v50 = vsel %vm2444_vm13, %v3201_v21, %v2452_v17  ;;  %v3120_v60 = vld [vmem:[%s3380_s19 + $0x110] sm:$0xff] }
 0x5e2   : > { %v3202_v3 = vadd.f32 %v2432_v11, %v4624_v52  ;;  %v2434_v30 = vpop.f32.mrb[13].mxu1  ;;  %v2482_v0 = vpack.c.bf16 %v2460_v50, %v2458_v27 }
 0x5e3   : > { %v3203_v51 = vadd.f32 %v2434_v30, %v4624_v52  ;;  %v2436_v18 = vpop.f32.mrb[14].mxu1  ;;  %v3148_v30 = vld [vmem:[%s3380_s19 + $0x1f0] sm:$0xff] }
 0x5e4   : > { %v2453_v57 = vmul.f32 0.01, %v3202_v3  ;;  %v3204_v16 = vadd.f32 %v2436_v18, %v4627_v20  ;;  %v2438_v59 = vpop.f32.mrb[15].mxu1  ;;  %2645 = vmatprep.subr.bf16.mxu0 %v2482_v0  ;;  %3186 = vmatprep.subr.bf16.mxu1 %v2482_v0  ;;  %vm2445_vm14 = vcmp.gt.f32.partialorder %v3202_v3, 0.0 }
 0x5e5   : > { %v2454_v1 = vmul.f32 0.01, %v3203_v51  ;;  %v3205_v37 = vadd.f32 %v2438_v59, %v4627_v20  ;;  %2646 = vmatpush1.bf16.msra.mxu0 %v2481_v58  ;;  %3188 = vmatpush1.bf16.msra.mxu1 %v2481_v58  ;;  %vm2446_vm15 = vcmp.gt.f32.partialorder %v3203_v51, 0.0  ;;  %v3270_v20 = vld [vmem:[%s4898_s5 + $0x38] sm:$0xff]  }
 0x5e6   : > { %vm2447_vm3 = vcmp.gt.f32.partialorder %v3204_v16, 0.0  ;;  %v2455_v46 = vmul.f32 0.01, %v3204_v16  ;;  %v2461_v61 = vsel %vm2445_vm14, %v3202_v3, %v2453_v57  ;;  %v3149_v57 = vld [vmem:[%s3380_s19 + $0x1f8] sm:$0xff] }
 0x5e7   : > { %vm2448_vm4 = vcmp.gt.f32.partialorder %v3205_v37, 0.0  ;;  %v2456_v45 = vmul.f32 0.01, %v3205_v37  ;;  %v2462_v22 = vsel %vm2446_vm15, %v3203_v51, %v2454_v1  ;;  %v3121_v51 = vld [vmem:[%s3380_s19 + $0x118] sm:$0xff] }
 0x5e8   : > { %v2463_v52 = vsel %vm2447_vm3, %v3204_v16, %v2455_v46 }
 0x5e9   : > { %v2483_v40 = vpack.c.bf16 %v2463_v52, %v2461_v61  ;;  %v2464_v19 = vsel %vm2448_vm4, %v3205_v37, %v2456_v45 }
 0x5ea   : > { %v2484_v26 = vpack.c.bf16 %v2464_v19, %v2462_v22 }
 0x5ec   : > { %2647 = vmatprep.subr.bf16.mxu0 %v2484_v26  ;;  %3187 = vmatprep.subr.bf16.mxu1 %v2484_v26 }
 0x5ed   : > { %2648 = vmatpush1.bf16.msra.mxu0 %v2483_v40  ;;  %3189 = vmatpush1.bf16.msra.mxu1 %v2483_v40 }
 0x5f0   : > { %3110 = vmatmul.mubr.msk.bf16.vlgmr.msra.gmra.mrb[48].mxu0 %vm1019_vm0, %v3269_v5  ;;  %3117 = vmatmul.mubr.msk.bf16.vlgmr.msra.gmra.mrb[16].mxu1 %vm1019_vm0, %v3270_v20  ;;  %v3122_v20 = vld [vmem:[%s3380_s19 + $0x120] sm:$0xff] }
 0x5f1   : > { %2687 = vmatprep.mubr.bf16.mxu0 %v4951_v54 }
 0x5f8   : > { %3111 = vmatmul.mubr.msk.bf16.gmra.mrb[52].mxu0 %vm1019_vm0, %v3271_v29 }
 0x5f9   : > { %2697 = vmatprep.mubr.bf16.mxu0 %v4951_v54 }
 0x600   : > { %3112 = vmatmul.mubr.msk.bf16.gmra.mrb[56].mxu0 %vm1019_vm0, %v3272_v14 }
 0x601   : > { %2707 = vmatprep.mubr.bf16.mxu0 %v4951_v54 }
 0x608   : > { %3113 = vmatmul.mubr.msk.bf16.gmra.mrb[60].mxu0 %vm1019_vm0, %v3273_v39 }
 0x609   : > { %2717 = vmatprep.mubr.bf16.mxu0 %v4951_v54 }
 0x610   : > { %3114 = vmatmul.mubr.msk.bf16.gmra.mrb[64].mxu0 %vm1019_vm0, %v3274_v41 }
 0x611   : > { %2727 = vmatprep.mubr.bf16.mxu0 %v4951_v54 }
 0x618   : > { %3115 = vmatmul.mubr.msk.bf16.gmra.mrb[68].mxu0 %vm1019_vm0, %v3275_v55 }
 0x619   : > { %2737 = vmatprep.mubr.bf16.mxu0 %v4951_v54  ;;  %v4788_v54 = vpop.permute.xlu1 %2538 }
 0x61d   : > { %v4792_v28 = vpop.permute.xlu1 %2548 }
 0x620   : > { %3116 = vmatmul.mubr.msk.bf16.gmra.mrb[72].mxu0 %vm1019_vm0, %v3276_v25 }
 0x621   : > { %v4796_v15 = vpop.permute.xlu1 %2558 }
 0x625   : > { %v4800_v2 = vpop.permute.xlu1 %2568 }
 0x629   : > { %v2579_v12 = vpop.permute.xlu1 %2578 }
 0x6c3   : > { %v2679_v38 = vpop.f32.mrb[48].mxu0  ;;  %v2749_v62 = vpop.f32.mrb[16].mxu1 }
 0x6c4   : > { %v2680_v44 = vadd.f32 %v2679_v38, %v2504_v32  ;;  %v2750_v9 = vadd.f32 %v2749_v62, %v2574_v6  ;;  %v2681_v48 = vpop.f32.mrb[49].mxu0  ;;  %v2751_v31 = vpop.f32.mrb[17].mxu1 }
 0x6c5   : > { %v2682_v24 = vadd.f32 %v2681_v48, %v2504_v32  ;;  %v2752_v56 = vadd.f32 %v2751_v31, %v2574_v6  ;;  %v2683_v33 = vpop.f32.mrb[50].mxu0  ;;  %v2753_v21 = vpop.f32.mrb[18].mxu1  ;;  %v3123_v6 = vld [vmem:[%s3380_s19 + $0x128] sm:$0xff] }
 0x6c6   : > { %v2790_v63 = vadd.f32 %v3118_v13, %v2680_v44  ;;  %v2818_v17 = vadd.f32 %v3146_v36, %v2750_v9  ;;  %v2684_v43 = vadd.f32 %v2683_v33, %v2509_v23  ;;  %v2754_v58 = vadd.f32 %v2753_v21, %v2579_v12  ;;  %v2685_v11 = vpop.f32.mrb[51].mxu0  ;;  %v2755_v27 = vpop.f32.mrb[19].mxu1  ;;  %v3124_v36 = vld [vmem:[%s3380_s19 + $0x130] sm:$0xff] }
 0x6c7   : > { %v2791_v50 = vadd.f32 %v3119_v49, %v2682_v24  ;;  %v2819_v3 = vadd.f32 %v3147_v4, %v2752_v56  ;;  %v2686_v0 = vadd.f32 %v2685_v11, %v2509_v23  ;;  %v2756_v18 = vadd.f32 %v2755_v27, %v2579_v12  ;;  %v3125_v49 = vld [vmem:[%s3380_s19 + $0x138] sm:$0xff]  ;;  %v3127_v11 = vld [vmem:[%s3380_s19 + $0x148] sm:$0xff] }
 0x6c8   : > { %vm2822_vm0 = vcmp.gt.f32.partialorder %v2790_v63, 0.0  ;;  %v2854_v16 = vmul.f32 0.01, %v2790_v63  ;;  %vm2850_vm5 = vcmp.gt.f32.partialorder %v2818_v17, 0.0  ;;  %v2882_v59 = vmul.f32 0.01, %v2818_v17 }
 0x6c9   : > { %vm2823_vm6 = vcmp.gt.f32.partialorder %v2791_v50, 0.0  ;;  %v2855_v1 = vmul.f32 0.01, %v2791_v50  ;;  %vm2851_vm7 = vcmp.gt.f32.partialorder %v2819_v3, 0.0  ;;  %v2883_v37 = vmul.f32 0.01, %v2819_v3 }
 0x6ca   : > { %v2886_v46 = vsel %vm2822_vm0, %v2790_v63, %v2854_v16  ;;  %v2914_v45 = vsel %vm2850_vm5, %v2818_v17, %v2882_v59  ;;  %v2792_v61 = vadd.f32 %v3120_v60, %v2684_v43  ;;  %v2820_v52 = vadd.f32 %v3148_v30, %v2754_v58  ;;  %v3126_v63 = vld [vmem:[%s3380_s19 + $0x140] sm:$0xff]  ;;  %v3128_v30 = vld [vmem:[%s3380_s19 + $0x150] sm:$0xff]  ;;  %v3129_v16 = vld [vmem:[%s3380_s19 + $0x158] sm:$0xff] }
 0x6cb   : > { %3150 = vst [vmem:[%s4643_s17 + $0x100] sm:$0xff] %v2886_v46  ;;  %3178 = vst [vmem:[%s4643_s17 + $0x1e0] sm:$0xff] %v2914_v45  ;;  %v2887_v40 = vsel %vm2823_vm6, %v2791_v50, %v2855_v1  ;;  %v2915_v22 = vsel %vm2851_vm7, %v2819_v3, %v2883_v37  ;;  %v2793_v19 = vadd.f32 %v3121_v51, %v2686_v0  ;;  %v2689_v5 = vpop.f32.mrb[52].mxu0 }
 0x6cc   : > { %v2821_v26 = vadd.f32 %v3149_v57, %v2756_v18  ;;  %3151 = vst [vmem:[%s4643_s17 + $0x108] sm:$0xff] %v2887_v40  ;;  %3179 = vst [vmem:[%s4643_s17 + $0x1e8] sm:$0xff] %v2915_v22  ;;  %vm2824_vm1 = vcmp.gt.f32.partialorder %v2792_v61, 0.0  ;;  %v2856_v29 = vmul.f32 0.01, %v2792_v61  ;;  %vm2852_vm2 = vcmp.gt.f32.partialorder %v2820_v52, 0.0 }
 0x6cd   : > { %v2884_v14 = vmul.f32 0.01, %v2820_v52  ;;  %vm2825_vm8 = vcmp.gt.f32.partialorder %v2793_v19, 0.0  ;;  %v2857_v39 = vmul.f32 0.01, %v2793_v19  ;;  %v2690_v32 = vadd.f32 %v2689_v5, %v4778_v34  ;;  %v2691_v23 = vpop.f32.mrb[53].mxu0 }
 0x6ce   : > { %vm2853_vm9 = vcmp.gt.f32.partialorder %v2821_v26, 0.0  ;;  %v2885_v41 = vmul.f32 0.01, %v2821_v26  ;;  %v2888_v55 = vsel %vm2824_vm1, %v2792_v61, %v2856_v29  ;;  %v2692_v13 = vadd.f32 %v2691_v23, %v4778_v34  ;;  %v2693_v62 = vpop.f32.mrb[54].mxu0 }
 0x6cf   : > { %v2916_v25 = vsel %vm2852_vm2, %v2820_v52, %v2884_v14  ;;  %3152 = vst [vmem:[%s4643_s17 + $0x110] sm:$0xff] %v2888_v55  ;;  %v2889_v12 = vsel %vm2825_vm8, %v2793_v19, %v2857_v39  ;;  %v2794_v44 = vadd.f32 %v3122_v20, %v2690_v32  ;;  %v2694_v9 = vadd.f32 %v2693_v62, %v4780_v42  ;;  %v2695_v48 = vpop.f32.mrb[55].mxu0  ;;  %v3131_v14 = vld [vmem:[%s3380_s19 + $0x168] sm:$0xff] }
 0x6d0   : > { %3180 = vst [vmem:[%s4643_s17 + $0x1f0] sm:$0xff] %v2916_v25  ;;  %v2917_v38 = vsel %vm2853_vm9, %v2821_v26, %v2885_v41  ;;  %3153 = vst [vmem:[%s4643_s17 + $0x118] sm:$0xff] %v2889_v12  ;;  %v2795_v31 = vadd.f32 %v3123_v6, %v2692_v13  ;;  %v2696_v4 = vadd.f32 %v2695_v48, %v4780_v42  ;;  %v3130_v26 = vld [vmem:[%s3380_s19 + $0x160] sm:$0xff]  ;;  %v3132_v25 = vld [vmem:[%s3380_s19 + $0x170] sm:$0xff] }
 0x6d1   : > { %3181 = vst [vmem:[%s4643_s17 + $0x1f8] sm:$0xff] %v2917_v38  ;;  %vm2826_vm10 = vcmp.gt.f32.partialorder %v2794_v44, 0.0  ;;  %v2858_v24 = vmul.f32 0.01, %v2794_v44  ;;  %v2796_v56 = vadd.f32 %v3124_v36, %v2694_v9  ;;  %v3133_v12 = vld [vmem:[%s3380_s19 + $0x178] sm:$0xff] }
 0x6d2   : > { %vm2827_vm11 = vcmp.gt.f32.partialorder %v2795_v31, 0.0  ;;  %v2859_v34 = vmul.f32 0.01, %v2795_v31  ;;  %v2797_v33 = vadd.f32 %v3125_v49, %v2696_v4 }
 0x6d3   : > { %v2699_v21 = vpop.f32.mrb[56].mxu0  ;;  %v2890_v17 = vsel %vm2826_vm10, %v2794_v44, %v2858_v24  ;;  %vm2828_vm12 = vcmp.gt.f32.partialorder %v2796_v56, 0.0  ;;  %v2860_v43 = vmul.f32 0.01, %v2796_v56 }
 0x6d4   : > { %v2700_v60 = vadd.f32 %v2699_v21, %v4782_v35  ;;  %v2701_v58 = vpop.f32.mrb[57].mxu0  ;;  %3154 = vst [vmem:[%s4643_s17 + $0x120] sm:$0xff] %v2890_v17  ;;  %v2891_v42 = vsel %vm2827_vm11, %v2795_v31, %v2859_v34  ;;  %vm2829_vm13 = vcmp.gt.f32.partialorder %v2797_v33, 0.0  ;;  %v2861_v27 = vmul.f32 0.01, %v2797_v33 }
 0x6d5   : > { %v2702_v50 = vadd.f32 %v2701_v58, %v4782_v35  ;;  %v2703_v3 = vpop.f32.mrb[58].mxu0  ;;  %3155 = vst [vmem:[%s4643_s17 + $0x128] sm:$0xff] %v2891_v42  ;;  %v2892_v0 = vsel %vm2828_vm12, %v2796_v56, %v2860_v43  ;;  %v3136_v43 = vld [vmem:[%s3380_s19 + $0x190] sm:$0xff]  ;;  %v3137_v42 = vld [vmem:[%s3380_s19 + $0x198] sm:$0xff] }
 0x6d6   : > { %v2798_v51 = vadd.f32 %v3126_v63, %v2700_v60  ;;  %v2704_v18 = vadd.f32 %v2703_v3, %v4784_v8  ;;  %v2705_v57 = vpop.f32.mrb[59].mxu0  ;;  %3156 = vst [vmem:[%s4643_s17 + $0x130] sm:$0xff] %v2892_v0  ;;  %v2893_v59 = vsel %vm2829_vm13, %v2797_v33, %v2861_v27  ;;  %v3135_v33 = vld [vmem:[%s3380_s19 + $0x188] sm:$0xff] }
 0x6d7   : > { %v2799_v1 = vadd.f32 %v3127_v11, %v2702_v50  ;;  %v2706_v37 = vadd.f32 %v2705_v57, %v4784_v8  ;;  %3157 = vst [vmem:[%s4643_s17 + $0x138] sm:$0xff] %v2893_v59 }
 0x6d8   : > { %vm2830_vm14 = vcmp.gt.f32.partialorder %v2798_v51, 0.0  ;;  %v2862_v35 = vmul.f32 0.01, %v2798_v51  ;;  %v2800_v46 = vadd.f32 %v3128_v30, %v2704_v18 }
 0x6d9   : > { %vm2831_vm15 = vcmp.gt.f32.partialorder %v2799_v1, 0.0  ;;  %v2863_v45 = vmul.f32 0.01, %v2799_v1  ;;  %v2801_v61 = vadd.f32 %v3129_v16, %v2706_v37 }
 0x6da   : > { %v2894_v52 = vsel %vm2830_vm14, %v2798_v51, %v2862_v35  ;;  %vm2832_vm3 = vcmp.gt.f32.partialorder %v2800_v46, 0.0  ;;  %v2864_v40 = vmul.f32 0.01, %v2800_v46 }
 0x6db   : > { %3158 = vst [vmem:[%s4643_s17 + $0x140] sm:$0xff] %v2894_v52  ;;  %v2895_v22 = vsel %vm2831_vm15, %v2799_v1, %v2863_v45  ;;  %vm2833_vm4 = vcmp.gt.f32.partialorder %v2801_v61, 0.0  ;;  %v2865_v8 = vmul.f32 0.01, %v2801_v61  ;;  %v2709_v19 = vpop.f32.mrb[60].mxu0 }
 0x6dc   : > { %3159 = vst [vmem:[%s4643_s17 + $0x148] sm:$0xff] %v2895_v22  ;;  %v2896_v5 = vsel %vm2832_vm3, %v2800_v46, %v2864_v40  ;;  %v2710_v20 = vadd.f32 %v2709_v19, %v4786_v10  ;;  %v2711_v29 = vpop.f32.mrb[61].mxu0  ;;  %v3139_v46 = vld [vmem:[%s3380_s19 + $0x1a8] sm:$0xff]  ;;  %v3140_v40 = vld [vmem:[%s3380_s19 + $0x1b0] sm:$0xff] }
 0x6dd   : > { %3160 = vst [vmem:[%s4643_s17 + $0x150] sm:$0xff] %v2896_v5  ;;  %v2897_v39 = vsel %vm2833_vm4, %v2801_v61, %v2865_v8  ;;  %v2712_v41 = vadd.f32 %v2711_v29, %v4786_v10  ;;  %v2713_v55 = vpop.f32.mrb[62].mxu0 }
 0x6de   : > { %3161 = vst [vmem:[%s4643_s17 + $0x158] sm:$0xff] %v2897_v39  ;;  %v2802_v32 = vadd.f32 %v3130_v26, %v2710_v20  ;;  %v2714_v23 = vadd.f32 %v2713_v55, %v4788_v54  ;;  %v2715_v6 = vpop.f32.mrb[63].mxu0  ;;  %v3141_v26 = vld [vmem:[%s3380_s19 + $0x1b8] sm:$0xff] }
 0x6df   : > { %v2803_v38 = vadd.f32 %v3131_v14, %v2712_v41  ;;  %v2716_v13 = vadd.f32 %v2715_v6, %v4788_v54  ;;  %v3134_v54 = vld [vmem:[%s3380_s19 + $0x180] sm:$0xff] }
 0x6e0   : > { %vm2834_vm0 = vcmp.gt.f32.partialorder %v2802_v32, 0.0  ;;  %v2866_v62 = vmul.f32 0.01, %v2802_v32  ;;  %v2804_v36 = vadd.f32 %v3132_v25, %v2714_v23 }
 0x6e1   : > { %vm2835_vm5 = vcmp.gt.f32.partialorder %v2803_v38, 0.0  ;;  %v2867_v10 = vmul.f32 0.01, %v2803_v38  ;;  %v2805_v44 = vadd.f32 %v3133_v12, %v2716_v13  ;;  %v3143_v13 = vld [vmem:[%s3380_s19 + $0x1c8] sm:$0xff] }
 0x6e2   : > { %v2898_v9 = vsel %vm2834_vm0, %v2802_v32, %v2866_v62  ;;  %vm2836_vm6 = vcmp.gt.f32.partialorder %v2804_v36, 0.0  ;;  %v2868_v48 = vmul.f32 0.01, %v2804_v36 }
 0x6e3   : > { %3162 = vst [vmem:[%s4643_s17 + $0x160] sm:$0xff] %v2898_v9  ;;  %v2899_v49 = vsel %vm2835_vm5, %v2803_v38, %v2867_v10  ;;  %vm2837_vm7 = vcmp.gt.f32.partialorder %v2805_v44, 0.0  ;;  %v2869_v31 = vmul.f32 0.01, %v2805_v44  ;;  %v2719_v4 = vpop.f32.mrb[64].mxu0 }
 0x6e4   : > { %3163 = vst [vmem:[%s4643_s17 + $0x168] sm:$0xff] %v2899_v49  ;;  %v2900_v24 = vsel %vm2836_vm6, %v2804_v36, %v2868_v48  ;;  %v2720_v56 = vadd.f32 %v2719_v4, %v4790_v53  ;;  %v2721_v34 = vpop.f32.mrb[65].mxu0 }
 0x6e5   : > { %3164 = vst [vmem:[%s4643_s17 + $0x170] sm:$0xff] %v2900_v24  ;;  %v2901_v21 = vsel %vm2837_vm7, %v2805_v44, %v2869_v31  ;;  %v2722_v63 = vadd.f32 %v2721_v34, %v4790_v53  ;;  %v2723_v17 = vpop.f32.mrb[66].mxu0  ;;  %v3144_v44 = vld [vmem:[%s3380_s19 + $0x1d0] sm:$0xff]  ;;  %v3145_v31 = vld [vmem:[%s3380_s19 + $0x1d8] sm:$0xff] }
 0x6e6   : > { %3165 = vst [vmem:[%s4643_s17 + $0x178] sm:$0xff] %v2901_v21  ;;  %v2806_v60 = vadd.f32 %v3134_v54, %v2720_v56  ;;  %v2724_v58 = vadd.f32 %v2723_v17, %v4792_v28  ;;  %v2725_v11 = vpop.f32.mrb[67].mxu0 }
 0x6e7   : > { %v2807_v27 = vadd.f32 %v3135_v33, %v2722_v63  ;;  %v2726_v50 = vadd.f32 %v2725_v11, %v4792_v28  ;;  %v3138_v28 = vld [vmem:[%s3380_s19 + $0x1a0] sm:$0xff] }
 0x6e8   : > { %vm2838_vm1 = vcmp.gt.f32.partialorder %v2806_v60, 0.0  ;;  %v2870_v3 = vmul.f32 0.01, %v2806_v60  ;;  %v2808_v30 = vadd.f32 %v3136_v43, %v2724_v58 }
 0x6e9   : > { %vm2839_vm2 = vcmp.gt.f32.partialorder %v2807_v27, 0.0  ;;  %v2871_v53 = vmul.f32 0.01, %v2807_v27  ;;  %v2809_v0 = vadd.f32 %v3137_v42, %v2726_v50 }
 0x6ea   : > { %v2902_v51 = vsel %vm2838_vm1, %v2806_v60, %v2870_v3  ;;  %vm2840_vm8 = vcmp.gt.f32.partialorder %v2808_v30, 0.0  ;;  %v2872_v18 = vmul.f32 0.01, %v2808_v30 }
 0x6eb   : > { %3166 = vst [vmem:[%s4643_s17 + $0x180] sm:$0xff] %v2902_v51  ;;  %v2903_v57 = vsel %vm2839_vm2, %v2807_v27, %v2871_v53  ;;  %vm2841_vm9 = vcmp.gt.f32.partialorder %v2809_v0, 0.0  ;;  %v2873_v16 = vmul.f32 0.01, %v2809_v0  ;;  %v2729_v59 = vpop.f32.mrb[68].mxu0 }
 0x6ec   : > { %3167 = vst [vmem:[%s4643_s17 + $0x188] sm:$0xff] %v2903_v57  ;;  %v2904_v1 = vsel %vm2840_vm8, %v2808_v30, %v2872_v18  ;;  %v2730_v37 = vadd.f32 %v2729_v59, %v4794_v47  ;;  %v2731_v35 = vpop.f32.mrb[69].mxu0 }
 0x6ed   : > { %3168 = vst [vmem:[%s4643_s17 + $0x190] sm:$0xff] %v2904_v1  ;;  %v2905_v45 = vsel %vm2841_vm9, %v2809_v0, %v2873_v16  ;;  %v2732_v61 = vadd.f32 %v2731_v35, %v4794_v47  ;;  %v2733_v52 = vpop.f32.mrb[70].mxu0 }
 0x6ee   : > { %3169 = vst [vmem:[%s4643_s17 + $0x198] sm:$0xff] %v2905_v45  ;;  %v2810_v22 = vadd.f32 %v3138_v28, %v2730_v37  ;;  %v2734_v8 = vadd.f32 %v2733_v52, %v4796_v15  ;;  %v2735_v19 = vpop.f32.mrb[71].mxu0 }
 0x6ef   : > { %v2811_v5 = vadd.f32 %v3139_v46, %v2732_v61  ;;  %v2736_v20 = vadd.f32 %v2735_v19, %v4796_v15  ;;  %v3142_v15 = vld [vmem:[%s3380_s19 + $0x1c0] sm:$0xff] }
 0x6f0   : > { %vm2842_vm10 = vcmp.gt.f32.partialorder %v2810_v22, 0.0  ;;  %v2874_v29 = vmul.f32 0.01, %v2810_v22  ;;  %v2812_v14 = vadd.f32 %v3140_v40, %v2734_v8 }
 0x6f1   : > { %vm2843_vm11 = vcmp.gt.f32.partialorder %v2811_v5, 0.0  ;;  %v2875_v47 = vmul.f32 0.01, %v2811_v5  ;;  %v2813_v39 = vadd.f32 %v3141_v26, %v2736_v20 }
 0x6f2   : > { %v2906_v41 = vsel %vm2842_vm10, %v2810_v22, %v2874_v29  ;;  %vm2844_vm12 = vcmp.gt.f32.partialorder %v2812_v14, 0.0  ;;  %v2876_v55 = vmul.f32 0.01, %v2812_v14 }
 0x6f3   : > { %3170 = vst [vmem:[%s4643_s17 + $0x1a0] sm:$0xff] %v2906_v41  ;;  %v2907_v25 = vsel %vm2843_vm11, %v2811_v5, %v2875_v47  ;;  %vm2845_vm13 = vcmp.gt.f32.partialorder %v2813_v39, 0.0  ;;  %v2877_v32 = vmul.f32 0.01, %v2813_v39  ;;  %v2739_v23 = vpop.f32.mrb[72].mxu0 }
 0x6f4   : > { %3171 = vst [vmem:[%s4643_s17 + $0x1a8] sm:$0xff] %v2907_v25  ;;  %v2908_v6 = vsel %vm2844_vm12, %v2812_v14, %v2876_v55  ;;  %v2740_v12 = vadd.f32 %v2739_v23, %v4798_v7  ;;  %v2741_v38 = vpop.f32.mrb[73].mxu0 }
 0x6f5   : > { %3172 = vst [vmem:[%s4643_s17 + $0x1b0] sm:$0xff] %v2908_v6  ;;  %v2909_v62 = vsel %vm2845_vm13, %v2813_v39, %v2877_v32  ;;  %v2742_v36 = vadd.f32 %v2741_v38, %v4798_v7  ;;  %v2743_v10 = vpop.f32.mrb[74].mxu0 }
 0x6f6   : > { %3173 = vst [vmem:[%s4643_s17 + $0x1b8] sm:$0xff] %v2909_v62  ;;  %v2814_v9 = vadd.f32 %v3142_v15, %v2740_v12  ;;  %v2744_v48 = vadd.f32 %v2743_v10, %v4800_v2  ;;  %v2745_v49 = vpop.f32.mrb[75].mxu0 }
 0x6f7   : > { %v2815_v4 = vadd.f32 %v3143_v13, %v2742_v36  ;;  %v2746_v54 = vadd.f32 %v2745_v49, %v4800_v2 }
 0x6f8   : > { %vm2846_vm14 = vcmp.gt.f32.partialorder %v2814_v9, 0.0  ;;  %v2878_v24 = vmul.f32 0.01, %v2814_v9  ;;  %v2816_v56 = vadd.f32 %v3144_v44, %v2744_v48 }
 0x6f9   : > { %vm2847_vm15 = vcmp.gt.f32.partialorder %v2815_v4, 0.0  ;;  %v2879_v7 = vmul.f32 0.01, %v2815_v4  ;;  %v2817_v34 = vadd.f32 %v3145_v31, %v2746_v54 }
 0x6fa   : > { %v2910_v33 = vsel %vm2846_vm14, %v2814_v9, %v2878_v24  ;;  %vm2848_vm3 = vcmp.gt.f32.partialorder %v2816_v56, 0.0  ;;  %v2880_v21 = vmul.f32 0.01, %v2816_v56 }
 0x6fb   : > { %3174 = vst [vmem:[%s4643_s17 + $0x1c0] sm:$0xff] %v2910_v33  ;;  %v2911_v63 = vsel %vm2847_vm15, %v2815_v4, %v2879_v7  ;;  %vm2849_vm4 = vcmp.gt.f32.partialorder %v2817_v34, 0.0  ;;  %v2881_v17 = vmul.f32 0.01, %v2817_v34 }
 0x6fc   : > { %3175 = vst [vmem:[%s4643_s17 + $0x1c8] sm:$0xff] %v2911_v63  ;;  %v2912_v43 = vsel %vm2848_vm3, %v2816_v56, %v2880_v21 }
 0x6fd   : > { %3176 = vst [vmem:[%s4643_s17 + $0x1d0] sm:$0xff] %v2912_v43  ;;  %v2913_v60 = vsel %vm2849_vm4, %v2817_v34, %v2881_v17 }
 0x6fe   : > { %3177 = vst [vmem:[%s4643_s17 + $0x1d8] sm:$0xff] %v2913_v60 }
 0x6ff PF: > { %s18_s27 = sadd.s32 1, %s3283_s27  }
 0x700   : > { %p15_p4 = scmp.ge.s32.totalorder %s18_s27, 4  }
 0x702   :  { %17 = sbr.rel (!%p15_p4) target bundleno = 1 (0x1), region = 91 }

</bundles_post_ra>
